<compile_context>
chip_gen: v6e
topology: v6e:2x2x1
jax: 0.10.0
libtpu: 0.0.40
codegen_flags: <defaults>
</compile_context>

<pallas_src>
import functools

import jax
import jax.numpy as jnp
from jax.experimental import pallas as pl
from jax.experimental.pallas import tpu as pltpu


# ----------------------------- kernel helpers --------------------------------

def _attention_ffn(x_sd, wqkv, bqkv, wo, bo, wff, bff, *, nhead):
    """relu(Linear_ff(MHA(x, x, x))) for one (seq, d_model) sequence.

    x_sd : (S, Dm)        f32 activations
    wqkv : (3, H, Dm, dh) bf16 per-head Q/K/V weights; 1/sqrt(dh) already
                          folded into the Q slab (and its bias).
    bqkv : (3, H, 1, dh)  f32
    wo   : (H, dh, Dm)    bf16 per-head output-projection slabs
    bo   : (1, Dm)        f32
    wff  : (Dm, Dff)      bf16
    bff  : (1, Dff)       f32
    """
    seq, d_model = x_sd.shape
    xh = jnp.broadcast_to(x_sd.astype(jnp.bfloat16)[None],
                          (nhead, seq, d_model))

    # Head-batched projections: one batched matmul each for Q/K/V -- no fused
    # QKV result to lane-slice, no per-head slices at 8-lane offsets.
    q = jnp.einsum("hsd,hde->hse", xh, wqkv[0],
                   preferred_element_type=jnp.float32) + bqkv[0]
    k = jnp.einsum("hsd,hde->hse", xh, wqkv[1],
                   preferred_element_type=jnp.float32) + bqkv[1]
    v = jnp.einsum("hsd,hde->hse", xh, wqkv[2],
                   preferred_element_type=jnp.float32) + bqkv[2]

    # Scores for every head in one batched einsum (scale already in q).
    s = jnp.einsum("hqd,hkd->hqk", q.astype(jnp.bfloat16),
                   k.astype(jnp.bfloat16), preferred_element_type=jnp.float32)
    s = s - jnp.max(s, axis=-1, keepdims=True)
    p = jnp.exp(s)
    p = p * pl.reciprocal(jnp.sum(p, axis=-1, keepdims=True), approx=True)

    pv = jnp.einsum("hqk,hkd->hqd", p.astype(jnp.bfloat16),
                    v.astype(jnp.bfloat16), preferred_element_type=jnp.float32)

    # Per-head output projection as one head-batched matmul, then a cheap
    # leading-axis accumulation (== concat(heads) @ Wo without a lane concat).
    oh = jnp.einsum("hqd,hdm->hqm", pv.astype(jnp.bfloat16), wo,
                    preferred_element_type=jnp.float32)          # (H, S, Dm)
    attn = sum(oh[h] for h in range(nhead)) + bo                 # (S, Dm)

    ff = jnp.dot(attn.astype(jnp.bfloat16), wff,
                 preferred_element_type=jnp.float32) + bff       # (S, Dff)
    return jnp.maximum(ff, 0.0)


def _detector_kernel(x_ref,
                     e_wqkv_ref, e_bqkv_ref, e_wo_ref, e_bo_ref, e_wff_ref,
                     e_bff_ref,
                     d_wqkv_ref, d_bqkv_ref, d_wo_ref, d_bo_ref, d_wff_ref,
                     d_bff_ref,
                     fc_w_ref, fc_b_ref,
                     o_ref, *, nhead, seq, batch_block):
    enc = (e_wqkv_ref[...], e_bqkv_ref[...], e_wo_ref[...], e_bo_ref[...],
           e_wff_ref[...], e_bff_ref[...])
    dec = (d_wqkv_ref[...], d_bqkv_ref[...], d_wo_ref[...], d_bo_ref[...],
           d_wff_ref[...], d_bff_ref[...])
    fc_w = fc_w_ref[...]
    fc_b = fc_b_ref[...]

    # Static unroll over the batch elements of this block (attention couples
    # rows within one sequence only). All slices are 8-aligned sublane slices.
    for b in range(batch_block):
        rows = slice(b * seq, (b + 1) * seq)
        x = x_ref[rows, :]                                       # (S, D)
        h = _attention_ffn(x, *enc, nhead=nhead)                 # encoder
        h = _attention_ffn(h, *dec, nhead=nhead)                 # decoder
        y = jnp.dot(h.astype(jnp.bfloat16), fc_w,
                    preferred_element_type=jnp.float32) + fc_b   # (S, 128)
        o_ref[rows, :] = y.astype(o_ref.dtype)                   # full-lane store


# ------------------------------- wrapper --------------------------------------

def _pick_batch_block(batch, seq):
    """Rows-per-grid-step policy.

    Keep the whole batch in one grid step while it is small (each extra grid
    step costs ~0.35us, which dominates at micro sizes); once a block carries
    enough rows, split the batch across a "parallel" grid axis so v7x's second
    TensorCore gets used as the problem scales.
    """
    if batch * seq <= 1024:
        return batch
    bb = max(1, 512 // seq)
    while batch % bb:
        bb -= 1
    return bb


def transformer_anomaly_detector(x, packed, *, nhead, batch_block=None):
    """x: (B, S, D) float32.  packed: dict from pack_params()."""
    B, S, D = x.shape
    Hd = packed["e_wff"].shape[1]
    assert D == Hd, "reference module only type-checks when input_dim == hidden_dim"
    O = packed["out_dim"]
    O_pad = packed["fc_w"].shape[1]
    if batch_block is None:
        batch_block = _pick_batch_block(B, S)
    assert B % batch_block == 0
    grid = (B // batch_block,)
    rows = batch_block * S
    BS = B * S

    weight_names = ("e_wqkv", "e_bqkv", "e_wo", "e_bo", "e_wff", "e_bff",
                    "d_wqkv", "d_bqkv", "d_wo", "d_bo", "d_wff", "d_bff",
                    "fc_w", "fc_b")
    weights = [packed[n] for n in weight_names]

    def _resident(arr):
        # Full-array block with a constant index map: DMA'd once, stays in
        # VMEM across all grid steps (no per-step weight refetch).
        n = arr.ndim
        return pl.BlockSpec(arr.shape, lambda i, _n=n: (0,) * _n)

    in_specs = ([pl.BlockSpec((rows, D), lambda i: (i, 0))]
                + [_resident(w) for w in weights])
    out_specs = pl.BlockSpec((rows, O_pad), lambda i: (i, 0))

    # Rough cost hint for the XLA scheduler.
    def _layer_flops(dm, dff):
        f = 3 * 2 * BS * dm * dm          # q/k/v projections
        f += 2 * 2 * BS * S * dm          # scores + p@v
        f += 2 * BS * dm * dm             # output projection
        f += 2 * BS * dm * dff            # feed-forward
        return f

    flops = _layer_flops(D, Hd) + _layer_flops(Hd, Hd) + 2 * BS * Hd * O_pad
    transcendentals = 2 * (B * nhead * S * S + B * nhead * S)
    bytes_accessed = (4 * BS * (D + O_pad)
                      + sum(w.size * w.dtype.itemsize for w in weights))

    out2d = pl.pallas_call(
        functools.partial(_detector_kernel, nhead=nhead, seq=S,
                          batch_block=batch_block),
        grid=grid,
        in_specs=in_specs,
        out_specs=out_specs,
        out_shape=jax.ShapeDtypeStruct((BS, O_pad), jnp.float32),
        compiler_params=pltpu.CompilerParams(
            dimension_semantics=("parallel",),
            # TODO(synk): at realistic d_model pick this per generation
            # (<=48 MiB on v7x, ~100 MiB usable on v5e/v6e) and tile weight N.
            vmem_limit_bytes=32 * 1024 * 1024),
        cost_estimate=pl.CostEstimate(flops=int(flops),
                                      transcendentals=int(transcendentals),
                                      bytes_accessed=int(bytes_accessed)),
    )(x.reshape(BS, D), *weights)

    return out2d[:, :O].reshape(B, S, O)


# -------------------------- parameter construction ----------------------------

def init_params(key, input_dim, hidden_dim, output_dim):
    """Raw (unpacked, f32) parameters; consumed by the pure-JAX reference."""
    D, Hd, O = input_dim, hidden_dim, output_dim
    ks = jax.random.split(key, 10)

    def lin(k, fan_in, fan_out):
        return (jax.random.normal(k, (fan_in, fan_out), jnp.float32)
                * (1.0 / jnp.sqrt(fan_in)))

    p = {}
    # encoder MHA + feed-forward
    p["e_wqkv"] = lin(ks[0], D, 3 * D)
    p["e_bqkv"] = jnp.zeros((1, 3 * D), jnp.float32)
    p["e_wo"] = lin(ks[1], D, D)
    p["e_bo"] = jnp.zeros((1, D), jnp.float32)
    p["e_wff"] = lin(ks[2], D, Hd)
    p["e_bff"] = 0.01 * jax.random.normal(ks[3], (1, Hd), jnp.float32)
    # decoder MHA + feed-forward (d_model == hidden_dim == input_dim here)
    p["d_wqkv"] = lin(ks[4], Hd, 3 * Hd)
    p["d_bqkv"] = jnp.zeros((1, 3 * Hd), jnp.float32)
    p["d_wo"] = lin(ks[5], Hd, Hd)
    p["d_bo"] = jnp.zeros((1, Hd), jnp.float32)
    p["d_wff"] = lin(ks[6], Hd, Hd)
    p["d_bff"] = 0.01 * jax.random.normal(ks[7], (1, Hd), jnp.float32)
    # final fc
    p["fc_w"] = lin(ks[8], Hd, O)
    p["fc_b"] = 0.01 * jax.random.normal(ks[9], (1, O), jnp.float32)
    return p


def pack_params(p, nhead):
    """One-time preprocessing into the kernel's per-head, bf16, lane-aligned layout."""

    def mha_pack(wqkv, bqkv, wo, d_model):
        dh = d_model // nhead
        scale = 1.0 / float(dh) ** 0.5

        def per_head_w(w):                       # (Dm, Dm) -> (H, Dm, dh)
            return w.reshape(d_model, nhead, dh).transpose(1, 0, 2)

        def per_head_b(bvec):                    # (1, Dm) -> (H, 1, dh)
            return bvec.reshape(nhead, 1, dh)

        wq = per_head_w(wqkv[:, 0:d_model]) * scale       # fold attention scale
        wk = per_head_w(wqkv[:, d_model:2 * d_model])
        wv = per_head_w(wqkv[:, 2 * d_model:3 * d_model])
        bq = per_head_b(bqkv[:, 0:d_model]) * scale
        bk = per_head_b(bqkv[:, d_model:2 * d_model])
        bv = per_head_b(bqkv[:, 2 * d_model:3 * d_model])
        wqkv_h = jnp.stack([wq, wk, wv], axis=0).astype(jnp.bfloat16)
        bqkv_h = jnp.stack([bq, bk, bv], axis=0)                       # f32
        wo_h = wo.reshape(nhead, dh, d_model).astype(jnp.bfloat16)
        return wqkv_h, bqkv_h, wo_h

    D = p["e_wqkv"].shape[0]
    Hd = p["e_wff"].shape[1]
    O = p["fc_w"].shape[1]
    O_pad = max(128, ((O + 127) // 128) * 128)            # lane-dense output slab

    e_wqkv, e_bqkv, e_wo = mha_pack(p["e_wqkv"], p["e_bqkv"], p["e_wo"], D)
    d_wqkv, d_bqkv, d_wo = mha_pack(p["d_wqkv"], p["d_bqkv"], p["d_wo"], Hd)

    return {
        "e_wqkv": e_wqkv, "e_bqkv": e_bqkv, "e_wo": e_wo,
        "e_bo": p["e_bo"],
        "e_wff": p["e_wff"].astype(jnp.bfloat16), "e_bff": p["e_bff"],
        "d_wqkv": d_wqkv, "d_bqkv": d_bqkv, "d_wo": d_wo,
        "d_bo": p["d_bo"],
        "d_wff": p["d_wff"].astype(jnp.bfloat16), "d_bff": p["d_bff"],
        "fc_w": jnp.pad(p["fc_w"], ((0, 0), (0, O_pad - O))).astype(jnp.bfloat16),
        "fc_b": jnp.pad(p["fc_b"], ((0, 0), (0, O_pad - O))),
        "out_dim": O,
    }


# ---------------------------- pure-JAX reference ------------------------------

def _ref_mha_ffn(x, wqkv, bqkv, wo, bo, wff, bff, nhead):
    S, D = x.shape
    dh = D // nhead
    qkv = x @ wqkv + bqkv
    q, k, v = qkv[:, :D], qkv[:, D:2 * D], qkv[:, 2 * D:]
    outs = []
    for h in range(nhead):
        qh = q[:, h * dh:(h + 1) * dh]
        kh = k[:, h * dh:(h + 1) * dh]
        vh = v[:, h * dh:(h + 1) * dh]
        s = (qh @ kh.T) / (dh ** 0.5)
        pr = jax.nn.softmax(s, axis=-1)
        outs.append(pr @ vh)
    attn = jnp.concatenate(outs, axis=-1) @ wo + bo
    return jax.nn.relu(attn @ wff + bff)


def reference(x, p, nhead):
    def one(xb):
        h = _ref_mha_ffn(xb, p["e_wqkv"], p["e_bqkv"], p["e_wo"], p["e_bo"],
                         p["e_wff"], p["e_bff"], nhead)
        h = _ref_mha_ffn(h, p["d_wqkv"], p["d_bqkv"], p["d_wo"], p["d_bo"],
                         p["d_wff"], p["d_bff"], nhead)
        return h @ p["fc_w"] + p["fc_b"]
    return jax.vmap(one)(x)


# --------------------------------- main ----------------------------------------

if __name__ == "__main__":
    B, S = 2, 8
    input_dim = hidden_dim = 32          # must be equal (see note above)
    output_dim = 8
    num_heads = 4

    key = jax.random.PRNGKey(0)
    kx, kp = jax.random.split(key)
    x = jax.random.normal(kx, (B, S, input_dim), jnp.float32)
    params = init_params(kp, input_dim, hidden_dim, output_dim)
    packed = pack_params(params, num_heads)

    out = transformer_anomaly_detector(x, packed, nhead=num_heads)
    out = jax.block_until_ready(out)

    ref = jax.block_until_ready(reference(x, params, num_heads))
    assert out.shape == (B, S, output_dim)
    # Matmul operands are bf16 (MXU-native, per perf review) with f32
    # accumulation, and the softmax denominator uses the EUP approximate
    # reciprocal; agreement with the exact-f32 reference is therefore bounded
    # by bf16 operand rounding through two attention+FF layers.
    assert jnp.allclose(out, ref, atol=3e-2, rtol=3e-2), (
        float(jnp.max(jnp.abs(out - ref))))

    print("KERNEL_OK")
</pallas_src>

<mosaic_0001>
module attributes {stable_mosaic.version = 11 : i64} {
  func.func @_detector_kernel(%arg0: i32, %arg1: memref<16x32xf32, #tpu.memory_space<vmem>>, %arg2: memref<3x4x32x8xbf16, #tpu.memory_space<vmem>>, %arg3: memref<3x4x1x8xf32, #tpu.memory_space<vmem>>, %arg4: memref<4x8x32xbf16, #tpu.memory_space<vmem>>, %arg5: memref<1x32xf32, #tpu.memory_space<vmem>>, %arg6: memref<32x32xbf16, #tpu.memory_space<vmem>>, %arg7: memref<1x32xf32, #tpu.memory_space<vmem>>, %arg8: memref<3x4x32x8xbf16, #tpu.memory_space<vmem>>, %arg9: memref<3x4x1x8xf32, #tpu.memory_space<vmem>>, %arg10: memref<4x8x32xbf16, #tpu.memory_space<vmem>>, %arg11: memref<1x32xf32, #tpu.memory_space<vmem>>, %arg12: memref<32x32xbf16, #tpu.memory_space<vmem>>, %arg13: memref<1x32xf32, #tpu.memory_space<vmem>>, %arg14: memref<32x128xbf16, #tpu.memory_space<vmem>>, %arg15: memref<1x128xf32, #tpu.memory_space<vmem>>, %arg16: memref<16x128xf32, #tpu.memory_space<vmem>>) attributes {dimension_semantics = [#tpu.dimension_semantics<parallel>], iteration_bounds = array<i64: 1>, scalar_prefetch = 0 : i64, scratch_operands = 0 : i64, tpu.core_type = #tpu.core_type<tc>, window_params = [{transform_indices = @transform_0, window_bounds = array<i64: 16, 32>}, {pipeline_mode = #tpu.pipeline_mode<synchronous>, transform_indices = @transform_1, window_bounds = array<i64: 3, 4, 32, 8>}, {pipeline_mode = #tpu.pipeline_mode<synchronous>, transform_indices = @transform_2, window_bounds = array<i64: 3, 4, 1, 8>}, {pipeline_mode = #tpu.pipeline_mode<synchronous>, transform_indices = @transform_3, window_bounds = array<i64: 4, 8, 32>}, {pipeline_mode = #tpu.pipeline_mode<synchronous>, transform_indices = @transform_4, window_bounds = array<i64: 1, 32>}, {pipeline_mode = #tpu.pipeline_mode<synchronous>, transform_indices = @transform_5, window_bounds = array<i64: 32, 32>}, {pipeline_mode = #tpu.pipeline_mode<synchronous>, transform_indices = @transform_6, window_bounds = array<i64: 1, 32>}, {pipeline_mode = #tpu.pipeline_mode<synchronous>, transform_indices = @transform_7, window_bounds = array<i64: 3, 4, 32, 8>}, {pipeline_mode = #tpu.pipeline_mode<synchronous>, transform_indices = @transform_8, window_bounds = array<i64: 3, 4, 1, 8>}, {pipeline_mode = #tpu.pipeline_mode<synchronous>, transform_indices = @transform_9, window_bounds = array<i64: 4, 8, 32>}, {pipeline_mode = #tpu.pipeline_mode<synchronous>, transform_indices = @transform_10, window_bounds = array<i64: 1, 32>}, {pipeline_mode = #tpu.pipeline_mode<synchronous>, transform_indices = @transform_11, window_bounds = array<i64: 32, 32>}, {pipeline_mode = #tpu.pipeline_mode<synchronous>, transform_indices = @transform_12, window_bounds = array<i64: 1, 32>}, {pipeline_mode = #tpu.pipeline_mode<synchronous>, transform_indices = @transform_13, window_bounds = array<i64: 32, 128>}, {pipeline_mode = #tpu.pipeline_mode<synchronous>, transform_indices = @transform_14, window_bounds = array<i64: 1, 128>}, {transform_indices = @transform_15, window_bounds = array<i64: 16, 128>}]} {
    %c0 = arith.constant 0 : index
    %c0_0 = arith.constant 0 : index
    %c0_1 = arith.constant 0 : index
    %c0_2 = arith.constant 0 : index
    %0 = vector.load %arg2[%c0, %c0_0, %c0_1, %c0_2] : memref<3x4x32x8xbf16, #tpu.memory_space<vmem>>, vector<3x4x32x8xbf16>
    %c0_3 = arith.constant 0 : index
    %c0_4 = arith.constant 0 : index
    %c0_5 = arith.constant 0 : index
    %c0_6 = arith.constant 0 : index
    %1 = vector.load %arg3[%c0_3, %c0_4, %c0_5, %c0_6] : memref<3x4x1x8xf32, #tpu.memory_space<vmem>>, vector<3x4x1x8xf32>
    %c0_7 = arith.constant 0 : index
    %c0_8 = arith.constant 0 : index
    %c0_9 = arith.constant 0 : index
    %2 = vector.load %arg4[%c0_7, %c0_8, %c0_9] : memref<4x8x32xbf16, #tpu.memory_space<vmem>>, vector<4x8x32xbf16>
    %c0_10 = arith.constant 0 : index
    %c0_11 = arith.constant 0 : index
    %3 = vector.load %arg5[%c0_10, %c0_11] : memref<1x32xf32, #tpu.memory_space<vmem>>, vector<1x32xf32>
    %c0_12 = arith.constant 0 : index
    %c0_13 = arith.constant 0 : index
    %4 = vector.load %arg6[%c0_12, %c0_13] : memref<32x32xbf16, #tpu.memory_space<vmem>>, vector<32x32xbf16>
    %c0_14 = arith.constant 0 : index
    %c0_15 = arith.constant 0 : index
    %5 = vector.load %arg7[%c0_14, %c0_15] : memref<1x32xf32, #tpu.memory_space<vmem>>, vector<1x32xf32>
    %c0_16 = arith.constant 0 : index
    %c0_17 = arith.constant 0 : index
    %c0_18 = arith.constant 0 : index
    %c0_19 = arith.constant 0 : index
    %6 = vector.load %arg8[%c0_16, %c0_17, %c0_18, %c0_19] : memref<3x4x32x8xbf16, #tpu.memory_space<vmem>>, vector<3x4x32x8xbf16>
    %c0_20 = arith.constant 0 : index
    %c0_21 = arith.constant 0 : index
    %c0_22 = arith.constant 0 : index
    %c0_23 = arith.constant 0 : index
    %7 = vector.load %arg9[%c0_20, %c0_21, %c0_22, %c0_23] : memref<3x4x1x8xf32, #tpu.memory_space<vmem>>, vector<3x4x1x8xf32>
    %c0_24 = arith.constant 0 : index
    %c0_25 = arith.constant 0 : index
    %c0_26 = arith.constant 0 : index
    %8 = vector.load %arg10[%c0_24, %c0_25, %c0_26] : memref<4x8x32xbf16, #tpu.memory_space<vmem>>, vector<4x8x32xbf16>
    %c0_27 = arith.constant 0 : index
    %c0_28 = arith.constant 0 : index
    %9 = vector.load %arg11[%c0_27, %c0_28] : memref<1x32xf32, #tpu.memory_space<vmem>>, vector<1x32xf32>
    %c0_29 = arith.constant 0 : index
    %c0_30 = arith.constant 0 : index
    %10 = vector.load %arg12[%c0_29, %c0_30] : memref<32x32xbf16, #tpu.memory_space<vmem>>, vector<32x32xbf16>
    %c0_31 = arith.constant 0 : index
    %c0_32 = arith.constant 0 : index
    %11 = vector.load %arg13[%c0_31, %c0_32] : memref<1x32xf32, #tpu.memory_space<vmem>>, vector<1x32xf32>
    %c0_33 = arith.constant 0 : index
    %c0_34 = arith.constant 0 : index
    %12 = vector.load %arg14[%c0_33, %c0_34] : memref<32x128xbf16, #tpu.memory_space<vmem>>, vector<32x128xbf16>
    %c0_35 = arith.constant 0 : index
    %c0_36 = arith.constant 0 : index
    %13 = vector.load %arg15[%c0_35, %c0_36] : memref<1x128xf32, #tpu.memory_space<vmem>>, vector<1x128xf32>
    %c0_37 = arith.constant 0 : index
    %c0_38 = arith.constant 0 : index
    %14 = vector.load %arg1[%c0_37, %c0_38] : memref<16x32xf32, #tpu.memory_space<vmem>>, vector<8x32xf32>
    %15 = arith.truncf %14 : vector<8x32xf32> to vector<8x32xbf16>
    %16 = vector.shape_cast %15 : vector<8x32xbf16> to vector<1x8x32xbf16>
    %17 = vector.shape_cast %16 : vector<1x8x32xbf16> to vector<1x8x32xbf16>
    %18 = vector.broadcast %17 : vector<1x8x32xbf16> to vector<4x8x32xbf16>
    %19 = vector.extract_strided_slice %0 {offsets = [0, 0, 0, 0], sizes = [1, 4, 32, 8], strides = [1, 1, 1, 1]} : vector<3x4x32x8xbf16> to vector<1x4x32x8xbf16>
    %20 = vector.shape_cast %19 : vector<1x4x32x8xbf16> to vector<4x32x8xbf16>
    "tpu.trace_start"() <{level = 10 : i32, message = "hsd,hde->hse"}> : () -> ()
    %cst = arith.constant dense<0.000000e+00> : vector<4x8x8xf32>
    %21 = tpu.matmul %18, %20, %cst {dimension_numbers = #tpu.dot_dimension_numbers<[2], [1], [1], [2], [0, 0, 0, 1, 1, 2], [0], [0]>} : vector<4x8x32xbf16>, vector<4x32x8xbf16>, vector<4x8x8xf32> -> vector<4x8x8xf32>
    "tpu.trace_stop"() : () -> ()
    %22 = vector.extract_strided_slice %1 {offsets = [0, 0, 0, 0], sizes = [1, 4, 1, 8], strides = [1, 1, 1, 1]} : vector<3x4x1x8xf32> to vector<1x4x1x8xf32>
    %23 = vector.shape_cast %22 : vector<1x4x1x8xf32> to vector<4x1x8xf32>
    %24 = vector.broadcast %23 : vector<4x1x8xf32> to vector<4x8x8xf32>
    %25 = arith.addf %21, %24 : vector<4x8x8xf32>
    %26 = vector.extract_strided_slice %0 {offsets = [1, 0, 0, 0], sizes = [1, 4, 32, 8], strides = [1, 1, 1, 1]} : vector<3x4x32x8xbf16> to vector<1x4x32x8xbf16>
    %27 = vector.shape_cast %26 : vector<1x4x32x8xbf16> to vector<4x32x8xbf16>
    "tpu.trace_start"() <{level = 10 : i32, message = "hsd,hde->hse"}> : () -> ()
    %cst_39 = arith.constant dense<0.000000e+00> : vector<4x8x8xf32>
    %28 = tpu.matmul %18, %27, %cst_39 {dimension_numbers = #tpu.dot_dimension_numbers<[2], [1], [1], [2], [0, 0, 0, 1, 1, 2], [0], [0]>} : vector<4x8x32xbf16>, vector<4x32x8xbf16>, vector<4x8x8xf32> -> vector<4x8x8xf32>
    "tpu.trace_stop"() : () -> ()
    %29 = vector.extract_strided_slice %1 {offsets = [1, 0, 0, 0], sizes = [1, 4, 1, 8], strides = [1, 1, 1, 1]} : vector<3x4x1x8xf32> to vector<1x4x1x8xf32>
    %30 = vector.shape_cast %29 : vector<1x4x1x8xf32> to vector<4x1x8xf32>
    %31 = vector.broadcast %30 : vector<4x1x8xf32> to vector<4x8x8xf32>
    %32 = arith.addf %28, %31 : vector<4x8x8xf32>
    %33 = vector.extract_strided_slice %0 {offsets = [2, 0, 0, 0], sizes = [1, 4, 32, 8], strides = [1, 1, 1, 1]} : vector<3x4x32x8xbf16> to vector<1x4x32x8xbf16>
    %34 = vector.shape_cast %33 : vector<1x4x32x8xbf16> to vector<4x32x8xbf16>
    "tpu.trace_start"() <{level = 10 : i32, message = "hsd,hde->hse"}> : () -> ()
    %cst_40 = arith.constant dense<0.000000e+00> : vector<4x8x8xf32>
    %35 = tpu.matmul %18, %34, %cst_40 {dimension_numbers = #tpu.dot_dimension_numbers<[2], [1], [1], [2], [0, 0, 0, 1, 1, 2], [0], [0]>} : vector<4x8x32xbf16>, vector<4x32x8xbf16>, vector<4x8x8xf32> -> vector<4x8x8xf32>
    "tpu.trace_stop"() : () -> ()
    %36 = vector.extract_strided_slice %1 {offsets = [2, 0, 0, 0], sizes = [1, 4, 1, 8], strides = [1, 1, 1, 1]} : vector<3x4x1x8xf32> to vector<1x4x1x8xf32>
    %37 = vector.shape_cast %36 : vector<1x4x1x8xf32> to vector<4x1x8xf32>
    %38 = vector.broadcast %37 : vector<4x1x8xf32> to vector<4x8x8xf32>
    %39 = arith.addf %35, %38 : vector<4x8x8xf32>
    %40 = arith.truncf %25 : vector<4x8x8xf32> to vector<4x8x8xbf16>
    %41 = arith.truncf %32 : vector<4x8x8xf32> to vector<4x8x8xbf16>
    "tpu.trace_start"() <{level = 10 : i32, message = "hqd,hkd->hqk"}> : () -> ()
    %cst_41 = arith.constant dense<0.000000e+00> : vector<4x8x8xf32>
    %42 = tpu.matmul %40, %41, %cst_41 {dimension_numbers = #tpu.dot_dimension_numbers<[2], [2], [1], [1], [0, 0, 0, 1, 1, 1], [0], [0]>} : vector<4x8x8xbf16>, vector<4x8x8xbf16>, vector<4x8x8xf32> -> vector<4x8x8xf32>
    "tpu.trace_stop"() : () -> ()
    %cst_42 = arith.constant dense<0xFF800000> : vector<4x8xf32>
    %43 = vector.multi_reduction <maximumf>, %42, %cst_42 [2] : vector<4x8x8xf32> to vector<4x8xf32>
    %44 = vector.shape_cast %43 : vector<4x8xf32> to vector<4x8x1xf32>
    %45 = vector.broadcast %44 : vector<4x8x1xf32> to vector<4x8x8xf32>
    %46 = arith.subf %42, %45 : vector<4x8x8xf32>
    %47 = math.exp %46 : vector<4x8x8xf32>
    %cst_43 = arith.constant dense<0.000000e+00> : vector<4x8xf32>
    %48 = vector.multi_reduction <add>, %47, %cst_43 [2] : vector<4x8x8xf32> to vector<4x8xf32>
    %49 = vector.shape_cast %48 : vector<4x8xf32> to vector<4x8x1xf32>
    %50 = tpu.reciprocal %49 {approx = true} : vector<4x8x1xf32> -> vector<4x8x1xf32>
    %51 = vector.broadcast %50 : vector<4x8x1xf32> to vector<4x8x8xf32>
    %52 = arith.mulf %47, %51 : vector<4x8x8xf32>
    %53 = arith.truncf %52 : vector<4x8x8xf32> to vector<4x8x8xbf16>
    %54 = arith.truncf %39 : vector<4x8x8xf32> to vector<4x8x8xbf16>
    "tpu.trace_start"() <{level = 10 : i32, message = "hqk,hkd->hqd"}> : () -> ()
    %cst_44 = arith.constant dense<0.000000e+00> : vector<4x8x8xf32>
    %55 = tpu.matmul %53, %54, %cst_44 {dimension_numbers = #tpu.dot_dimension_numbers<[2], [1], [1], [2], [0, 0, 0, 1, 1, 2], [0], [0]>} : vector<4x8x8xbf16>, vector<4x8x8xbf16>, vector<4x8x8xf32> -> vector<4x8x8xf32>
    "tpu.trace_stop"() : () -> ()
    %56 = arith.truncf %55 : vector<4x8x8xf32> to vector<4x8x8xbf16>
    "tpu.trace_start"() <{level = 10 : i32, message = "hqd,hdm->hqm"}> : () -> ()
    %cst_45 = arith.constant dense<0.000000e+00> : vector<4x8x32xf32>
    %57 = tpu.matmul %56, %2, %cst_45 {dimension_numbers = #tpu.dot_dimension_numbers<[2], [1], [1], [2], [0, 0, 0, 1, 1, 2], [0], [0]>} : vector<4x8x8xbf16>, vector<4x8x32xbf16>, vector<4x8x32xf32> -> vector<4x8x32xf32>
    "tpu.trace_stop"() : () -> ()
    %58 = vector.extract_strided_slice %57 {offsets = [0, 0, 0], sizes = [1, 8, 32], strides = [1, 1, 1]} : vector<4x8x32xf32> to vector<1x8x32xf32>
    %59 = vector.shape_cast %58 : vector<1x8x32xf32> to vector<8x32xf32>
    %cst_46 = arith.constant 0.000000e+00 : f32
    %60 = vector.broadcast %cst_46 : f32 to vector<8x32xf32>
    %61 = arith.addf %60, %59 : vector<8x32xf32>
    %62 = vector.extract_strided_slice %57 {offsets = [1, 0, 0], sizes = [1, 8, 32], strides = [1, 1, 1]} : vector<4x8x32xf32> to vector<1x8x32xf32>
    %63 = vector.shape_cast %62 : vector<1x8x32xf32> to vector<8x32xf32>
    %64 = arith.addf %61, %63 : vector<8x32xf32>
    %65 = vector.extract_strided_slice %57 {offsets = [2, 0, 0], sizes = [1, 8, 32], strides = [1, 1, 1]} : vector<4x8x32xf32> to vector<1x8x32xf32>
    %66 = vector.shape_cast %65 : vector<1x8x32xf32> to vector<8x32xf32>
    %67 = arith.addf %64, %66 : vector<8x32xf32>
    %68 = vector.extract_strided_slice %57 {offsets = [3, 0, 0], sizes = [1, 8, 32], strides = [1, 1, 1]} : vector<4x8x32xf32> to vector<1x8x32xf32>
    %69 = vector.shape_cast %68 : vector<1x8x32xf32> to vector<8x32xf32>
    %70 = arith.addf %67, %69 : vector<8x32xf32>
    %71 = vector.broadcast %3 : vector<1x32xf32> to vector<8x32xf32>
    %72 = arith.addf %70, %71 : vector<8x32xf32>
    %73 = arith.truncf %72 : vector<8x32xf32> to vector<8x32xbf16>
    %cst_47 = arith.constant dense<0.000000e+00> : vector<8x32xf32>
    %74 = tpu.matmul %73, %4, %cst_47 {dimension_numbers = #tpu.dot_dimension_numbers<[1], [0], [0], [1], [0, 0, 1, 1], [], []>} : vector<8x32xbf16>, vector<32x32xbf16>, vector<8x32xf32> -> vector<8x32xf32>
    %75 = vector.broadcast %5 : vector<1x32xf32> to vector<8x32xf32>
    %76 = arith.addf %74, %75 : vector<8x32xf32>
    %cst_48 = arith.constant 0.000000e+00 : f32
    %77 = vector.broadcast %cst_48 : f32 to vector<8x32xf32>
    %78 = arith.maximumf %76, %77 : vector<8x32xf32>
    %79 = arith.truncf %78 : vector<8x32xf32> to vector<8x32xbf16>
    %80 = vector.shape_cast %79 : vector<8x32xbf16> to vector<1x8x32xbf16>
    %81 = vector.shape_cast %80 : vector<1x8x32xbf16> to vector<1x8x32xbf16>
    %82 = vector.broadcast %81 : vector<1x8x32xbf16> to vector<4x8x32xbf16>
    %83 = vector.extract_strided_slice %6 {offsets = [0, 0, 0, 0], sizes = [1, 4, 32, 8], strides = [1, 1, 1, 1]} : vector<3x4x32x8xbf16> to vector<1x4x32x8xbf16>
    %84 = vector.shape_cast %83 : vector<1x4x32x8xbf16> to vector<4x32x8xbf16>
    "tpu.trace_start"() <{level = 10 : i32, message = "hsd,hde->hse"}> : () -> ()
    %cst_49 = arith.constant dense<0.000000e+00> : vector<4x8x8xf32>
    %85 = tpu.matmul %82, %84, %cst_49 {dimension_numbers = #tpu.dot_dimension_numbers<[2], [1], [1], [2], [0, 0, 0, 1, 1, 2], [0], [0]>} : vector<4x8x32xbf16>, vector<4x32x8xbf16>, vector<4x8x8xf32> -> vector<4x8x8xf32>
    "tpu.trace_stop"() : () -> ()
    %86 = vector.extract_strided_slice %7 {offsets = [0, 0, 0, 0], sizes = [1, 4, 1, 8], strides = [1, 1, 1, 1]} : vector<3x4x1x8xf32> to vector<1x4x1x8xf32>
    %87 = vector.shape_cast %86 : vector<1x4x1x8xf32> to vector<4x1x8xf32>
    %88 = vector.broadcast %87 : vector<4x1x8xf32> to vector<4x8x8xf32>
    %89 = arith.addf %85, %88 : vector<4x8x8xf32>
    %90 = vector.extract_strided_slice %6 {offsets = [1, 0, 0, 0], sizes = [1, 4, 32, 8], strides = [1, 1, 1, 1]} : vector<3x4x32x8xbf16> to vector<1x4x32x8xbf16>
    %91 = vector.shape_cast %90 : vector<1x4x32x8xbf16> to vector<4x32x8xbf16>
    "tpu.trace_start"() <{level = 10 : i32, message = "hsd,hde->hse"}> : () -> ()
    %cst_50 = arith.constant dense<0.000000e+00> : vector<4x8x8xf32>
    %92 = tpu.matmul %82, %91, %cst_50 {dimension_numbers = #tpu.dot_dimension_numbers<[2], [1], [1], [2], [0, 0, 0, 1, 1, 2], [0], [0]>} : vector<4x8x32xbf16>, vector<4x32x8xbf16>, vector<4x8x8xf32> -> vector<4x8x8xf32>
    "tpu.trace_stop"() : () -> ()
    %93 = vector.extract_strided_slice %7 {offsets = [1, 0, 0, 0], sizes = [1, 4, 1, 8], strides = [1, 1, 1, 1]} : vector<3x4x1x8xf32> to vector<1x4x1x8xf32>
    %94 = vector.shape_cast %93 : vector<1x4x1x8xf32> to vector<4x1x8xf32>
    %95 = vector.broadcast %94 : vector<4x1x8xf32> to vector<4x8x8xf32>
    %96 = arith.addf %92, %95 : vector<4x8x8xf32>
    %97 = vector.extract_strided_slice %6 {offsets = [2, 0, 0, 0], sizes = [1, 4, 32, 8], strides = [1, 1, 1, 1]} : vector<3x4x32x8xbf16> to vector<1x4x32x8xbf16>
    %98 = vector.shape_cast %97 : vector<1x4x32x8xbf16> to vector<4x32x8xbf16>
    "tpu.trace_start"() <{level = 10 : i32, message = "hsd,hde->hse"}> : () -> ()
    %cst_51 = arith.constant dense<0.000000e+00> : vector<4x8x8xf32>
    %99 = tpu.matmul %82, %98, %cst_51 {dimension_numbers = #tpu.dot_dimension_numbers<[2], [1], [1], [2], [0, 0, 0, 1, 1, 2], [0], [0]>} : vector<4x8x32xbf16>, vector<4x32x8xbf16>, vector<4x8x8xf32> -> vector<4x8x8xf32>
    "tpu.trace_stop"() : () -> ()
    %100 = vector.extract_strided_slice %7 {offsets = [2, 0, 0, 0], sizes = [1, 4, 1, 8], strides = [1, 1, 1, 1]} : vector<3x4x1x8xf32> to vector<1x4x1x8xf32>
    %101 = vector.shape_cast %100 : vector<1x4x1x8xf32> to vector<4x1x8xf32>
    %102 = vector.broadcast %101 : vector<4x1x8xf32> to vector<4x8x8xf32>
    %103 = arith.addf %99, %102 : vector<4x8x8xf32>
    %104 = arith.truncf %89 : vector<4x8x8xf32> to vector<4x8x8xbf16>
    %105 = arith.truncf %96 : vector<4x8x8xf32> to vector<4x8x8xbf16>
    "tpu.trace_start"() <{level = 10 : i32, message = "hqd,hkd->hqk"}> : () -> ()
    %cst_52 = arith.constant dense<0.000000e+00> : vector<4x8x8xf32>
    %106 = tpu.matmul %104, %105, %cst_52 {dimension_numbers = #tpu.dot_dimension_numbers<[2], [2], [1], [1], [0, 0, 0, 1, 1, 1], [0], [0]>} : vector<4x8x8xbf16>, vector<4x8x8xbf16>, vector<4x8x8xf32> -> vector<4x8x8xf32>
    "tpu.trace_stop"() : () -> ()
    %cst_53 = arith.constant dense<0xFF800000> : vector<4x8xf32>
    %107 = vector.multi_reduction <maximumf>, %106, %cst_53 [2] : vector<4x8x8xf32> to vector<4x8xf32>
    %108 = vector.shape_cast %107 : vector<4x8xf32> to vector<4x8x1xf32>
    %109 = vector.broadcast %108 : vector<4x8x1xf32> to vector<4x8x8xf32>
    %110 = arith.subf %106, %109 : vector<4x8x8xf32>
    %111 = math.exp %110 : vector<4x8x8xf32>
    %cst_54 = arith.constant dense<0.000000e+00> : vector<4x8xf32>
    %112 = vector.multi_reduction <add>, %111, %cst_54 [2] : vector<4x8x8xf32> to vector<4x8xf32>
    %113 = vector.shape_cast %112 : vector<4x8xf32> to vector<4x8x1xf32>
    %114 = tpu.reciprocal %113 {approx = true} : vector<4x8x1xf32> -> vector<4x8x1xf32>
    %115 = vector.broadcast %114 : vector<4x8x1xf32> to vector<4x8x8xf32>
    %116 = arith.mulf %111, %115 : vector<4x8x8xf32>
    %117 = arith.truncf %116 : vector<4x8x8xf32> to vector<4x8x8xbf16>
    %118 = arith.truncf %103 : vector<4x8x8xf32> to vector<4x8x8xbf16>
    "tpu.trace_start"() <{level = 10 : i32, message = "hqk,hkd->hqd"}> : () -> ()
    %cst_55 = arith.constant dense<0.000000e+00> : vector<4x8x8xf32>
    %119 = tpu.matmul %117, %118, %cst_55 {dimension_numbers = #tpu.dot_dimension_numbers<[2], [1], [1], [2], [0, 0, 0, 1, 1, 2], [0], [0]>} : vector<4x8x8xbf16>, vector<4x8x8xbf16>, vector<4x8x8xf32> -> vector<4x8x8xf32>
    "tpu.trace_stop"() : () -> ()
    %120 = arith.truncf %119 : vector<4x8x8xf32> to vector<4x8x8xbf16>
    "tpu.trace_start"() <{level = 10 : i32, message = "hqd,hdm->hqm"}> : () -> ()
    %cst_56 = arith.constant dense<0.000000e+00> : vector<4x8x32xf32>
    %121 = tpu.matmul %120, %8, %cst_56 {dimension_numbers = #tpu.dot_dimension_numbers<[2], [1], [1], [2], [0, 0, 0, 1, 1, 2], [0], [0]>} : vector<4x8x8xbf16>, vector<4x8x32xbf16>, vector<4x8x32xf32> -> vector<4x8x32xf32>
    "tpu.trace_stop"() : () -> ()
    %122 = vector.extract_strided_slice %121 {offsets = [0, 0, 0], sizes = [1, 8, 32], strides = [1, 1, 1]} : vector<4x8x32xf32> to vector<1x8x32xf32>
    %123 = vector.shape_cast %122 : vector<1x8x32xf32> to vector<8x32xf32>
    %cst_57 = arith.constant 0.000000e+00 : f32
    %124 = vector.broadcast %cst_57 : f32 to vector<8x32xf32>
    %125 = arith.addf %124, %123 : vector<8x32xf32>
    %126 = vector.extract_strided_slice %121 {offsets = [1, 0, 0], sizes = [1, 8, 32], strides = [1, 1, 1]} : vector<4x8x32xf32> to vector<1x8x32xf32>
    %127 = vector.shape_cast %126 : vector<1x8x32xf32> to vector<8x32xf32>
    %128 = arith.addf %125, %127 : vector<8x32xf32>
    %129 = vector.extract_strided_slice %121 {offsets = [2, 0, 0], sizes = [1, 8, 32], strides = [1, 1, 1]} : vector<4x8x32xf32> to vector<1x8x32xf32>
    %130 = vector.shape_cast %129 : vector<1x8x32xf32> to vector<8x32xf32>
    %131 = arith.addf %128, %130 : vector<8x32xf32>
    %132 = vector.extract_strided_slice %121 {offsets = [3, 0, 0], sizes = [1, 8, 32], strides = [1, 1, 1]} : vector<4x8x32xf32> to vector<1x8x32xf32>
    %133 = vector.shape_cast %132 : vector<1x8x32xf32> to vector<8x32xf32>
    %134 = arith.addf %131, %133 : vector<8x32xf32>
    %135 = vector.broadcast %9 : vector<1x32xf32> to vector<8x32xf32>
    %136 = arith.addf %134, %135 : vector<8x32xf32>
    %137 = arith.truncf %136 : vector<8x32xf32> to vector<8x32xbf16>
    %cst_58 = arith.constant dense<0.000000e+00> : vector<8x32xf32>
    %138 = tpu.matmul %137, %10, %cst_58 {dimension_numbers = #tpu.dot_dimension_numbers<[1], [0], [0], [1], [0, 0, 1, 1], [], []>} : vector<8x32xbf16>, vector<32x32xbf16>, vector<8x32xf32> -> vector<8x32xf32>
    %139 = vector.broadcast %11 : vector<1x32xf32> to vector<8x32xf32>
    %140 = arith.addf %138, %139 : vector<8x32xf32>
    %cst_59 = arith.constant 0.000000e+00 : f32
    %141 = vector.broadcast %cst_59 : f32 to vector<8x32xf32>
    %142 = arith.maximumf %140, %141 : vector<8x32xf32>
    %143 = arith.truncf %142 : vector<8x32xf32> to vector<8x32xbf16>
    %cst_60 = arith.constant dense<0.000000e+00> : vector<8x128xf32>
    %144 = tpu.matmul %143, %12, %cst_60 {dimension_numbers = #tpu.dot_dimension_numbers<[1], [0], [0], [1], [0, 0, 1, 1], [], []>} : vector<8x32xbf16>, vector<32x128xbf16>, vector<8x128xf32> -> vector<8x128xf32>
    %145 = vector.broadcast %13 : vector<1x128xf32> to vector<8x128xf32>
    %146 = arith.addf %144, %145 : vector<8x128xf32>
    %c0_61 = arith.constant 0 : index
    %c0_62 = arith.constant 0 : index
    %147 = vector.load %arg16[%c0_61, %c0_62] : memref<16x128xf32, #tpu.memory_space<vmem>>, vector<8x128xf32>
    tpu.vector_store %arg16[%c0_61, %c0_62], %146 {strides = array<i32>} : memref<16x128xf32, #tpu.memory_space<vmem>>, vector<8x128xf32>,
    %c8 = arith.constant 8 : index
    %c0_63 = arith.constant 0 : index
    %148 = vector.load %arg1[%c8, %c0_63] : memref<16x32xf32, #tpu.memory_space<vmem>>, vector<8x32xf32>
    %149 = arith.truncf %148 : vector<8x32xf32> to vector<8x32xbf16>
    %150 = vector.shape_cast %149 : vector<8x32xbf16> to vector<1x8x32xbf16>
    %151 = vector.shape_cast %150 : vector<1x8x32xbf16> to vector<1x8x32xbf16>
    %152 = vector.broadcast %151 : vector<1x8x32xbf16> to vector<4x8x32xbf16>
    %153 = vector.extract_strided_slice %0 {offsets = [0, 0, 0, 0], sizes = [1, 4, 32, 8], strides = [1, 1, 1, 1]} : vector<3x4x32x8xbf16> to vector<1x4x32x8xbf16>
    %154 = vector.shape_cast %153 : vector<1x4x32x8xbf16> to vector<4x32x8xbf16>
    "tpu.trace_start"() <{level = 10 : i32, message = "hsd,hde->hse"}> : () -> ()
    %cst_64 = arith.constant dense<0.000000e+00> : vector<4x8x8xf32>
    %155 = tpu.matmul %152, %154, %cst_64 {dimension_numbers = #tpu.dot_dimension_numbers<[2], [1], [1], [2], [0, 0, 0, 1, 1, 2], [0], [0]>} : vector<4x8x32xbf16>, vector<4x32x8xbf16>, vector<4x8x8xf32> -> vector<4x8x8xf32>
    "tpu.trace_stop"() : () -> ()
    %156 = vector.extract_strided_slice %1 {offsets = [0, 0, 0, 0], sizes = [1, 4, 1, 8], strides = [1, 1, 1, 1]} : vector<3x4x1x8xf32> to vector<1x4x1x8xf32>
    %157 = vector.shape_cast %156 : vector<1x4x1x8xf32> to vector<4x1x8xf32>
    %158 = vector.broadcast %157 : vector<4x1x8xf32> to vector<4x8x8xf32>
    %159 = arith.addf %155, %158 : vector<4x8x8xf32>
    %160 = vector.extract_strided_slice %0 {offsets = [1, 0, 0, 0], sizes = [1, 4, 32, 8], strides = [1, 1, 1, 1]} : vector<3x4x32x8xbf16> to vector<1x4x32x8xbf16>
    %161 = vector.shape_cast %160 : vector<1x4x32x8xbf16> to vector<4x32x8xbf16>
    "tpu.trace_start"() <{level = 10 : i32, message = "hsd,hde->hse"}> : () -> ()
    %cst_65 = arith.constant dense<0.000000e+00> : vector<4x8x8xf32>
    %162 = tpu.matmul %152, %161, %cst_65 {dimension_numbers = #tpu.dot_dimension_numbers<[2], [1], [1], [2], [0, 0, 0, 1, 1, 2], [0], [0]>} : vector<4x8x32xbf16>, vector<4x32x8xbf16>, vector<4x8x8xf32> -> vector<4x8x8xf32>
    "tpu.trace_stop"() : () -> ()
    %163 = vector.extract_strided_slice %1 {offsets = [1, 0, 0, 0], sizes = [1, 4, 1, 8], strides = [1, 1, 1, 1]} : vector<3x4x1x8xf32> to vector<1x4x1x8xf32>
    %164 = vector.shape_cast %163 : vector<1x4x1x8xf32> to vector<4x1x8xf32>
    %165 = vector.broadcast %164 : vector<4x1x8xf32> to vector<4x8x8xf32>
    %166 = arith.addf %162, %165 : vector<4x8x8xf32>
    %167 = vector.extract_strided_slice %0 {offsets = [2, 0, 0, 0], sizes = [1, 4, 32, 8], strides = [1, 1, 1, 1]} : vector<3x4x32x8xbf16> to vector<1x4x32x8xbf16>
    %168 = vector.shape_cast %167 : vector<1x4x32x8xbf16> to vector<4x32x8xbf16>
    "tpu.trace_start"() <{level = 10 : i32, message = "hsd,hde->hse"}> : () -> ()
    %cst_66 = arith.constant dense<0.000000e+00> : vector<4x8x8xf32>
    %169 = tpu.matmul %152, %168, %cst_66 {dimension_numbers = #tpu.dot_dimension_numbers<[2], [1], [1], [2], [0, 0, 0, 1, 1, 2], [0], [0]>} : vector<4x8x32xbf16>, vector<4x32x8xbf16>, vector<4x8x8xf32> -> vector<4x8x8xf32>
    "tpu.trace_stop"() : () -> ()
    %170 = vector.extract_strided_slice %1 {offsets = [2, 0, 0, 0], sizes = [1, 4, 1, 8], strides = [1, 1, 1, 1]} : vector<3x4x1x8xf32> to vector<1x4x1x8xf32>
    %171 = vector.shape_cast %170 : vector<1x4x1x8xf32> to vector<4x1x8xf32>
    %172 = vector.broadcast %171 : vector<4x1x8xf32> to vector<4x8x8xf32>
    %173 = arith.addf %169, %172 : vector<4x8x8xf32>
    %174 = arith.truncf %159 : vector<4x8x8xf32> to vector<4x8x8xbf16>
    %175 = arith.truncf %166 : vector<4x8x8xf32> to vector<4x8x8xbf16>
    "tpu.trace_start"() <{level = 10 : i32, message = "hqd,hkd->hqk"}> : () -> ()
    %cst_67 = arith.constant dense<0.000000e+00> : vector<4x8x8xf32>
    %176 = tpu.matmul %174, %175, %cst_67 {dimension_numbers = #tpu.dot_dimension_numbers<[2], [2], [1], [1], [0, 0, 0, 1, 1, 1], [0], [0]>} : vector<4x8x8xbf16>, vector<4x8x8xbf16>, vector<4x8x8xf32> -> vector<4x8x8xf32>
    "tpu.trace_stop"() : () -> ()
    %cst_68 = arith.constant dense<0xFF800000> : vector<4x8xf32>
    %177 = vector.multi_reduction <maximumf>, %176, %cst_68 [2] : vector<4x8x8xf32> to vector<4x8xf32>
    %178 = vector.shape_cast %177 : vector<4x8xf32> to vector<4x8x1xf32>
    %179 = vector.broadcast %178 : vector<4x8x1xf32> to vector<4x8x8xf32>
    %180 = arith.subf %176, %179 : vector<4x8x8xf32>
    %181 = math.exp %180 : vector<4x8x8xf32>
    %cst_69 = arith.constant dense<0.000000e+00> : vector<4x8xf32>
    %182 = vector.multi_reduction <add>, %181, %cst_69 [2] : vector<4x8x8xf32> to vector<4x8xf32>
    %183 = vector.shape_cast %182 : vector<4x8xf32> to vector<4x8x1xf32>
    %184 = tpu.reciprocal %183 {approx = true} : vector<4x8x1xf32> -> vector<4x8x1xf32>
    %185 = vector.broadcast %184 : vector<4x8x1xf32> to vector<4x8x8xf32>
    %186 = arith.mulf %181, %185 : vector<4x8x8xf32>
    %187 = arith.truncf %186 : vector<4x8x8xf32> to vector<4x8x8xbf16>
    %188 = arith.truncf %173 : vector<4x8x8xf32> to vector<4x8x8xbf16>
    "tpu.trace_start"() <{level = 10 : i32, message = "hqk,hkd->hqd"}> : () -> ()
    %cst_70 = arith.constant dense<0.000000e+00> : vector<4x8x8xf32>
    %189 = tpu.matmul %187, %188, %cst_70 {dimension_numbers = #tpu.dot_dimension_numbers<[2], [1], [1], [2], [0, 0, 0, 1, 1, 2], [0], [0]>} : vector<4x8x8xbf16>, vector<4x8x8xbf16>, vector<4x8x8xf32> -> vector<4x8x8xf32>
    "tpu.trace_stop"() : () -> ()
    %190 = arith.truncf %189 : vector<4x8x8xf32> to vector<4x8x8xbf16>
    "tpu.trace_start"() <{level = 10 : i32, message = "hqd,hdm->hqm"}> : () -> ()
    %cst_71 = arith.constant dense<0.000000e+00> : vector<4x8x32xf32>
    %191 = tpu.matmul %190, %2, %cst_71 {dimension_numbers = #tpu.dot_dimension_numbers<[2], [1], [1], [2], [0, 0, 0, 1, 1, 2], [0], [0]>} : vector<4x8x8xbf16>, vector<4x8x32xbf16>, vector<4x8x32xf32> -> vector<4x8x32xf32>
    "tpu.trace_stop"() : () -> ()
    %192 = vector.extract_strided_slice %191 {offsets = [0, 0, 0], sizes = [1, 8, 32], strides = [1, 1, 1]} : vector<4x8x32xf32> to vector<1x8x32xf32>
    %193 = vector.shape_cast %192 : vector<1x8x32xf32> to vector<8x32xf32>
    %cst_72 = arith.constant 0.000000e+00 : f32
    %194 = vector.broadcast %cst_72 : f32 to vector<8x32xf32>
    %195 = arith.addf %194, %193 : vector<8x32xf32>
    %196 = vector.extract_strided_slice %191 {offsets = [1, 0, 0], sizes = [1, 8, 32], strides = [1, 1, 1]} : vector<4x8x32xf32> to vector<1x8x32xf32>
    %197 = vector.shape_cast %196 : vector<1x8x32xf32> to vector<8x32xf32>
    %198 = arith.addf %195, %197 : vector<8x32xf32>
    %199 = vector.extract_strided_slice %191 {offsets = [2, 0, 0], sizes = [1, 8, 32], strides = [1, 1, 1]} : vector<4x8x32xf32> to vector<1x8x32xf32>
    %200 = vector.shape_cast %199 : vector<1x8x32xf32> to vector<8x32xf32>
    %201 = arith.addf %198, %200 : vector<8x32xf32>
    %202 = vector.extract_strided_slice %191 {offsets = [3, 0, 0], sizes = [1, 8, 32], strides = [1, 1, 1]} : vector<4x8x32xf32> to vector<1x8x32xf32>
    %203 = vector.shape_cast %202 : vector<1x8x32xf32> to vector<8x32xf32>
    %204 = arith.addf %201, %203 : vector<8x32xf32>
    %205 = vector.broadcast %3 : vector<1x32xf32> to vector<8x32xf32>
    %206 = arith.addf %204, %205 : vector<8x32xf32>
    %207 = arith.truncf %206 : vector<8x32xf32> to vector<8x32xbf16>
    %cst_73 = arith.constant dense<0.000000e+00> : vector<8x32xf32>
    %208 = tpu.matmul %207, %4, %cst_73 {dimension_numbers = #tpu.dot_dimension_numbers<[1], [0], [0], [1], [0, 0, 1, 1], [], []>} : vector<8x32xbf16>, vector<32x32xbf16>, vector<8x32xf32> -> vector<8x32xf32>
    %209 = vector.broadcast %5 : vector<1x32xf32> to vector<8x32xf32>
    %210 = arith.addf %208, %209 : vector<8x32xf32>
    %cst_74 = arith.constant 0.000000e+00 : f32
    %211 = vector.broadcast %cst_74 : f32 to vector<8x32xf32>
    %212 = arith.maximumf %210, %211 : vector<8x32xf32>
    %213 = arith.truncf %212 : vector<8x32xf32> to vector<8x32xbf16>
    %214 = vector.shape_cast %213 : vector<8x32xbf16> to vector<1x8x32xbf16>
    %215 = vector.shape_cast %214 : vector<1x8x32xbf16> to vector<1x8x32xbf16>
    %216 = vector.broadcast %215 : vector<1x8x32xbf16> to vector<4x8x32xbf16>
    %217 = vector.extract_strided_slice %6 {offsets = [0, 0, 0, 0], sizes = [1, 4, 32, 8], strides = [1, 1, 1, 1]} : vector<3x4x32x8xbf16> to vector<1x4x32x8xbf16>
    %218 = vector.shape_cast %217 : vector<1x4x32x8xbf16> to vector<4x32x8xbf16>
    "tpu.trace_start"() <{level = 10 : i32, message = "hsd,hde->hse"}> : () -> ()
    %cst_75 = arith.constant dense<0.000000e+00> : vector<4x8x8xf32>
    %219 = tpu.matmul %216, %218, %cst_75 {dimension_numbers = #tpu.dot_dimension_numbers<[2], [1], [1], [2], [0, 0, 0, 1, 1, 2], [0], [0]>} : vector<4x8x32xbf16>, vector<4x32x8xbf16>, vector<4x8x8xf32> -> vector<4x8x8xf32>
    "tpu.trace_stop"() : () -> ()
    %220 = vector.extract_strided_slice %7 {offsets = [0, 0, 0, 0], sizes = [1, 4, 1, 8], strides = [1, 1, 1, 1]} : vector<3x4x1x8xf32> to vector<1x4x1x8xf32>
    %221 = vector.shape_cast %220 : vector<1x4x1x8xf32> to vector<4x1x8xf32>
    %222 = vector.broadcast %221 : vector<4x1x8xf32> to vector<4x8x8xf32>
    %223 = arith.addf %219, %222 : vector<4x8x8xf32>
    %224 = vector.extract_strided_slice %6 {offsets = [1, 0, 0, 0], sizes = [1, 4, 32, 8], strides = [1, 1, 1, 1]} : vector<3x4x32x8xbf16> to vector<1x4x32x8xbf16>
    %225 = vector.shape_cast %224 : vector<1x4x32x8xbf16> to vector<4x32x8xbf16>
    "tpu.trace_start"() <{level = 10 : i32, message = "hsd,hde->hse"}> : () -> ()
    %cst_76 = arith.constant dense<0.000000e+00> : vector<4x8x8xf32>
    %226 = tpu.matmul %216, %225, %cst_76 {dimension_numbers = #tpu.dot_dimension_numbers<[2], [1], [1], [2], [0, 0, 0, 1, 1, 2], [0], [0]>} : vector<4x8x32xbf16>, vector<4x32x8xbf16>, vector<4x8x8xf32> -> vector<4x8x8xf32>
    "tpu.trace_stop"() : () -> ()
    %227 = vector.extract_strided_slice %7 {offsets = [1, 0, 0, 0], sizes = [1, 4, 1, 8], strides = [1, 1, 1, 1]} : vector<3x4x1x8xf32> to vector<1x4x1x8xf32>
    %228 = vector.shape_cast %227 : vector<1x4x1x8xf32> to vector<4x1x8xf32>
    %229 = vector.broadcast %228 : vector<4x1x8xf32> to vector<4x8x8xf32>
    %230 = arith.addf %226, %229 : vector<4x8x8xf32>
    %231 = vector.extract_strided_slice %6 {offsets = [2, 0, 0, 0], sizes = [1, 4, 32, 8], strides = [1, 1, 1, 1]} : vector<3x4x32x8xbf16> to vector<1x4x32x8xbf16>
    %232 = vector.shape_cast %231 : vector<1x4x32x8xbf16> to vector<4x32x8xbf16>
    "tpu.trace_start"() <{level = 10 : i32, message = "hsd,hde->hse"}> : () -> ()
    %cst_77 = arith.constant dense<0.000000e+00> : vector<4x8x8xf32>
    %233 = tpu.matmul %216, %232, %cst_77 {dimension_numbers = #tpu.dot_dimension_numbers<[2], [1], [1], [2], [0, 0, 0, 1, 1, 2], [0], [0]>} : vector<4x8x32xbf16>, vector<4x32x8xbf16>, vector<4x8x8xf32> -> vector<4x8x8xf32>
    "tpu.trace_stop"() : () -> ()
    %234 = vector.extract_strided_slice %7 {offsets = [2, 0, 0, 0], sizes = [1, 4, 1, 8], strides = [1, 1, 1, 1]} : vector<3x4x1x8xf32> to vector<1x4x1x8xf32>
    %235 = vector.shape_cast %234 : vector<1x4x1x8xf32> to vector<4x1x8xf32>
    %236 = vector.broadcast %235 : vector<4x1x8xf32> to vector<4x8x8xf32>
    %237 = arith.addf %233, %236 : vector<4x8x8xf32>
    %238 = arith.truncf %223 : vector<4x8x8xf32> to vector<4x8x8xbf16>
    %239 = arith.truncf %230 : vector<4x8x8xf32> to vector<4x8x8xbf16>
    "tpu.trace_start"() <{level = 10 : i32, message = "hqd,hkd->hqk"}> : () -> ()
    %cst_78 = arith.constant dense<0.000000e+00> : vector<4x8x8xf32>
    %240 = tpu.matmul %238, %239, %cst_78 {dimension_numbers = #tpu.dot_dimension_numbers<[2], [2], [1], [1], [0, 0, 0, 1, 1, 1], [0], [0]>} : vector<4x8x8xbf16>, vector<4x8x8xbf16>, vector<4x8x8xf32> -> vector<4x8x8xf32>
    "tpu.trace_stop"() : () -> ()
    %cst_79 = arith.constant dense<0xFF800000> : vector<4x8xf32>
    %241 = vector.multi_reduction <maximumf>, %240, %cst_79 [2] : vector<4x8x8xf32> to vector<4x8xf32>
    %242 = vector.shape_cast %241 : vector<4x8xf32> to vector<4x8x1xf32>
    %243 = vector.broadcast %242 : vector<4x8x1xf32> to vector<4x8x8xf32>
    %244 = arith.subf %240, %243 : vector<4x8x8xf32>
    %245 = math.exp %244 : vector<4x8x8xf32>
    %cst_80 = arith.constant dense<0.000000e+00> : vector<4x8xf32>
    %246 = vector.multi_reduction <add>, %245, %cst_80 [2] : vector<4x8x8xf32> to vector<4x8xf32>
    %247 = vector.shape_cast %246 : vector<4x8xf32> to vector<4x8x1xf32>
    %248 = tpu.reciprocal %247 {approx = true} : vector<4x8x1xf32> -> vector<4x8x1xf32>
    %249 = vector.broadcast %248 : vector<4x8x1xf32> to vector<4x8x8xf32>
    %250 = arith.mulf %245, %249 : vector<4x8x8xf32>
    %251 = arith.truncf %250 : vector<4x8x8xf32> to vector<4x8x8xbf16>
    %252 = arith.truncf %237 : vector<4x8x8xf32> to vector<4x8x8xbf16>
    "tpu.trace_start"() <{level = 10 : i32, message = "hqk,hkd->hqd"}> : () -> ()
    %cst_81 = arith.constant dense<0.000000e+00> : vector<4x8x8xf32>
    %253 = tpu.matmul %251, %252, %cst_81 {dimension_numbers = #tpu.dot_dimension_numbers<[2], [1], [1], [2], [0, 0, 0, 1, 1, 2], [0], [0]>} : vector<4x8x8xbf16>, vector<4x8x8xbf16>, vector<4x8x8xf32> -> vector<4x8x8xf32>
    "tpu.trace_stop"() : () -> ()
    %254 = arith.truncf %253 : vector<4x8x8xf32> to vector<4x8x8xbf16>
    "tpu.trace_start"() <{level = 10 : i32, message = "hqd,hdm->hqm"}> : () -> ()
    %cst_82 = arith.constant dense<0.000000e+00> : vector<4x8x32xf32>
    %255 = tpu.matmul %254, %8, %cst_82 {dimension_numbers = #tpu.dot_dimension_numbers<[2], [1], [1], [2], [0, 0, 0, 1, 1, 2], [0], [0]>} : vector<4x8x8xbf16>, vector<4x8x32xbf16>, vector<4x8x32xf32> -> vector<4x8x32xf32>
    "tpu.trace_stop"() : () -> ()
    %256 = vector.extract_strided_slice %255 {offsets = [0, 0, 0], sizes = [1, 8, 32], strides = [1, 1, 1]} : vector<4x8x32xf32> to vector<1x8x32xf32>
    %257 = vector.shape_cast %256 : vector<1x8x32xf32> to vector<8x32xf32>
    %cst_83 = arith.constant 0.000000e+00 : f32
    %258 = vector.broadcast %cst_83 : f32 to vector<8x32xf32>
    %259 = arith.addf %258, %257 : vector<8x32xf32>
    %260 = vector.extract_strided_slice %255 {offsets = [1, 0, 0], sizes = [1, 8, 32], strides = [1, 1, 1]} : vector<4x8x32xf32> to vector<1x8x32xf32>
    %261 = vector.shape_cast %260 : vector<1x8x32xf32> to vector<8x32xf32>
    %262 = arith.addf %259, %261 : vector<8x32xf32>
    %263 = vector.extract_strided_slice %255 {offsets = [2, 0, 0], sizes = [1, 8, 32], strides = [1, 1, 1]} : vector<4x8x32xf32> to vector<1x8x32xf32>
    %264 = vector.shape_cast %263 : vector<1x8x32xf32> to vector<8x32xf32>
    %265 = arith.addf %262, %264 : vector<8x32xf32>
    %266 = vector.extract_strided_slice %255 {offsets = [3, 0, 0], sizes = [1, 8, 32], strides = [1, 1, 1]} : vector<4x8x32xf32> to vector<1x8x32xf32>
    %267 = vector.shape_cast %266 : vector<1x8x32xf32> to vector<8x32xf32>
    %268 = arith.addf %265, %267 : vector<8x32xf32>
    %269 = vector.broadcast %9 : vector<1x32xf32> to vector<8x32xf32>
    %270 = arith.addf %268, %269 : vector<8x32xf32>
    %271 = arith.truncf %270 : vector<8x32xf32> to vector<8x32xbf16>
    %cst_84 = arith.constant dense<0.000000e+00> : vector<8x32xf32>
    %272 = tpu.matmul %271, %10, %cst_84 {dimension_numbers = #tpu.dot_dimension_numbers<[1], [0], [0], [1], [0, 0, 1, 1], [], []>} : vector<8x32xbf16>, vector<32x32xbf16>, vector<8x32xf32> -> vector<8x32xf32>
    %273 = vector.broadcast %11 : vector<1x32xf32> to vector<8x32xf32>
    %274 = arith.addf %272, %273 : vector<8x32xf32>
    %cst_85 = arith.constant 0.000000e+00 : f32
    %275 = vector.broadcast %cst_85 : f32 to vector<8x32xf32>
    %276 = arith.maximumf %274, %275 : vector<8x32xf32>
    %277 = arith.truncf %276 : vector<8x32xf32> to vector<8x32xbf16>
    %cst_86 = arith.constant dense<0.000000e+00> : vector<8x128xf32>
    %278 = tpu.matmul %277, %12, %cst_86 {dimension_numbers = #tpu.dot_dimension_numbers<[1], [0], [0], [1], [0, 0, 1, 1], [], []>} : vector<8x32xbf16>, vector<32x128xbf16>, vector<8x128xf32> -> vector<8x128xf32>
    %279 = vector.broadcast %13 : vector<1x128xf32> to vector<8x128xf32>
    %280 = arith.addf %278, %279 : vector<8x128xf32>
    %c8_87 = arith.constant 8 : index
    %c0_88 = arith.constant 0 : index
    %281 = vector.load %arg16[%c8_87, %c0_88] : memref<16x128xf32, #tpu.memory_space<vmem>>, vector<8x128xf32>
    tpu.vector_store %arg16[%c8_87, %c0_88], %280 {strides = array<i32>} : memref<16x128xf32, #tpu.memory_space<vmem>>, vector<8x128xf32>,
    return
  }
  func.func @transform_0(%arg0: i32) -> (i32, i32) {
    %c0_i32 = arith.constant 0 : i32
    %c0_i32_0 = arith.constant 0 : i32
    return %arg0, %c0_i32 : i32, i32
  }
  func.func @transform_1(%arg0: i32) -> (i32, i32, i32, i32) {
    %c0_i32 = arith.constant 0 : i32
    %c0_i32_0 = arith.constant 0 : i32
    %c0_i32_1 = arith.constant 0 : i32
    %c0_i32_2 = arith.constant 0 : i32
    %c0_i32_3 = arith.constant 0 : i32
    return %c0_i32, %c0_i32_0, %c0_i32_1, %c0_i32_2 : i32, i32, i32, i32
  }
  func.func @transform_2(%arg0: i32) -> (i32, i32, i32, i32) {
    %c0_i32 = arith.constant 0 : i32
    %c0_i32_0 = arith.constant 0 : i32
    %c0_i32_1 = arith.constant 0 : i32
    %c0_i32_2 = arith.constant 0 : i32
    %c0_i32_3 = arith.constant 0 : i32
    return %c0_i32, %c0_i32_0, %c0_i32_1, %c0_i32_2 : i32, i32, i32, i32
  }
  func.func @transform_3(%arg0: i32) -> (i32, i32, i32) {
    %c0_i32 = arith.constant 0 : i32
    %c0_i32_0 = arith.constant 0 : i32
    %c0_i32_1 = arith.constant 0 : i32
    %c0_i32_2 = arith.constant 0 : i32
    return %c0_i32, %c0_i32_0, %c0_i32_1 : i32, i32, i32
  }
  func.func @transform_4(%arg0: i32) -> (i32, i32) {
    %c0_i32 = arith.constant 0 : i32
    %c0_i32_0 = arith.constant 0 : i32
    %c0_i32_1 = arith.constant 0 : i32
    return %c0_i32, %c0_i32_0 : i32, i32
  }
  func.func @transform_5(%arg0: i32) -> (i32, i32) {
    %c0_i32 = arith.constant 0 : i32
    %c0_i32_0 = arith.constant 0 : i32
    %c0_i32_1 = arith.constant 0 : i32
    return %c0_i32, %c0_i32_0 : i32, i32
  }
  func.func @transform_6(%arg0: i32) -> (i32, i32) {
    %c0_i32 = arith.constant 0 : i32
    %c0_i32_0 = arith.constant 0 : i32
    %c0_i32_1 = arith.constant 0 : i32
    return %c0_i32, %c0_i32_0 : i32, i32
  }
  func.func @transform_7(%arg0: i32) -> (i32, i32, i32, i32) {
    %c0_i32 = arith.constant 0 : i32
    %c0_i32_0 = arith.constant 0 : i32
    %c0_i32_1 = arith.constant 0 : i32
    %c0_i32_2 = arith.constant 0 : i32
    %c0_i32_3 = arith.constant 0 : i32
    return %c0_i32, %c0_i32_0, %c0_i32_1, %c0_i32_2 : i32, i32, i32, i32
  }
  func.func @transform_8(%arg0: i32) -> (i32, i32, i32, i32) {
    %c0_i32 = arith.constant 0 : i32
    %c0_i32_0 = arith.constant 0 : i32
    %c0_i32_1 = arith.constant 0 : i32
    %c0_i32_2 = arith.constant 0 : i32
    %c0_i32_3 = arith.constant 0 : i32
    return %c0_i32, %c0_i32_0, %c0_i32_1, %c0_i32_2 : i32, i32, i32, i32
  }
  func.func @transform_9(%arg0: i32) -> (i32, i32, i32) {
    %c0_i32 = arith.constant 0 : i32
    %c0_i32_0 = arith.constant 0 : i32
    %c0_i32_1 = arith.constant 0 : i32
    %c0_i32_2 = arith.constant 0 : i32
    return %c0_i32, %c0_i32_0, %c0_i32_1 : i32, i32, i32
  }
  func.func @transform_10(%arg0: i32) -> (i32, i32) {
    %c0_i32 = arith.constant 0 : i32
    %c0_i32_0 = arith.constant 0 : i32
    %c0_i32_1 = arith.constant 0 : i32
    return %c0_i32, %c0_i32_0 : i32, i32
  }
  func.func @transform_11(%arg0: i32) -> (i32, i32) {
    %c0_i32 = arith.constant 0 : i32
    %c0_i32_0 = arith.constant 0 : i32
    %c0_i32_1 = arith.constant 0 : i32
    return %c0_i32, %c0_i32_0 : i32, i32
  }
  func.func @transform_12(%arg0: i32) -> (i32, i32) {
    %c0_i32 = arith.constant 0 : i32
    %c0_i32_0 = arith.constant 0 : i32
    %c0_i32_1 = arith.constant 0 : i32
    return %c0_i32, %c0_i32_0 : i32, i32
  }
  func.func @transform_13(%arg0: i32) -> (i32, i32) {
    %c0_i32 = arith.constant 0 : i32
    %c0_i32_0 = arith.constant 0 : i32
    %c0_i32_1 = arith.constant 0 : i32
    return %c0_i32, %c0_i32_0 : i32, i32
  }
  func.func @transform_14(%arg0: i32) -> (i32, i32) {
    %c0_i32 = arith.constant 0 : i32
    %c0_i32_0 = arith.constant 0 : i32
    %c0_i32_1 = arith.constant 0 : i32
    return %c0_i32, %c0_i32_0 : i32, i32
  }
  func.func @transform_15(%arg0: i32) -> (i32, i32) {
    %c0_i32 = arith.constant 0 : i32
    %c0_i32_0 = arith.constant 0 : i32
    return %arg0, %c0_i32 : i32, i32
  }
}

</mosaic_0001>

<bundles_post_ra>
// kernel: tpu_custom_call.1
= control target key start
LH: loop header
LB: loop body
LE: loop exit
PB: predicated region body
PF: predicated region fallthrough
CT: control target
= control target key end

     0   :  { %v6773_v1 = vmov 0.0   ;;  %vm6774_vm0 = vmmov 0   ;;  %vm235_vm1 = vcmask 261120   ;;  %s8035_s0 = inlined_call_operand.vmem [shape: f32[16,32], index: 0, kind: input, shape index: {}]   ;;  %s8036_s1 = inlined_call_operand.vmem [shape: bf16[3,4,32,8], index: 1, kind: input, shape index: {}]   ;;  %s8037_s2 = inlined_call_operand.vmem [shape: f32[3,4,1,8], index: 2, kind: input, shape index: {}]   ;;  %s8038_s3 = inlined_call_operand.vmem [shape: bf16[4,8,32], index: 3, kind: input, shape index: {}]   ;;  %s8039_s4 = inlined_call_operand.vmem [shape: f32[1,32], index: 4, kind: input, shape index: {}]   ;;  %s8040_s5 = inlined_call_operand.vmem [shape: bf16[32,32], index: 5, kind: input, shape index: {}]   ;;  %s8041_s6 = inlined_call_operand.vmem [shape: f32[1,32], index: 6, kind: input, shape index: {}]   ;;  %s8042_s7 = inlined_call_operand.vmem [shape: bf16[3,4,32,8], index: 7, kind: input, shape index: {}]   ;;  %s8043_s8 = inlined_call_operand.vmem [shape: f32[3,4,1,8], index: 8, kind: input, shape index: {}]   ;;  %s8044_s9 = inlined_call_operand.vmem [shape: bf16[4,8,32], index: 9, kind: input, shape index: {}]   ;;  %s8045_s10 = inlined_call_operand.vmem [shape: f32[1,32], index: 10, kind: input, shape index: {}]   ;;  %s8046_s11 = inlined_call_operand.vmem [shape: bf16[32,32], index: 11, kind: input, shape index: {}]   ;;  %s8047_s12 = inlined_call_operand.vmem [shape: f32[1,32], index: 12, kind: input, shape index: {}]   ;;  %s8048_s13 = inlined_call_operand.vmem [shape: bf16[32,128], index: 13, kind: input, shape index: {}]   ;;  %s8049_s14 = inlined_call_operand.vmem [shape: f32[1,128], index: 14, kind: input, shape index: {}]   ;;  %s8050_s15 = inlined_call_operand.hbm [shape: f32[16,128], index: 15, kind: output, shape index: {}]  }
   0x1   :  { %v6550_v0 = vld [vmem:[%s8036_s1 + $0x8] sm:$0xff]   ;;  %5825 = vmatprep.subr.bf16.mxu0 %v6773_v1  ;;  %5833 = vmatprep.subr.bf16.mxu1 %v6773_v1  ;;  %v6551_v2 = vld [vmem:[%s8036_s1 + $0x18] sm:$0xff]   ;;  %v6552_v3 = vld [vmem:[%s8036_s1] sm:$0xff]  }
   0x2   :  { %5826 = vmatpush3.bf16.msra.mxu0 %v6550_v0  ;;  %5829 = vmatprep.mubr.msk.bf16.mxu0 %vm6774_vm0, %v6773_v1  ;;  %v6553_v4 = vld [vmem:[%s8036_s1 + $0x10] sm:$0xff]   ;;  %v197_v5 = vld [vmem:[%s8035_s0] sm:$0xff]  ;;  %v6554_v7 = vld [vmem:[%s8036_s1 + $0x28] sm:$0xff]  }
   0x3   :  { %5834 = vmatpush3.bf16.msra.mxu1 %v6551_v2  ;;  %5827 = vmatprep.subr.bf16.mxu0 %v6773_v1  ;;  %v6881_v6 = vpack.c.bf16 %v197_v5, %v197_v5  ;;  %v6555_v8 = vld [vmem:[%s8036_s1 + $0x38] sm:$0xff]   ;;  %v6556_v9 = vld [vmem:[%s8036_s1 + $0x20] sm:$0xff]   ;;  %v6557_v10 = vld [vmem:[%s8036_s1 + $0x30] sm:$0xff]  }
   0x4   :  { %5835 = vmatprep.subr.bf16.mxu1 %v6773_v1  ;;  %5837 = vmatprep.mubr.msk.bf16.mxu1 %vm6774_vm0, %v6773_v1  ;;  %v6558_v11 = vld [vmem:[%s8036_s1 + $0x48] sm:$0xff]   ;;  %v6559_v12 = vld [vmem:[%s8036_s1 + $0x58] sm:$0xff]   ;;  %v6560_v13 = vld [vmem:[%s8036_s1 + $0x40] sm:$0xff]  }
   0x5   :  { %v6561_v14 = vld [vmem:[%s8036_s1 + $0x50] sm:$0xff]   ;;  %v6562_v15 = vld [vmem:[%s8036_s1 + $0x68] sm:$0xff]   ;;  %v6563_v16 = vld [vmem:[%s8036_s1 + $0x78] sm:$0xff]  }
   0x6   :  { %5828 = vmatpush3.bf16.msra.mxu0 %v6552_v3  ;;  %v6564_v17 = vld [vmem:[%s8036_s1 + $0x60] sm:$0xff]   ;;  %v6565_v18 = vld [vmem:[%s8036_s1 + $0x70] sm:$0xff]  }
   0x7   :  { %5836 = vmatpush3.bf16.msra.mxu1 %v6553_v4  ;;  %5841 = vmatprep.subr.bf16.mxu0 %v6773_v1 }
   0x8   :  { %5849 = vmatprep.subr.bf16.mxu1 %v6773_v1 }
   0x9   :  { %5830 = vmatmul.mubr.msk.bf16.vlgmr.msra.gmra.mxu0 %vm235_vm1, %v6881_v6 }
   0xa   :  { %5838 = vmatmul.mubr.msk.bf16.vlgmr.msra.gmra.mxu1 %vm235_vm1, %v6881_v6  ;;  %5842 = vmatpush3.bf16.msra.mxu0 %v6554_v7 }
   0xb   :  { %5850 = vmatpush3.bf16.msra.mxu1 %v6555_v8  ;;  %5843 = vmatprep.subr.bf16.mxu0 %v6773_v1 }
   0xc   :  { %5851 = vmatprep.subr.bf16.mxu1 %v6773_v1  ;;  %5845 = vmatprep.mubr.msk.bf16.mxu0 %vm6774_vm0, %v6773_v1 }
   0xd   :  { %5853 = vmatprep.mubr.msk.bf16.mxu1 %vm6774_vm0, %v6773_v1 }
   0xe   :  { %5844 = vmatpush3.bf16.msra.mxu0 %v6556_v9 }
   0xf   :  { %5852 = vmatpush3.bf16.msra.mxu1 %v6557_v10  ;;  %5857 = vmatprep.subr.bf16.mxu0 %v6773_v1 }
  0x10   :  { %5865 = vmatprep.subr.bf16.mxu1 %v6773_v1 }
  0x11   :  { %5846 = vmatmul.mubr.msk.bf16.vlgmr.msra.gmra.mxu0 %vm235_vm1, %v6881_v6 }
  0x12   :  { %5854 = vmatmul.mubr.msk.bf16.vlgmr.msra.gmra.mxu1 %vm235_vm1, %v6881_v6  ;;  %5858 = vmatpush3.bf16.msra.mxu0 %v6558_v11 }
  0x13   :  { %5866 = vmatpush3.bf16.msra.mxu1 %v6559_v12  ;;  %5859 = vmatprep.subr.bf16.mxu0 %v6773_v1 }
  0x14   :  { %5867 = vmatprep.subr.bf16.mxu1 %v6773_v1  ;;  %5861 = vmatprep.mubr.msk.bf16.mxu0 %vm6774_vm0, %v6773_v1 }
  0x15   :  { %5869 = vmatprep.mubr.msk.bf16.mxu1 %vm6774_vm0, %v6773_v1 }
  0x16   :  { %5860 = vmatpush3.bf16.msra.mxu0 %v6560_v13 }
  0x17   :  { %5868 = vmatpush3.bf16.msra.mxu1 %v6561_v14  ;;  %5873 = vmatprep.subr.bf16.mxu0 %v6773_v1 }
  0x18   :  { %5881 = vmatprep.subr.bf16.mxu1 %v6773_v1 }
  0x19   :  { %5862 = vmatmul.mubr.msk.bf16.vlgmr.msra.gmra.mxu0 %vm235_vm1, %v6881_v6 }
  0x1a   :  { %5870 = vmatmul.mubr.msk.bf16.vlgmr.msra.gmra.mxu1 %vm235_vm1, %v6881_v6  ;;  %5874 = vmatpush3.bf16.msra.mxu0 %v6562_v15 }
  0x1b   :  { %5882 = vmatpush3.bf16.msra.mxu1 %v6563_v16  ;;  %5875 = vmatprep.subr.bf16.mxu0 %v6773_v1 }
  0x1c   :  { %5883 = vmatprep.subr.bf16.mxu1 %v6773_v1  ;;  %5877 = vmatprep.mubr.msk.bf16.mxu0 %vm6774_vm0, %v6773_v1 }
  0x1d   :  { %5885 = vmatprep.mubr.msk.bf16.mxu1 %vm6774_vm0, %v6773_v1 }
  0x1e   :  { %5876 = vmatpush3.bf16.msra.mxu0 %v6564_v17 }
  0x1f   :  { %5884 = vmatpush3.bf16.msra.mxu1 %v6565_v18  ;;  %5889 = vmatprep.subr.bf16.mxu0 %v6773_v1 }
  0x20   :  { %5897 = vmatprep.subr.bf16.mxu1 %v6773_v1 }
  0x21   :  { %5878 = vmatmul.mubr.msk.bf16.vlgmr.msra.gmra.mxu0 %vm235_vm1, %v6881_v6 }
  0x22   :  { %5886 = vmatmul.mubr.msk.bf16.vlgmr.msra.gmra.mxu1 %vm235_vm1, %v6881_v6  ;;  %5893 = vmatprep.mubr.msk.bf16.mxu0 %vm6774_vm0, %v6773_v1 }
  0x23   :  { %5901 = vmatprep.mubr.msk.bf16.mxu1 %vm6774_vm0, %v6773_v1 }
  0x24   :  { %20 = vsyncpa [#allocation3], 0  ;;  %v6566_v19 = vld [vmem:[%s8036_s1 + $0x88] sm:$0xff]   ;;  %v6567_v20 = vld [vmem:[%s8036_s1 + $0x80] sm:$0xff]   ;;  %vm907_vm2 = vcmask 64512   ;;  %vm1147_vm3 = vcmask 1043456  }
  0x25   :  { %5890 = vmatpush3.bf16.msra.mxu0 %v6566_v19  ;;  %v6568_v21 = vld [vmem:[%s8036_s1 + $0x98] sm:$0xff]   ;;  %v6569_v22 = vld [vmem:[%s8036_s1 + $0x90] sm:$0xff]   ;;  %v6570_v23 = vld [vmem:[%s8036_s1 + $0xa8] sm:$0xff]  }
  0x26   :  { %5891 = vmatprep.subr.bf16.mxu0 %v6773_v1  ;;  %5898 = vmatpush3.bf16.msra.mxu1 %v6568_v21  ;;  %v6571_v24 = vld [vmem:[%s8036_s1 + $0xa0] sm:$0xff]   ;;  %v6572_v25 = vld [vmem:[%s8036_s1 + $0xb8] sm:$0xff]   ;;  %v6573_v26 = vld [vmem:[%s8036_s1 + $0xb0] sm:$0xff]  }
  0x27   :  { %5899 = vmatprep.subr.bf16.mxu1 %v6773_v1  ;;  %v5398_v42 = vld [vmem:[%s8037_s2 + $0x4] ss:$0 sm:$0xff]  ;;  %v5399_v44 = vld [vmem:[%s8037_s2 + $0x5] ss:$0 sm:$0xff]  ;;  %v5382_v52 = vld [vmem:[%s8037_s2] ss:$0 sm:$0xff] }
  0x28   :  { %v5383_v55 = vld [vmem:[%s8037_s2 + $0x1] ss:$0 sm:$0xff]  ;;  %v5400_v60 = vld [vmem:[%s8037_s2 + $0x6] ss:$0 sm:$0xff]  ;;  %v5401_v63 = vld [vmem:[%s8037_s2 + $0x7] ss:$0 sm:$0xff] }
  0x29   :  { %5892 = vmatpush3.bf16.msra.mxu0 %v6567_v20  ;;  %v5384_v11 = vld [vmem:[%s8037_s2 + $0x2] ss:$0 sm:$0xff]  ;;  %v5385_v14 = vld [vmem:[%s8037_s2 + $0x3] ss:$0 sm:$0xff] }
  0x2a   :  { %5905 = vmatprep.subr.bf16.mxu0 %v6773_v1  ;;  %5900 = vmatpush3.bf16.msra.mxu1 %v6569_v22 }
  0x2b   :  { %5913 = vmatprep.subr.bf16.mxu1 %v6773_v1 }
  0x2c   :  { %5894 = vmatmul.mubr.msk.bf16.vlgmr.msra.gmra.mxu0 %vm235_vm1, %v6881_v6 }
  0x2d   :  { %5906 = vmatpush3.bf16.msra.mxu0 %v6570_v23  ;;  %5909 = vmatprep.mubr.msk.bf16.mxu0 %vm6774_vm0, %v6773_v1 }
  0x2e   :  { %5907 = vmatprep.subr.bf16.mxu0 %v6773_v1  ;;  %5902 = vmatmul.mubr.msk.bf16.vlgmr.msra.gmra.mxu1 %vm235_vm1, %v6881_v6 }
  0x2f   :  { %5914 = vmatpush3.bf16.msra.mxu1 %v6572_v25  ;;  %5917 = vmatprep.mubr.msk.bf16.mxu1 %vm6774_vm0, %v6773_v1 }
  0x30   :  { %5915 = vmatprep.subr.bf16.mxu1 %v6773_v1 }
  0x31   :  { %5908 = vmatpush3.bf16.msra.mxu0 %v6571_v24  ;;  %v5414_v24 = vld [vmem:[%s8037_s2 + $0x8] ss:$0 sm:$0xff] }
  0x32   :  { %5921 = vmatprep.subr.bf16.mxu0 %v6773_v1 }
  0x33   :  { %5916 = vmatpush3.bf16.msra.mxu1 %v6573_v26 }
  0x34   :  { %5910 = vmatmul.mubr.msk.bf16.vlgmr.msra.gmra.mxu0 %vm235_vm1, %v6881_v6  ;;  %5927 = vmatprep.subr.bf16.mxu1 %v6773_v1 }
  0x35   :  { %5923 = vmatprep.mubr.msk.bf16.mxu0 %vm6774_vm0, %v6773_v1 }
  0x36   :  { %5918 = vmatmul.mubr.msk.bf16.vlgmr.msra.gmra.mxu1 %vm235_vm1, %v6881_v6 }
  0x37   :  { %5929 = vmatprep.mubr.msk.bf16.mxu1 %vm6774_vm0, %v6773_v1 }
  0xc9   :  { %v273_v27 = vpop.f32.mrf.mxu0 }
  0xca   :  { %v325_v28 = vpop.f32.mrf.mxu1  ;;  %v274_v61 = vadd.f32 %v5382_v52, %v273_v27 }
  0xcb   :  { %v5831_v29 = vpop.f32.mrf.mxu0  ;;  %v326_v0 = vadd.f32 %v5383_v55, %v325_v28  ;;  %v5415_v28 = vld [vmem:[%s8037_s2 + $0x9] ss:$0 sm:$0xff] }
  0xcc   :  { %v5839_v30 = vpop.f32.mrf.mxu1  ;;  %v899_v7 = vpack.c.bf16 %v274_v61, %v274_v61 }
  0xcd   :  { %v276_v31 = vpop.f32.mrf.mxu0  ;;  %v900_v10 = vpack.c.bf16 %v326_v0, %v326_v0 }
  0xce   :  { %v328_v32 = vpop.f32.mrf.mxu1 }
  0xcf   :  { %v5832_v33 = vpop.f32.mrf.mxu0 }
  0xd0   :  { %v5840_v34 = vpop.f32.mrf.mxu1 }
  0xd1   :  { %v377_v35 = vpop.f32.mrf.mxu0 }
  0xd2   :  { %v429_v36 = vpop.f32.mrf.mxu1  ;;  %v378_v19 = vadd.f32 %v5384_v11, %v377_v35 }
  0xd3   :  { %v5847_v37 = vpop.f32.mrf.mxu0  ;;  %v430_v21 = vadd.f32 %v5385_v14, %v429_v36 }
  0xd4   :  { %v5855_v38 = vpop.f32.mrf.mxu1  ;;  %v901_v22 = vpack.c.bf16 %v378_v19, %v378_v19 }
  0xd5   :  { %v380_v39 = vpop.f32.mrf.mxu0  ;;  %v902_v23 = vpack.c.bf16 %v430_v21, %v430_v21 }
  0xd6   :  { %v432_v40 = vpop.f32.mrf.mxu1 }
  0xd7   :  { %v5848_v41 = vpop.f32.mrf.mxu0 }
  0xd8   :  { %v5856_v43 = vpop.f32.mrf.mxu1 }
  0xd9   :  { %v505_v45 = vpop.f32.mrf.mxu0 }
  0xda   :  { %v506_v46 = vadd.f32 %v5398_v42, %v505_v45  ;;  %v557_v47 = vpop.f32.mrf.mxu1 }
  0xdb   :  { %v558_v48 = vadd.f32 %v5399_v44, %v557_v47  ;;  %v5863_v49 = vpop.f32.mrf.mxu0 }
  0xdc   :  { %v903_v50 = vpack.c.bf16 %v506_v46, %v506_v46  ;;  %v5871_v51 = vpop.f32.mrf.mxu1 }
  0xdd   :  { %v904_v53 = vpack.c.bf16 %v558_v48, %v558_v48  ;;  %v508_v54 = vpop.f32.mrf.mxu0 }
  0xde   :  { %v912_v56 = vsel %vm907_vm2, %v903_v50, 0  ;;  %v560_v57 = vpop.f32.mrf.mxu1 }
  0xdf   :  { %v958_v58 = vsel %vm907_vm2, %v904_v53, 0  ;;  %v5864_v59 = vpop.f32.mrf.mxu0  ;;  %5922 = vmatpush3.bf16.xpose.msra.mxu0 %v912_v56 }
  0xe0   :  { %v5872_v62 = vpop.f32.mrf.mxu1  ;;  %5928 = vmatpush3.bf16.xpose.msra.mxu1 %v958_v58  ;;  %5933 = vmatprep.subr.bf16.mxu0 %v6773_v1 }
  0xe1   :  { %v609_v2 = vpop.f32.mrf.mxu0  ;;  %5939 = vmatprep.subr.bf16.mxu1 %v6773_v1 }
  0xe2   :  { %v610_v3 = vadd.f32 %v5400_v60, %v609_v2  ;;  %v661_v4 = vpop.f32.mrf.mxu1 }
  0xe3   :  { %v662_v5 = vadd.f32 %v5401_v63, %v661_v4  ;;  %v5879_v6 = vpop.f32.mrf.mxu0 }
  0xe4   :  { %v905_v8 = vpack.c.bf16 %v610_v3, %v610_v3  ;;  %v5887_v9 = vpop.f32.mrf.mxu1 }
  0xe5   :  { %v906_v12 = vpack.c.bf16 %v662_v5, %v662_v5  ;;  %v612_v13 = vpop.f32.mrf.mxu0 }
  0xe6   :  { %v1004_v15 = vsel %vm907_vm2, %v905_v8, 0  ;;  %v664_v16 = vpop.f32.mrf.mxu1  ;;  %5924 = vmatmul.mubr.msk.bf16.vlgmr.msra.gmra.mxu0 %vm907_vm2, %v899_v7 }
  0xe7   :  { %v1050_v17 = vsel %vm907_vm2, %v906_v12, 0  ;;  %5930 = vmatmul.mubr.msk.bf16.vlgmr.msra.gmra.mxu1 %vm907_vm2, %v900_v10  ;;  %v5880_v18 = vpop.f32.mrf.mxu0  ;;  %5934 = vmatpush3.bf16.xpose.msra.mxu0 %v1004_v15 }
  0xe8   :  { %v5888_v20 = vpop.f32.mrf.mxu1  ;;  %5940 = vmatpush3.bf16.xpose.msra.mxu1 %v1050_v17  ;;  %5935 = vmatprep.mubr.msk.bf16.mxu0 %vm6774_vm0, %v6773_v1 }
  0xe9   :  { %5941 = vmatprep.mubr.msk.bf16.mxu1 %vm6774_vm0, %v6773_v1  ;;  %5945 = vmatprep.subr.bf16.mxu0 %v6773_v1 }
  0xea   :  { %5951 = vmatprep.subr.bf16.mxu1 %v6773_v1 }
  0xec   :  { %v737_v25 = vpop.f32.mrf.mxu0 }
  0xed   :  { %v738_v26 = vadd.f32 %v5414_v24, %v737_v25 }
  0xee   :  { %5936 = vmatmul.mubr.msk.bf16.vlgmr.msra.gmra.mxu0 %vm907_vm2, %v901_v22  ;;  %v5895_v27 = vpop.f32.mrf.mxu0  ;;  %v789_v31 = vpop.f32.mrf.mxu1 }
  0xef   :  { %5942 = vmatmul.mubr.msk.bf16.vlgmr.msra.gmra.mxu1 %vm907_vm2, %v902_v23  ;;  %5947 = vmatprep.mubr.msk.bf16.mxu0 %vm6774_vm0, %v6773_v1  ;;  %v1140_v29 = vpack.c.bf16 %v738_v26, %v738_v26  ;;  %v790_v33 = vadd.f32 %v5415_v28, %v789_v31  ;;  %v5416_v27 = vld [vmem:[%s8037_s2 + $0xa] ss:$0 sm:$0xff] }
  0xf0   :  { %5953 = vmatprep.mubr.msk.bf16.mxu1 %vm6774_vm0, %v6773_v1  ;;  %v740_v30 = vpop.f32.mrf.mxu0  ;;  %v5903_v35 = vpop.f32.mrf.mxu1 }
  0xf1   :  { %v1149_v32 = vsel %vm1147_vm3, %v1140_v29, 0  ;;  %v1141_v36 = vpack.c.bf16 %v790_v33, %v790_v33  ;;  %v5417_v30 = vld [vmem:[%s8037_s2 + $0xb] ss:$0 sm:$0xff] }
  0xf2   :  { %v5896_v34 = vpop.f32.mrf.mxu0  ;;  %5946 = vmatpush3.bf16.msra.mxu0 %v1149_v32  ;;  %v792_v37 = vpop.f32.mrf.mxu1 }
  0xf3   :  { %5957 = vmatprep.subr.bf16.mxu0 %v6773_v1  ;;  %v1195_v39 = vsel %vm1147_vm3, %v1141_v36, 0 }
  0xf4   :  { %v7065_v38 = vpop.f32.mrf.mxu0  ;;  %v5904_v40 = vpop.f32.mrf.mxu1  ;;  %5952 = vmatpush3.bf16.msra.mxu1 %v1195_v39 }
  0xf5   :  { %5963 = vmatprep.subr.bf16.mxu1 %v6773_v1  ;;  %v842_v29 = vadd.f32 %v5416_v27, %v7065_v38 }
  0xf6   :  { %v5911_v41 = vpop.f32.mrf.mxu0  ;;  %v7069_v43 = vpop.f32.mrf.mxu1 }
  0xf7   :  { %v1142_v33 = vpack.c.bf16 %v842_v29, %v842_v29  ;;  %v894_v34 = vadd.f32 %v5417_v30, %v7069_v43  ;;  %v112_v43 = vld [vmem:[%s8038_s3] sm:$0xf] }
  0xf8   :  { %v844_v42 = vpop.f32.mrf.mxu0  ;;  %v5919_v45 = vpop.f32.mrf.mxu1  ;;  %v5442_v29 = vld [vmem:[%s8039_s4] ss:$0 sm:$0xff] }
  0xf9   :  { %v1241_v39 = vsel %vm1147_vm3, %v1142_v33, 0  ;;  %v1143_v40 = vpack.c.bf16 %v894_v34, %v894_v34 }
  0xfa   :  { %v5912_v44 = vpop.f32.mrf.mxu0  ;;  %v896_v46 = vpop.f32.mrf.mxu1 }
  0xfb   :  { %v1287_v44 = vsel %vm1147_vm3, %v1143_v40, 0  ;;  %v6577_v40 = vld [vmem:[%s8042_s7 + $0x18] sm:$0xff]  }
  0xfc   :  { %v5920_v47 = vpop.f32.mrf.mxu1 }
  0xfd   :  { %v7100_v47 = vsel %vm1147_vm3, %v112_v43, 0 }
 0x1a6   :  { %v948_v48 = vpop.f32.mrf.mxu0 }
 0x1a7   :  { %v994_v49 = vpop.f32.mrf.mxu1  ;;  %v1092_v50 = vsel %vm907_vm2, %v948_v48, -inf }
 0x1a8   :  { %1093 = vmax.xlane.f32.xlu0 %v1092_v50  ;;  %v5925_v51 = vpop.f32.mrf.mxu0  ;;  %v1095_v55 = vsel %vm907_vm2, %v994_v49, -inf }
 0x1a9   :  { %v5931_v52 = vpop.f32.mrf.mxu1  ;;  %v113_v51 = vld [vmem:[%s8038_s3 + $0x4] sm:$0xf] }
 0x1aa   :  { %v951_v53 = vpop.f32.mrf.mxu0  ;;  %v7115_v52 = vsel %vm1147_vm3, %v113_v51, 0 }
 0x1ab   :  { %v997_v54 = vpop.f32.mrf.mxu1  ;;  %v114_v53 = vld [vmem:[%s8038_s3 + $0x8] sm:$0xf] }
 0x1ac   :  { %1096 = vmax.xlane.f32.xlu0 %v1095_v55  ;;  %v5926_v56 = vpop.f32.mrf.mxu0 }
 0x1ad   :  { %v5932_v57 = vpop.f32.mrf.mxu1  ;;  %v7123_v56 = vsel %vm1147_vm3, %v114_v53, 0 }
 0x1ae   :  { %v1040_v58 = vpop.f32.mrf.mxu0 }
 0x1af   :  { %v1086_v59 = vpop.f32.mrf.mxu1  ;;  %v1098_v60 = vsel %vm907_vm2, %v1040_v58, -inf }
 0x1b0   :  { %1099 = vmax.xlane.f32.xlu1 %v1098_v60  ;;  %v5937_v61 = vpop.f32.mrf.mxu0  ;;  %v1101_v2 = vsel %vm907_vm2, %v1086_v59, -inf }
 0x1b1   :  { %v5943_v62 = vpop.f32.mrf.mxu1 }
 0x1b2   :  { %v1043_v63 = vpop.f32.mrf.mxu0 }
 0x1b3   :  { %v1089_v0 = vpop.f32.mrf.mxu1 }
 0x1b4   :  { %1102 = vmax.xlane.f32.xlu1 %v1101_v2  ;;  %v5938_v3 = vpop.f32.mrf.mxu0 }
 0x1b5   :  { %v5944_v4 = vpop.f32.mrf.mxu1 }
 0x231   :  { %v1094_v5 = vpop.xlane.xlu0 %1093 }
 0x232   :  { %v1104_v6 = vsub.f32 %v948_v48, %v1094_v5 }
 0x234   :  { %v1108_v7 = vmul.f32 1.442695, %v1104_v6 }
 0x235   :  { %v1097_v8 = vpop.xlane.xlu0 %1096 }
 0x236   :  { %6604 = vpow2.f32 %v1108_v7  ;;  %v1105_v9 = vsub.f32 %v994_v49, %v1097_v8 }
 0x238   :  { %v1110_v10 = vmul.f32 1.442695, %v1105_v9 }
 0x239   :  { %v1100_v11 = vpop.xlane.xlu1 %1099 }
 0x23a   :  { %6606 = vpow2.f32 %v1110_v10  ;;  %v1106_v12 = vsub.f32 %v1040_v58, %v1100_v11  ;;  %v115_v58 = vld [vmem:[%s8038_s3 + $0xc] sm:$0xf] }
 0x23b   :  { %v7133_v62 = vsel %vm1147_vm3, %v115_v58, 0  ;;  %v6585_v58 = vld [vmem:[%s8042_s7 + $0x58] sm:$0xff]  }
 0x23c   :  { %v1112_v13 = vmul.f32 1.442695, %v1106_v12 }
 0x23d   :  { %v1103_v14 = vpop.xlane.xlu1 %1102 }
 0x23e   :  { %6608 = vpow2.f32 %v1112_v13  ;;  %v1107_v15 = vsub.f32 %v1086_v59, %v1103_v14  ;;  %v6574_v14 = vld [vmem:[%s8040_s5 + $0x8] sm:$0xff]  }
 0x240   :  { %v1114_v16 = vmul.f32 1.442695, %v1107_v15  ;;  %v6575_v15 = vld [vmem:[%s8040_s5] sm:$0xff]  }
 0x242   :  { %6610 = vpow2.f32 %v1114_v16 }
 0x243   :  { %v6605_v17 = vpop.eup %6604 }
 0x244   :  { %v1116_v18 = vsel %vm907_vm2, %v6605_v17, 0.0 }
 0x245   :  { %1117 = vadd.xlane.f32.xlu0 %v1116_v18 }
 0x247   :  { %v6607_v19 = vpop.eup %6606 }
 0x248   :  { %v1119_v20 = vsel %vm907_vm2, %v6607_v19, 0.0 }
 0x249   :  { %1120 = vadd.xlane.f32.xlu1 %v1119_v20 }
 0x24b   :  { %v6609_v21 = vpop.eup %6608 }
 0x24c   :  { %v1122_v22 = vsel %vm907_vm2, %v6609_v21, 0.0 }
 0x24d   :  { %1123 = vadd.xlane.f32.xlu0 %v1122_v22 }
 0x24f   :  { %v6611_v23 = vpop.eup %6610 }
 0x250   :  { %v1125_v24 = vsel %vm907_vm2, %v6611_v23, 0.0 }
 0x251   :  { %1126 = vadd.xlane.f32.xlu1 %v1125_v24 }
 0x2ce   :  { %v1118_v25 = vpop.xlane.xlu0 %1117 }
 0x2cf   :  { %6612 = vrcp.f32 %v1118_v25 }
 0x2d2   :  { %v1121_v26 = vpop.xlane.xlu1 %1120 }
 0x2d3   :  { %6614 = vrcp.f32 %v1121_v26 }
 0x2d6   :  { %v1124_v28 = vpop.xlane.xlu0 %1123 }
 0x2d7   :  { %6616 = vrcp.f32 %v1124_v28 }
 0x2da   :  { %v1127_v31 = vpop.xlane.xlu1 %1126 }
 0x2db   :  { %6618 = vrcp.f32 %v1127_v31 }
 0x2dc   :  { %v6613_v32 = vpop.eup %6612 }
 0x2dd   :  { %v1132_v35 = vmul.f32 %v6613_v32, %v6605_v17 }
 0x2df   :  { %v1136_v36 = vpack.c.bf16 %v1132_v35, %v1132_v35 }
 0x2e0   :  { %v6615_v37 = vpop.eup %6614 }
 0x2e1   :  { %5948 = vmatmul.mubr.msk.bf16.vlgmr.msra.gmra.mxu0 %vm907_vm2, %v1136_v36  ;;  %v1133_v41 = vmul.f32 %v6615_v37, %v6607_v19 }
 0x2e2   :  { %5958 = vmatpush3.bf16.msra.mxu0 %v1241_v39  ;;  %5959 = vmatprep.mubr.msk.bf16.mxu0 %vm6774_vm0, %v6773_v1  ;;  %v6576_v39 = vld [vmem:[%s8042_s7 + $0x8] sm:$0xff]  }
 0x2e3   :  { %v1137_v38 = vpack.c.bf16 %v1133_v41, %v1133_v41  ;;  %5969 = vmatprep.subr.bf16.mxu0 %v6773_v1  ;;  %v6578_v41 = vld [vmem:[%s8042_s7] sm:$0xff]  }
 0x2e4   :  { %v6617_v42 = vpop.eup %6616 }
 0x2e5   :  { %5954 = vmatmul.mubr.msk.bf16.vlgmr.msra.gmra.mxu1 %vm907_vm2, %v1137_v38  ;;  %v1134_v45 = vmul.f32 %v6617_v42, %v6609_v21  ;;  %v6579_v38 = vld [vmem:[%s8042_s7 + $0x10] sm:$0xff]   ;;  %v5443_v42 = vld [vmem:[%s8041_s6] ss:$0 sm:$0xff] }
 0x2e6   :  { %5964 = vmatpush3.bf16.msra.mxu1 %v1287_v44  ;;  %5965 = vmatprep.mubr.msk.bf16.mxu1 %vm6774_vm0, %v6773_v1 }
 0x2e7   :  { %v1138_v46 = vpack.c.bf16 %v1134_v45, %v1134_v45  ;;  %5975 = vmatprep.subr.bf16.mxu1 %v6773_v1 }
 0x2e8   :  { %v6619_v48 = vpop.eup %6618 }
 0x2e9   :  { %5960 = vmatmul.mubr.msk.bf16.vlgmr.msra.gmra.mxu0 %vm907_vm2, %v1138_v46  ;;  %v1135_v49 = vmul.f32 %v6619_v48, %v6611_v23 }
 0x2ea   :  { %5970 = vmatpush3.bf16.msra.mxu0 %v7100_v47  ;;  %5971 = vmatprep.mubr.msk.bf16.mxu0 %vm6774_vm0, %v6773_v1 }
 0x2eb   :  { %v1139_v50 = vpack.c.bf16 %v1135_v49, %v1135_v49  ;;  %5981 = vmatprep.subr.bf16.mxu0 %v6773_v1  ;;  %v6580_v49 = vld [vmem:[%s8042_s7 + $0x28] sm:$0xff]  }
 0x2ed   :  { %5966 = vmatmul.mubr.msk.bf16.vlgmr.msra.gmra.mxu1 %vm907_vm2, %v1139_v50  ;;  %v6581_v50 = vld [vmem:[%s8042_s7 + $0x38] sm:$0xff]  }
 0x2ee   :  { %5977 = vmatprep.mubr.msk.bf16.mxu1 %vm6774_vm0, %v6773_v1  ;;  %5976 = vmatpush3.bf16.msra.mxu1 %v7115_v52 }
 0x2ef   :  { %5987 = vmatprep.subr.bf16.mxu1 %v6773_v1 }
 0x3a1   :  { %v1185_v54 = vpop.f32.mrf.mxu0 }
 0x3a2   :  { %v1329_v55 = vpack.c.bf16 %v1185_v54, %v1185_v54  ;;  %v6582_v54 = vld [vmem:[%s8042_s7 + $0x20] sm:$0xff]  }
 0x3a3   :  { %v5949_v57 = vpop.f32.mrf.mxu0 }
 0x3a4   :  { %5972 = vmatmul.mubr.msk.bf16.vlgmr.msra.gmra.mxu0 %vm907_vm2, %v1329_v55  ;;  %v6583_v55 = vld [vmem:[%s8042_s7 + $0x30] sm:$0xff]   ;;  %v6584_v57 = vld [vmem:[%s8042_s7 + $0x48] sm:$0xff]  }
 0x3a5   :  { %v1188_v59 = vpop.f32.mrf.mxu0  ;;  %v1231_v60 = vpop.f32.mrf.mxu1  ;;  %5982 = vmatpush3.bf16.msra.mxu0 %v7123_v56  ;;  %5983 = vmatprep.mubr.msk.bf16.mxu0 %vm6774_vm0, %v6773_v1 }
 0x3a6   :  { %v1330_v61 = vpack.c.bf16 %v1231_v60, %v1231_v60  ;;  %5993 = vmatprep.subr.bf16.mxu0 %v6773_v1  ;;  %v6586_v59 = vld [vmem:[%s8042_s7 + $0x40] sm:$0xff]   ;;  %v6587_v60 = vld [vmem:[%s8042_s7 + $0x50] sm:$0xff]  }
 0x3a7   :  { %v5950_v63 = vpop.f32.mrf.mxu0  ;;  %v5955_v0 = vpop.f32.mrf.mxu1 }
 0x3a8   :  { %5978 = vmatmul.mubr.msk.bf16.vlgmr.msra.gmra.mxu1 %vm907_vm2, %v1330_v61  ;;  %v6588_v61 = vld [vmem:[%s8042_s7 + $0x68] sm:$0xff]   ;;  %v6589_v63 = vld [vmem:[%s8042_s7 + $0x78] sm:$0xff]   ;;  %v6590_v0 = vld [vmem:[%s8042_s7 + $0x60] sm:$0xff]  }
 0x3a9   :  { %v1234_v2 = vpop.f32.mrf.mxu1  ;;  %v1277_v3 = vpop.f32.mrf.mxu0  ;;  %5988 = vmatpush3.bf16.msra.mxu1 %v7133_v62  ;;  %5989 = vmatprep.mubr.msk.bf16.mxu1 %vm6774_vm0, %v6773_v1 }
 0x3aa   :  { %v1331_v4 = vpack.c.bf16 %v1277_v3, %v1277_v3  ;;  %6001 = vmatprep.subr.bf16.mxu1 %v6773_v1  ;;  %v6591_v2 = vld [vmem:[%s8042_s7 + $0x70] sm:$0xff]   ;;  %v6592_v3 = vld [vmem:[%s8042_s7 + $0x88] sm:$0xff]  }
 0x3ab   :  { %v5956_v5 = vpop.f32.mrf.mxu1  ;;  %v5961_v6 = vpop.f32.mrf.mxu0 }
 0x3ac   :  { %5984 = vmatmul.mubr.msk.bf16.vlgmr.msra.gmra.mxu0 %vm907_vm2, %v1331_v4  ;;  %v6593_v4 = vld [vmem:[%s8042_s7 + $0x98] sm:$0xff]   ;;  %v6594_v5 = vld [vmem:[%s8042_s7 + $0x80] sm:$0xff]   ;;  %v6595_v6 = vld [vmem:[%s8042_s7 + $0x90] sm:$0xff]  }
 0x3ad   :  { %v1280_v7 = vpop.f32.mrf.mxu0  ;;  %v1323_v8 = vpop.f32.mrf.mxu1  ;;  %5997 = vmatprep.mubr.msk.bf16.mxu0 %vm6774_vm0, %v6773_v1  ;;  %5994 = vmatpush3.bf16.msra.mxu0 %v6574_v14 }
 0x3ae   :  { %v1332_v9 = vpack.c.bf16 %v1323_v8, %v1323_v8  ;;  %5995 = vmatprep.subr.bf16.mxu0 %v6773_v1  ;;  %v6596_v7 = vld [vmem:[%s8042_s7 + $0xa8] sm:$0xff]   ;;  %v6597_v8 = vld [vmem:[%s8042_s7 + $0xb8] sm:$0xff]  }
 0x3af   :  { %v5962_v10 = vpop.f32.mrf.mxu0  ;;  %v5967_v11 = vpop.f32.mrf.mxu1 }
 0x3b0   :  { %5990 = vmatmul.mubr.msk.bf16.vlgmr.msra.gmra.mxu1 %vm907_vm2, %v1332_v9  ;;  %v6598_v9 = vld [vmem:[%s8042_s7 + $0xa0] sm:$0xff]   ;;  %v6599_v10 = vld [vmem:[%s8042_s7 + $0xb0] sm:$0xff]  }
 0x3b1   :  { %v1326_v12 = vpop.f32.mrf.mxu1  ;;  %6005 = vmatprep.mubr.msk.bf16.mxu1 %vm6774_vm0, %v6773_v1  ;;  %5996 = vmatpush3.bf16.msra.mxu0 %v6575_v15 }
 0x3b2   :  { %6009 = vmatprep.subr.bf16.mxu0 %v6773_v1  ;;  %6002 = vmatpush3.bf16.msra.mxu1 %v6576_v39  ;;  %v5448_v39 = vld [vmem:[%s8043_s8 + $0x1] ss:$0 sm:$0xff] }
 0x3b3   :  { %v5968_v13 = vpop.f32.mrf.mxu1  ;;  %6003 = vmatprep.subr.bf16.mxu1 %v6773_v1 }
 0x3b6   :  { %6004 = vmatpush3.bf16.msra.mxu1 %v6578_v41 }
 0x3b7   :  { %6017 = vmatprep.subr.bf16.mxu1 %v6773_v1 }
 0x464   :  { %v1373_v16 = vpop.f32.mrf.mxu0 }
 0x466   :  { %v5973_v17 = vpop.f32.mrf.mxu0 }
 0x468   :  { %v1376_v18 = vpop.f32.mrf.mxu0  ;;  %v1419_v19 = vpop.f32.mrf.mxu1 }
 0x469   :  { %v1518_v24 = vadd.f32 %v1419_v19, %v1373_v16 }
 0x46a   :  { %v5974_v20 = vpop.f32.mrf.mxu0  ;;  %v5979_v21 = vpop.f32.mrf.mxu1 }
 0x46c   :  { %v1422_v22 = vpop.f32.mrf.mxu1  ;;  %v1465_v23 = vpop.f32.mrf.mxu0 }
 0x46d   :  { %v1519_v27 = vadd.f32 %v1518_v24, %v1465_v23 }
 0x46e   :  { %v5980_v25 = vpop.f32.mrf.mxu1  ;;  %v5985_v26 = vpop.f32.mrf.mxu0 }
 0x470   :  { %v1468_v28 = vpop.f32.mrf.mxu0  ;;  %v1511_v30 = vpop.f32.mrf.mxu1 }
 0x471   :  { %v1520_v31 = vadd.f32 %v1519_v27, %v1511_v30  ;;  %v5463_v27 = vld [vmem:[%s8043_s8 + $0x4] ss:$0 sm:$0xff]  ;;  %v5464_v28 = vld [vmem:[%s8043_s8 + $0x5] ss:$0 sm:$0xff] }
 0x472   :  { %v5986_v32 = vpop.f32.mrf.mxu0  ;;  %v5991_v33 = vpop.f32.mrf.mxu1 }
 0x473   :  { %v1527_v34 = vadd.f32 %v5442_v29, %v1520_v31 }
 0x474   :  { %v1514_v35 = vpop.f32.mrf.mxu1 }
 0x475   :  { %v1528_v36 = vpack.c.bf16 %v1527_v34, %v1527_v34 }
 0x476   :  { %v5992_v37 = vpop.f32.mrf.mxu1 }
 0x477   :  { %5998 = vmatmul.mubr.msk.bf16.vlgmr.msra.gmra.mxu0 %vm235_vm1, %v1528_v36  ;;  %v5447_v37 = vld [vmem:[%s8043_s8] ss:$0 sm:$0xff] }
 0x478   :  { %6013 = vmatprep.mubr.msk.bf16.mxu0 %vm6774_vm0, %v6773_v1  ;;  %6010 = vmatpush3.bf16.msra.mxu0 %v6577_v40 }
 0x479   :  { %6011 = vmatprep.subr.bf16.mxu0 %v6773_v1 }
 0x47c   :  { %6012 = vmatpush3.bf16.msra.mxu0 %v6579_v38 }
 0x47d   :  { %6025 = vmatprep.subr.bf16.mxu0 %v6773_v1 }
 0x537   :  { %v1584_v43 = vpop.f32.mrf.mxu0 }
 0x538   :  { %v1585_v44 = vadd.f32 %v5443_v42, %v1584_v43 }
 0x539   :  { %v5999_v45 = vpop.f32.mrf.mxu0 }
 0x53a   :  { %v1590_v46 = vmax.f32 %v1585_v44, 0.0  ;;  %v5465_v45 = vld [vmem:[%s8043_s8 + $0x6] ss:$0 sm:$0xff] }
 0x53b   :  { %v1587_v48 = vpop.f32.mrf.mxu0 }
 0x53c   :  { %v7186_v51 = vpack.c.bf16 %v1590_v46, %v1590_v46  ;;  %v5466_v46 = vld [vmem:[%s8043_s8 + $0x7] ss:$0 sm:$0xff] }
 0x53d   :  { %v6000_v53 = vpop.f32.mrf.mxu0 }
 0x53e   :  { %6006 = vmatmul.mubr.msk.bf16.vlgmr.msra.gmra.mxu1 %vm235_vm1, %v7186_v51  ;;  %6014 = vmatmul.mubr.msk.bf16.vlgmr.msra.gmra.mxu0 %vm235_vm1, %v7186_v51 }
 0x53f   :  { %6018 = vmatpush3.bf16.msra.mxu1 %v6580_v49  ;;  %6026 = vmatpush3.bf16.msra.mxu0 %v6581_v50 }
 0x540   :  { %6019 = vmatprep.subr.bf16.mxu1 %v6773_v1  ;;  %6027 = vmatprep.subr.bf16.mxu0 %v6773_v1 }
 0x541   :  { %6021 = vmatprep.mubr.msk.bf16.mxu1 %vm6774_vm0, %v6773_v1  ;;  %6029 = vmatprep.mubr.msk.bf16.mxu0 %vm6774_vm0, %v6773_v1 }
 0x543   :  { %6020 = vmatpush3.bf16.msra.mxu1 %v6582_v54  ;;  %6028 = vmatpush3.bf16.msra.mxu0 %v6583_v55 }
 0x544   :  { %6033 = vmatprep.subr.bf16.mxu1 %v6773_v1  ;;  %6041 = vmatprep.subr.bf16.mxu0 %v6773_v1 }
 0x546   :  { %6022 = vmatmul.mubr.msk.bf16.vlgmr.msra.gmra.mxu1 %vm235_vm1, %v7186_v51  ;;  %6030 = vmatmul.mubr.msk.bf16.vlgmr.msra.gmra.mxu0 %vm235_vm1, %v7186_v51 }
 0x547   :  { %6034 = vmatpush3.bf16.msra.mxu1 %v6584_v57  ;;  %6042 = vmatpush3.bf16.msra.mxu0 %v6585_v58 }
 0x548   :  { %6035 = vmatprep.subr.bf16.mxu1 %v6773_v1  ;;  %6043 = vmatprep.subr.bf16.mxu0 %v6773_v1 }
 0x549   :  { %6037 = vmatprep.mubr.msk.bf16.mxu1 %vm6774_vm0, %v6773_v1  ;;  %6045 = vmatprep.mubr.msk.bf16.mxu0 %vm6774_vm0, %v6773_v1 }
 0x54b   :  { %6036 = vmatpush3.bf16.msra.mxu1 %v6586_v59  ;;  %6044 = vmatpush3.bf16.msra.mxu0 %v6587_v60 }
 0x54c   :  { %6049 = vmatprep.subr.bf16.mxu1 %v6773_v1  ;;  %6057 = vmatprep.subr.bf16.mxu0 %v6773_v1 }
 0x54e   :  { %6038 = vmatmul.mubr.msk.bf16.vlgmr.msra.gmra.mxu1 %vm235_vm1, %v7186_v51  ;;  %6046 = vmatmul.mubr.msk.bf16.vlgmr.msra.gmra.mxu0 %vm235_vm1, %v7186_v51 }
 0x54f   :  { %6050 = vmatpush3.bf16.msra.mxu1 %v6588_v61  ;;  %6058 = vmatpush3.bf16.msra.mxu0 %v6589_v63  ;;  %v5449_v63 = vld [vmem:[%s8043_s8 + $0x2] ss:$0 sm:$0xff] }
 0x550   :  { %6051 = vmatprep.subr.bf16.mxu1 %v6773_v1  ;;  %6059 = vmatprep.subr.bf16.mxu0 %v6773_v1 }
 0x551   :  { %6053 = vmatprep.mubr.msk.bf16.mxu1 %vm6774_vm0, %v6773_v1  ;;  %6061 = vmatprep.mubr.msk.bf16.mxu0 %vm6774_vm0, %v6773_v1 }
 0x553   :  { %6052 = vmatpush3.bf16.msra.mxu1 %v6590_v0  ;;  %6060 = vmatpush3.bf16.msra.mxu0 %v6591_v2  ;;  %v5450_v0 = vld [vmem:[%s8043_s8 + $0x3] ss:$0 sm:$0xff] }
 0x554   :  { %6065 = vmatprep.subr.bf16.mxu1 %v6773_v1  ;;  %6073 = vmatprep.subr.bf16.mxu0 %v6773_v1 }
 0x556   :  { %6054 = vmatmul.mubr.msk.bf16.vlgmr.msra.gmra.mxu1 %vm235_vm1, %v7186_v51  ;;  %6062 = vmatmul.mubr.msk.bf16.vlgmr.msra.gmra.mxu0 %vm235_vm1, %v7186_v51 }
 0x557   :  { %6066 = vmatpush3.bf16.msra.mxu1 %v6592_v3  ;;  %6074 = vmatpush3.bf16.msra.mxu0 %v6593_v4 }
 0x558   :  { %6067 = vmatprep.subr.bf16.mxu1 %v6773_v1  ;;  %6075 = vmatprep.subr.bf16.mxu0 %v6773_v1 }
 0x559   :  { %6069 = vmatprep.mubr.msk.bf16.mxu1 %vm6774_vm0, %v6773_v1  ;;  %6077 = vmatprep.mubr.msk.bf16.mxu0 %vm6774_vm0, %v6773_v1 }
 0x55b   :  { %6068 = vmatpush3.bf16.msra.mxu1 %v6594_v5  ;;  %6076 = vmatpush3.bf16.msra.mxu0 %v6595_v6 }
 0x55c   :  { %6081 = vmatprep.subr.bf16.mxu1 %v6773_v1  ;;  %6089 = vmatprep.subr.bf16.mxu0 %v6773_v1 }
 0x55e   :  { %6070 = vmatmul.mubr.msk.bf16.vlgmr.msra.gmra.mxu1 %vm235_vm1, %v7186_v51  ;;  %6078 = vmatmul.mubr.msk.bf16.vlgmr.msra.gmra.mxu0 %vm235_vm1, %v7186_v51 }
 0x55f   :  { %6082 = vmatpush3.bf16.msra.mxu1 %v6596_v7  ;;  %6090 = vmatpush3.bf16.msra.mxu0 %v6597_v8  ;;  %v5479_v8 = vld [vmem:[%s8043_s8 + $0x8] ss:$0 sm:$0xff] }
 0x560   :  { %6083 = vmatprep.subr.bf16.mxu1 %v6773_v1  ;;  %6091 = vmatprep.subr.bf16.mxu0 %v6773_v1 }
 0x561   :  { %6085 = vmatprep.mubr.msk.bf16.mxu1 %vm6774_vm0, %v6773_v1  ;;  %6093 = vmatprep.mubr.msk.bf16.mxu0 %vm6774_vm0, %v6773_v1 }
 0x563   :  { %6084 = vmatpush3.bf16.msra.mxu1 %v6598_v9  ;;  %6092 = vmatpush3.bf16.msra.mxu0 %v6599_v10  ;;  %v5480_v9 = vld [vmem:[%s8043_s8 + $0x9] ss:$0 sm:$0xff] }
 0x564   :  { %6097 = vmatprep.subr.bf16.mxu1 %v6773_v1  ;;  %6103 = vmatprep.subr.bf16.mxu0 %v6773_v1 }
 0x566   :  { %6086 = vmatmul.mubr.msk.bf16.vlgmr.msra.gmra.mxu1 %vm235_vm1, %v7186_v51  ;;  %6094 = vmatmul.mubr.msk.bf16.vlgmr.msra.gmra.mxu0 %vm235_vm1, %v7186_v51 }
 0x567   :  { %6099 = vmatprep.mubr.msk.bf16.mxu1 %vm6774_vm0, %v6773_v1  ;;  %6105 = vmatprep.mubr.msk.bf16.mxu0 %vm6774_vm0, %v6773_v1 }
 0x5fe   :  { %v1665_v11 = vpop.f32.mrf.mxu1  ;;  %v1717_v12 = vpop.f32.mrf.mxu0 }
 0x5ff   :  { %v1666_v48 = vadd.f32 %v5447_v37, %v1665_v11  ;;  %v1718_v49 = vadd.f32 %v5448_v39, %v1717_v12 }
 0x600   :  { %v6007_v13 = vpop.f32.mrf.mxu1  ;;  %v6015_v14 = vpop.f32.mrf.mxu0 }
 0x601   :  { %v2291_v58 = vpack.c.bf16 %v1666_v48, %v1666_v48  ;;  %v2292_v59 = vpack.c.bf16 %v1718_v49, %v1718_v49 }
 0x602   :  { %v1668_v15 = vpop.f32.mrf.mxu1  ;;  %v1720_v16 = vpop.f32.mrf.mxu0 }
 0x604   :  { %v6008_v17 = vpop.f32.mrf.mxu1  ;;  %v6016_v18 = vpop.f32.mrf.mxu0 }
 0x606   :  { %v1769_v19 = vpop.f32.mrf.mxu1  ;;  %v1821_v20 = vpop.f32.mrf.mxu0 }
 0x607   :  { %v1770_v10 = vadd.f32 %v5449_v63, %v1769_v19  ;;  %v1822_v11 = vadd.f32 %v5450_v0, %v1821_v20 }
 0x608   :  { %v6023_v21 = vpop.f32.mrf.mxu1  ;;  %v6031_v22 = vpop.f32.mrf.mxu0 }
 0x609   :  { %v2293_v18 = vpack.c.bf16 %v1770_v10, %v1770_v10  ;;  %v2294_v21 = vpack.c.bf16 %v1822_v11, %v1822_v11 }
 0x60a   :  { %v1772_v23 = vpop.f32.mrf.mxu1  ;;  %v1824_v24 = vpop.f32.mrf.mxu0 }
 0x60c   :  { %v6024_v25 = vpop.f32.mrf.mxu1  ;;  %v6032_v26 = vpop.f32.mrf.mxu0 }
 0x60e   :  { %v1897_v29 = vpop.f32.mrf.mxu1  ;;  %v1949_v30 = vpop.f32.mrf.mxu0 }
 0x60f   :  { %v1898_v31 = vadd.f32 %v5463_v27, %v1897_v29  ;;  %v1950_v32 = vadd.f32 %v5464_v28, %v1949_v30 }
 0x610   :  { %v6039_v33 = vpop.f32.mrf.mxu1  ;;  %v6047_v34 = vpop.f32.mrf.mxu0 }
 0x611   :  { %v2295_v35 = vpack.c.bf16 %v1898_v31, %v1898_v31  ;;  %v2296_v36 = vpack.c.bf16 %v1950_v32, %v1950_v32 }
 0x612   :  { %v1900_v40 = vpop.f32.mrf.mxu1  ;;  %v1952_v41 = vpop.f32.mrf.mxu0 }
 0x613   :  { %v2303_v38 = vsel %vm907_vm2, %v2295_v35, 0  ;;  %v2349_v42 = vsel %vm907_vm2, %v2296_v36, 0 }
 0x614   :  { %v6040_v43 = vpop.f32.mrf.mxu1  ;;  %v6048_v44 = vpop.f32.mrf.mxu0  ;;  %6098 = vmatpush3.bf16.xpose.msra.mxu1 %v2303_v38  ;;  %6104 = vmatpush3.bf16.xpose.msra.mxu0 %v2349_v42 }
 0x615   :  { %6109 = vmatprep.subr.bf16.mxu1 %v6773_v1  ;;  %6115 = vmatprep.subr.bf16.mxu0 %v6773_v1 }
 0x616   :  { %v2001_v50 = vpop.f32.mrf.mxu1  ;;  %v2053_v51 = vpop.f32.mrf.mxu0 }
 0x617   :  { %v2002_v53 = vadd.f32 %v5465_v45, %v2001_v50  ;;  %v2054_v54 = vadd.f32 %v5466_v46, %v2053_v51 }
 0x618   :  { %v6055_v55 = vpop.f32.mrf.mxu1  ;;  %v6063_v57 = vpop.f32.mrf.mxu0 }
 0x619   :  { %v2297_v60 = vpack.c.bf16 %v2002_v53, %v2002_v53  ;;  %v2298_v61 = vpack.c.bf16 %v2054_v54, %v2054_v54 }
 0x61a   :  { %v2004_v2 = vpop.f32.mrf.mxu1  ;;  %v2056_v3 = vpop.f32.mrf.mxu0 }
 0x61b   :  { %v2395_v4 = vsel %vm907_vm2, %v2297_v60, 0  ;;  %v2441_v5 = vsel %vm907_vm2, %v2298_v61, 0  ;;  %6100 = vmatmul.mubr.msk.bf16.vlgmr.msra.gmra.mxu1 %vm907_vm2, %v2291_v58  ;;  %6106 = vmatmul.mubr.msk.bf16.vlgmr.msra.gmra.mxu0 %vm907_vm2, %v2292_v59 }
 0x61c   :  { %v6056_v6 = vpop.f32.mrf.mxu1  ;;  %v6064_v7 = vpop.f32.mrf.mxu0  ;;  %6110 = vmatpush3.bf16.xpose.msra.mxu1 %v2395_v4  ;;  %6116 = vmatpush3.bf16.xpose.msra.mxu0 %v2441_v5 }
 0x61d   :  { %6111 = vmatprep.mubr.msk.bf16.mxu1 %vm6774_vm0, %v6773_v1  ;;  %6117 = vmatprep.mubr.msk.bf16.mxu0 %vm6774_vm0, %v6773_v1 }
 0x61e   :  { %v2129_v12 = vpop.f32.mrf.mxu1  ;;  %v2181_v13 = vpop.f32.mrf.mxu0  ;;  %6121 = vmatprep.subr.bf16.mxu1 %v6773_v1  ;;  %6127 = vmatprep.subr.bf16.mxu0 %v6773_v1 }
 0x61f   :  { %v2130_v14 = vadd.f32 %v5479_v8, %v2129_v12  ;;  %v2182_v15 = vadd.f32 %v5480_v9, %v2181_v13 }
 0x620   :  { %v6071_v16 = vpop.f32.mrf.mxu1  ;;  %v6079_v17 = vpop.f32.mrf.mxu0 }
 0x621   :  { %v2531_v19 = vpack.c.bf16 %v2130_v14, %v2130_v14  ;;  %v2532_v20 = vpack.c.bf16 %v2182_v15, %v2182_v15 }
 0x622   :  { %v2132_v22 = vpop.f32.mrf.mxu1  ;;  %v2184_v23 = vpop.f32.mrf.mxu0 }
 0x623   :  { %v2539_v24 = vsel %vm1147_vm3, %v2531_v19, 0  ;;  %v2585_v25 = vsel %vm1147_vm3, %v2532_v20, 0  ;;  %6112 = vmatmul.mubr.msk.bf16.vlgmr.msra.gmra.mxu1 %vm907_vm2, %v2293_v18  ;;  %6118 = vmatmul.mubr.msk.bf16.vlgmr.msra.gmra.mxu0 %vm907_vm2, %v2294_v21  ;;  %v5481_v21 = vld [vmem:[%s8043_s8 + $0xa] ss:$0 sm:$0xff]  ;;  %v5482_v20 = vld [vmem:[%s8043_s8 + $0xb] ss:$0 sm:$0xff] }
 0x624   :  { %v6072_v26 = vpop.f32.mrf.mxu1  ;;  %v6080_v27 = vpop.f32.mrf.mxu0  ;;  %6122 = vmatpush3.bf16.msra.mxu1 %v2539_v24  ;;  %6128 = vmatpush3.bf16.msra.mxu0 %v2585_v25 }
 0x625   :  { %6123 = vmatprep.mubr.msk.bf16.mxu1 %vm6774_vm0, %v6773_v1  ;;  %6129 = vmatprep.mubr.msk.bf16.mxu0 %vm6774_vm0, %v6773_v1 }
 0x626   :  { %v7362_v28 = vpop.f32.mrf.mxu1  ;;  %v7364_v29 = vpop.f32.mrf.mxu0  ;;  %6133 = vmatprep.subr.bf16.mxu1 %v6773_v1  ;;  %6139 = vmatprep.subr.bf16.mxu0 %v6773_v1 }
 0x627   :  { %v2234_v23 = vadd.f32 %v5481_v21, %v7362_v28  ;;  %v2286_v24 = vadd.f32 %v5482_v20, %v7364_v29  ;;  %v182_v29 = vld [vmem:[%s8044_s9] sm:$0xf] }
 0x628   :  { %v6087_v30 = vpop.f32.mrf.mxu1  ;;  %v6095_v31 = vpop.f32.mrf.mxu0 }
 0x629   :  { %v2533_v27 = vpack.c.bf16 %v2234_v23, %v2234_v23  ;;  %v2534_v31 = vpack.c.bf16 %v2286_v24, %v2286_v24  ;;  %v5507_v24 = vld [vmem:[%s8045_s10] ss:$0 sm:$0xff] }
 0x62a   :  { %v2236_v32 = vpop.f32.mrf.mxu1  ;;  %v2288_v33 = vpop.f32.mrf.mxu0 }
 0x62c   :  { %v6088_v34 = vpop.f32.mrf.mxu1  ;;  %v6096_v35 = vpop.f32.mrf.mxu0 }
 0x62d   :  { %v2631_v35 = vsel %vm1147_vm3, %v2533_v27, 0 }
 0x6db   :  { %v2339_v36 = vpop.f32.mrf.mxu1  ;;  %v2385_v37 = vpop.f32.mrf.mxu0 }
 0x6dc   :  { %v2483_v39 = vsel %vm907_vm2, %v2339_v36, -inf  ;;  %v2486_v40 = vsel %vm907_vm2, %v2385_v37, -inf }
 0x6dd   :  { %2484 = vmax.xlane.f32.xlu0 %v2483_v39  ;;  %v6101_v41 = vpop.f32.mrf.mxu1  ;;  %2487 = vmax.xlane.f32.xlu1 %v2486_v40  ;;  %v6107_v38 = vpop.f32.mrf.mxu0  ;;  %v183_v40 = vld [vmem:[%s8044_s9 + $0x4] sm:$0xf] }
 0x6df   :  { %v2342_v42 = vpop.f32.mrf.mxu1  ;;  %v2388_v43 = vpop.f32.mrf.mxu0 }
 0x6e0   :  { %v7401_v42 = vsel %vm1147_vm3, %v182_v29, 0 }
 0x6e1   :  { %v6102_v44 = vpop.f32.mrf.mxu1  ;;  %v6108_v45 = vpop.f32.mrf.mxu0 }
 0x6e2   :  { %v7404_v44 = vsel %vm1147_vm3, %v183_v40, 0  ;;  %v184_v45 = vld [vmem:[%s8044_s9 + $0x8] sm:$0xf]  ;;  %v6671_v40 = vld [vmem:[%s8036_s1 + $0x20] sm:$0xff]  }
 0x6e3   :  { %v2431_v46 = vpop.f32.mrf.mxu1  ;;  %v2477_v48 = vpop.f32.mrf.mxu0 }
 0x6e4   :  { %v2489_v49 = vsel %vm907_vm2, %v2431_v46, -inf  ;;  %v2492_v50 = vsel %vm907_vm2, %v2477_v48, -inf }
 0x6e5   :  { %2490 = vmax.xlane.f32.xlu0 %v2489_v49  ;;  %v6113_v51 = vpop.f32.mrf.mxu1  ;;  %2493 = vmax.xlane.f32.xlu1 %v2492_v50  ;;  %v6119_v53 = vpop.f32.mrf.mxu0 }
 0x6e6   :  { %v7423_v51 = vsel %vm1147_vm3, %v184_v45, 0  ;;  %v6675_v45 = vld [vmem:[%s8036_s1 + $0x60] sm:$0xff]  }
 0x6e7   :  { %v2434_v54 = vpop.f32.mrf.mxu1  ;;  %v2480_v55 = vpop.f32.mrf.mxu0 }
 0x6e9   :  { %v6114_v57 = vpop.f32.mrf.mxu1  ;;  %v6120_v58 = vpop.f32.mrf.mxu0 }
 0x766   :  { %v2485_v59 = vpop.xlane.xlu0 %2484  ;;  %v2488_v60 = vpop.xlane.xlu1 %2487 }
 0x767   :  { %v2495_v61 = vsub.f32 %v2339_v36, %v2485_v59  ;;  %v2496_v63 = vsub.f32 %v2385_v37, %v2488_v60  ;;  %v2677_v36 = vsel %vm1147_vm3, %v2534_v31, 0 }
 0x769   :  { %v2499_v0 = vmul.f32 1.442695, %v2495_v61  ;;  %v2501_v2 = vmul.f32 1.442695, %v2496_v63 }
 0x76b   :  { %6620 = vpow2.f32 %v2499_v0 }
 0x76c   :  { %6622 = vpow2.f32 %v2501_v2 }
 0x76e   :  { %v2491_v3 = vpop.xlane.xlu0 %2490  ;;  %v2494_v4 = vpop.xlane.xlu1 %2493 }
 0x76f   :  { %v2497_v5 = vsub.f32 %v2431_v46, %v2491_v3  ;;  %v2498_v6 = vsub.f32 %v2477_v48, %v2494_v4  ;;  %v185_v46 = vld [vmem:[%s8044_s9 + $0xc] sm:$0xf] }
 0x770   :  { %v7426_v55 = vsel %vm1147_vm3, %v185_v46, 0  ;;  %v6676_v46 = vld [vmem:[%s8036_s1 + $0x88] sm:$0xff]  }
 0x771   :  { %v2503_v7 = vmul.f32 1.442695, %v2497_v5  ;;  %v2505_v8 = vmul.f32 1.442695, %v2498_v6 }
 0x773   :  { %6624 = vpow2.f32 %v2503_v7 }
 0x774   :  { %6626 = vpow2.f32 %v2505_v8 }
 0x778   :  { %v6621_v9 = vpop.eup %6620 }
 0x779   :  { %v6623_v10 = vpop.eup %6622  ;;  %v2507_v11 = vsel %vm907_vm2, %v6621_v9, 0.0 }
 0x77a   :  { %2508 = vadd.xlane.f32.xlu0 %v2507_v11  ;;  %v2510_v12 = vsel %vm907_vm2, %v6623_v10, 0.0  ;;  %v6601_v11 = vld [vmem:[%s8046_s11] sm:$0xff]  }
 0x77b   :  { %2511 = vadd.xlane.f32.xlu1 %v2510_v12 }
 0x780   :  { %v6625_v13 = vpop.eup %6624 }
 0x781   :  { %v6627_v14 = vpop.eup %6626  ;;  %v2513_v15 = vsel %vm907_vm2, %v6625_v13, 0.0 }
 0x782   :  { %2514 = vadd.xlane.f32.xlu0 %v2513_v15  ;;  %v2516_v16 = vsel %vm907_vm2, %v6627_v14, 0.0 }
 0x783   :  { %2517 = vadd.xlane.f32.xlu1 %v2516_v16 }
 0x803   :  { %v2509_v17 = vpop.xlane.xlu0 %2508 }
 0x804   :  { %6628 = vrcp.f32 %v2509_v17  ;;  %v2512_v18 = vpop.xlane.xlu1 %2511 }
 0x805   :  { %6630 = vrcp.f32 %v2512_v18 }
 0x80b   :  { %v2515_v19 = vpop.xlane.xlu0 %2514 }
 0x80c   :  { %6632 = vrcp.f32 %v2515_v19  ;;  %v2518_v22 = vpop.xlane.xlu1 %2517 }
 0x80d   :  { %6634 = vrcp.f32 %v2518_v22 }
 0x811   :  { %v6629_v25 = vpop.eup %6628 }
 0x812   :  { %v6631_v26 = vpop.eup %6630  ;;  %v2523_v30 = vmul.f32 %v6629_v25, %v6621_v9 }
 0x813   :  { %v2524_v32 = vmul.f32 %v6631_v26, %v6623_v10  ;;  %v6600_v10 = vld [vmem:[%s8046_s11 + $0x8] sm:$0xff]  }
 0x814   :  { %v2527_v33 = vpack.c.bf16 %v2523_v30, %v2523_v30 }
 0x815   :  { %v2528_v34 = vpack.c.bf16 %v2524_v32, %v2524_v32 }
 0x816   :  { %6124 = vmatmul.mubr.msk.bf16.vlgmr.msra.gmra.mxu1 %vm907_vm2, %v2527_v33 }
 0x817   :  { %6130 = vmatmul.mubr.msk.bf16.vlgmr.msra.gmra.mxu0 %vm907_vm2, %v2528_v34  ;;  %6134 = vmatpush3.bf16.msra.mxu1 %v2631_v35 }
 0x818   :  { %6140 = vmatpush3.bf16.msra.mxu0 %v2677_v36  ;;  %6135 = vmatprep.mubr.msk.bf16.mxu1 %vm6774_vm0, %v6773_v1  ;;  %v6668_v36 = vld [vmem:[%s8036_s1 + $0x8] sm:$0xff]  }
 0x819   :  { %v6633_v28 = vpop.eup %6632  ;;  %6141 = vmatprep.mubr.msk.bf16.mxu0 %vm6774_vm0, %v6773_v1  ;;  %6145 = vmatprep.subr.bf16.mxu1 %v6773_v1 }
 0x81a   :  { %v6635_v37 = vpop.eup %6634  ;;  %v2525_v39 = vmul.f32 %v6633_v28, %v6625_v13  ;;  %6151 = vmatprep.subr.bf16.mxu0 %v6773_v1  ;;  %v3044_v28 = vld [vmem:[%s8035_s0 + $0x8] sm:$0xff] }
 0x81b   :  { %v2526_v41 = vmul.f32 %v6635_v37, %v6627_v14  ;;  %v7465_v29 = vpack.c.bf16 %v3044_v28, %v3044_v28  ;;  %v6669_v37 = vld [vmem:[%s8036_s1] sm:$0xff]  }
 0x81c   :  { %v2529_v38 = vpack.c.bf16 %v2525_v39, %v2525_v39  ;;  %v6670_v39 = vld [vmem:[%s8036_s1 + $0x28] sm:$0xff]  }
 0x81d   :  { %v2530_v43 = vpack.c.bf16 %v2526_v41, %v2526_v41  ;;  %v6672_v41 = vld [vmem:[%s8036_s1 + $0x48] sm:$0xff]  }
 0x81e   :  { %6136 = vmatmul.mubr.msk.bf16.vlgmr.msra.gmra.mxu1 %vm907_vm2, %v2529_v38  ;;  %v6673_v38 = vld [vmem:[%s8036_s1 + $0x40] sm:$0xff]  }
 0x81f   :  { %6142 = vmatmul.mubr.msk.bf16.vlgmr.msra.gmra.mxu0 %vm907_vm2, %v2530_v43  ;;  %6146 = vmatpush3.bf16.msra.mxu1 %v7401_v42  ;;  %v6674_v43 = vld [vmem:[%s8036_s1 + $0x68] sm:$0xff]  }
 0x820   :  { %6152 = vmatpush3.bf16.msra.mxu0 %v7404_v44  ;;  %6147 = vmatprep.mubr.msk.bf16.mxu1 %vm6774_vm0, %v6773_v1 }
 0x821   :  { %6153 = vmatprep.mubr.msk.bf16.mxu0 %vm6774_vm0, %v6773_v1  ;;  %6157 = vmatprep.subr.bf16.mxu1 %v6773_v1 }
 0x822   :  { %6163 = vmatprep.subr.bf16.mxu0 %v6773_v1 }
 0x8d6   :  { %v2575_v48 = vpop.f32.mrf.mxu1 }
 0x8d7   :  { %v2719_v49 = vpack.c.bf16 %v2575_v48, %v2575_v48  ;;  %v2621_v50 = vpop.f32.mrf.mxu0  ;;  %v6677_v48 = vld [vmem:[%s8036_s1 + $0x80] sm:$0xff]  }
 0x8d8   :  { %v2720_v53 = vpack.c.bf16 %v2621_v50, %v2621_v50  ;;  %v6125_v54 = vpop.f32.mrf.mxu1  ;;  %v6679_v50 = vld [vmem:[%s8036_s1 + $0xa0] sm:$0xff]  }
 0x8d9   :  { %v6131_v57 = vpop.f32.mrf.mxu0  ;;  %6148 = vmatmul.mubr.msk.bf16.vlgmr.msra.gmra.mxu1 %vm907_vm2, %v2719_v49  ;;  %v6678_v49 = vld [vmem:[%s8036_s1 + $0xa8] sm:$0xff]   ;;  %v6603_v54 = vld [vmem:[%s8048_s13] sm:$0xff]  }
 0x8da   :  { %6154 = vmatmul.mubr.msk.bf16.vlgmr.msra.gmra.mxu0 %vm907_vm2, %v2720_v53  ;;  %v2578_v58 = vpop.f32.mrf.mxu1  ;;  %6158 = vmatpush3.bf16.msra.mxu1 %v7423_v51  ;;  %v6602_v53 = vld [vmem:[%s8048_s13 + $0x8] sm:$0xff]   ;;  %v5508_v57 = vld [vmem:[%s8047_s12] ss:$0 sm:$0xff] }
 0x8db   :  { %v2624_v59 = vpop.f32.mrf.mxu0  ;;  %6164 = vmatpush3.bf16.msra.mxu0 %v7426_v55  ;;  %6159 = vmatprep.mubr.msk.bf16.mxu1 %vm6774_vm0, %v6773_v1 }
 0x8dc   :  { %v6126_v60 = vpop.f32.mrf.mxu1  ;;  %6165 = vmatprep.mubr.msk.bf16.mxu0 %vm6774_vm0, %v6773_v1  ;;  %6169 = vmatprep.subr.bf16.mxu1 %v6773_v1 }
 0x8dd   :  { %v6132_v61 = vpop.f32.mrf.mxu0  ;;  %6177 = vmatprep.subr.bf16.mxu0 %v6773_v1 }
 0x8de   :  { %v2667_v63 = vpop.f32.mrf.mxu1 }
 0x8df   :  { %v2721_v0 = vpack.c.bf16 %v2667_v63, %v2667_v63  ;;  %v2713_v2 = vpop.f32.mrf.mxu0 }
 0x8e0   :  { %v2722_v3 = vpack.c.bf16 %v2713_v2, %v2713_v2  ;;  %v6137_v4 = vpop.f32.mrf.mxu1 }
 0x8e1   :  { %v6143_v5 = vpop.f32.mrf.mxu0  ;;  %6160 = vmatmul.mubr.msk.bf16.vlgmr.msra.gmra.mxu1 %vm907_vm2, %v2721_v0  ;;  %v6680_v4 = vld [vmem:[%s8036_s1 + $0x18] sm:$0xff]  }
 0x8e2   :  { %6166 = vmatmul.mubr.msk.bf16.vlgmr.msra.gmra.mxu0 %vm907_vm2, %v2722_v3  ;;  %v2670_v6 = vpop.f32.mrf.mxu1  ;;  %6173 = vmatprep.mubr.msk.bf16.mxu1 %vm6774_vm0, %v6773_v1 }
 0x8e3   :  { %v2716_v7 = vpop.f32.mrf.mxu0  ;;  %6181 = vmatprep.mubr.msk.bf16.mxu0 %vm6774_vm0, %v6773_v1  ;;  %6170 = vmatpush3.bf16.msra.mxu1 %v6600_v10  ;;  %v6682_v10 = vld [vmem:[%s8036_s1 + $0x38] sm:$0xff]  }
 0x8e4   :  { %v6138_v8 = vpop.f32.mrf.mxu1  ;;  %6171 = vmatprep.subr.bf16.mxu1 %v6773_v1  ;;  %6178 = vmatpush3.bf16.msra.mxu0 %v6602_v53  ;;  %v6681_v7 = vld [vmem:[%s8036_s1 + $0x10] sm:$0xff]  }
 0x8e5   :  { %v6144_v9 = vpop.f32.mrf.mxu0  ;;  %6179 = vmatprep.subr.bf16.mxu0 %v6773_v1 }
 0x8e7   :  { %6172 = vmatpush3.bf16.msra.mxu1 %v6601_v11 }
 0x8e8   :  { %6185 = vmatprep.subr.bf16.mxu1 %v6773_v1  ;;  %6180 = vmatpush3.bf16.msra.mxu0 %v6603_v54 }
 0x8e9   :  { %6193 = vmatprep.subr.bf16.mxu0 %v6773_v1 }
 0x999   :  { %v2763_v12 = vpop.f32.mrf.mxu1 }
 0x99a   :  { %v2809_v13 = vpop.f32.mrf.mxu0 }
 0x99b   :  { %v6149_v14 = vpop.f32.mrf.mxu1  ;;  %v2908_v21 = vadd.f32 %v2809_v13, %v2763_v12  ;;  %v6683_v13 = vld [vmem:[%s8036_s1 + $0x30] sm:$0xff]  }
 0x99c   :  { %v6155_v15 = vpop.f32.mrf.mxu0 }
 0x99d   :  { %v2766_v16 = vpop.f32.mrf.mxu1 }
 0x99e   :  { %v2812_v17 = vpop.f32.mrf.mxu0  ;;  %v6684_v16 = vld [vmem:[%s8036_s1 + $0x58] sm:$0xff]  }
 0x99f   :  { %v6150_v18 = vpop.f32.mrf.mxu1  ;;  %v6685_v17 = vld [vmem:[%s8037_s2 + $0x4] ss:$0 sm:$0xff] }
 0x9a0   :  { %v6156_v19 = vpop.f32.mrf.mxu0 }
 0x9a1   :  { %v2855_v20 = vpop.f32.mrf.mxu1 }
 0x9a2   :  { %v2909_v22 = vadd.f32 %v2908_v21, %v2855_v20  ;;  %v2901_v23 = vpop.f32.mrf.mxu0 }
 0x9a3   :  { %v6161_v25 = vpop.f32.mrf.mxu1 }
 0x9a4   :  { %v2910_v26 = vadd.f32 %v2909_v22, %v2901_v23  ;;  %v6167_v27 = vpop.f32.mrf.mxu0  ;;  %v6686_v22 = vld [vmem:[%s8036_s1 + $0x50] sm:$0xff]   ;;  %v6687_v23 = vld [vmem:[%s8037_s2] ss:$0 sm:$0xff] }
 0x9a5   :  { %v2858_v30 = vpop.f32.mrf.mxu1 }
 0x9a6   :  { %v2917_v31 = vadd.f32 %v5507_v24, %v2910_v26  ;;  %v2904_v32 = vpop.f32.mrf.mxu0  ;;  %v6688_v30 = vld [vmem:[%s8036_s1 + $0x78] sm:$0xff]  }
 0x9a7   :  { %v6162_v33 = vpop.f32.mrf.mxu1  ;;  %v6689_v32 = vld [vmem:[%s8037_s2 + $0x6] ss:$0 sm:$0xff] }
 0x9a8   :  { %v2918_v34 = vpack.c.bf16 %v2917_v31, %v2917_v31  ;;  %v6168_v35 = vpop.f32.mrf.mxu0 }
 0x9aa   :  { %6174 = vmatmul.mubr.msk.bf16.vlgmr.msra.gmra.mxu1 %vm235_vm1, %v2918_v34 }
 0x9ab   :  { %6186 = vmatpush3.bf16.msra.mxu1 %v6668_v36  ;;  %6189 = vmatprep.mubr.msk.bf16.mxu1 %vm6774_vm0, %v6773_v1  ;;  %v6690_v36 = vld [vmem:[%s8036_s1 + $0x70] sm:$0xff]  }
 0x9ac   :  { %6187 = vmatprep.subr.bf16.mxu1 %v6773_v1 }
 0x9af   :  { %6188 = vmatpush3.bf16.msra.mxu1 %v6669_v37  ;;  %v6691_v37 = vld [vmem:[%s8037_s2 + $0x2] ss:$0 sm:$0xff] }
 0x9b0   :  { %6201 = vmatprep.subr.bf16.mxu1 %v6773_v1 }
 0x9b2   :  { %6190 = vmatmul.mubr.msk.bf16.vlgmr.msra.gmra.mxu1 %vm235_vm1, %v7465_v29 }
 0x9b3   :  { %6202 = vmatpush3.bf16.msra.mxu1 %v6670_v39  ;;  %6205 = vmatprep.mubr.msk.bf16.mxu1 %vm6774_vm0, %v6773_v1 }
 0x9b4   :  { %6203 = vmatprep.subr.bf16.mxu1 %v6773_v1 }
 0x9b7   :  { %6204 = vmatpush3.bf16.msra.mxu1 %v6671_v40 }
 0x9b8   :  { %6217 = vmatprep.subr.bf16.mxu1 %v6773_v1 }
 0x9ba   :  { %6206 = vmatmul.mubr.msk.bf16.vlgmr.msra.gmra.mxu1 %vm235_vm1, %v7465_v29 }
 0x9bb   :  { %6218 = vmatpush3.bf16.msra.mxu1 %v6672_v41  ;;  %6221 = vmatprep.mubr.msk.bf16.mxu1 %vm6774_vm0, %v6773_v1 }
 0x9bc   :  { %6219 = vmatprep.subr.bf16.mxu1 %v6773_v1 }
 0x9bf   :  { %6220 = vmatpush3.bf16.msra.mxu1 %v6673_v38  ;;  %v6692_v38 = vld [vmem:[%s8036_s1 + $0x98] sm:$0xff]  }
 0x9c0   :  { %6233 = vmatprep.subr.bf16.mxu1 %v6773_v1 }
 0x9c2   :  { %6222 = vmatmul.mubr.msk.bf16.vlgmr.msra.gmra.mxu1 %vm235_vm1, %v7465_v29 }
 0x9c3   :  { %6234 = vmatpush3.bf16.msra.mxu1 %v6674_v43  ;;  %6237 = vmatprep.mubr.msk.bf16.mxu1 %vm6774_vm0, %v6773_v1 }
 0x9c4   :  { %6235 = vmatprep.subr.bf16.mxu1 %v6773_v1 }
 0x9c7   :  { %6236 = vmatpush3.bf16.msra.mxu1 %v6675_v45  ;;  %v6693_v45 = vld [vmem:[%s8036_s1 + $0x90] sm:$0xff]  }
 0x9c8   :  { %6249 = vmatprep.subr.bf16.mxu1 %v6773_v1 }
 0x9ca   :  { %6238 = vmatmul.mubr.msk.bf16.vlgmr.msra.gmra.mxu1 %vm235_vm1, %v7465_v29 }
 0x9cb   :  { %6250 = vmatpush3.bf16.msra.mxu1 %v6676_v46  ;;  %6253 = vmatprep.mubr.msk.bf16.mxu1 %vm6774_vm0, %v6773_v1  ;;  %v6694_v46 = vld [vmem:[%s8036_s1 + $0xb8] sm:$0xff]  }
 0x9cc   :  { %6251 = vmatprep.subr.bf16.mxu1 %v6773_v1 }
 0x9cf   :  { %6252 = vmatpush3.bf16.msra.mxu1 %v6677_v48  ;;  %v6695_v48 = vld [vmem:[%s8036_s1 + $0xb0] sm:$0xff]  }
 0x9d0   :  { %6265 = vmatprep.subr.bf16.mxu1 %v6773_v1 }
 0x9d2   :  { %6254 = vmatmul.mubr.msk.bf16.vlgmr.msra.gmra.mxu1 %vm235_vm1, %v7465_v29 }
 0x9d3   :  { %6266 = vmatpush3.bf16.msra.mxu1 %v6678_v49  ;;  %6269 = vmatprep.mubr.msk.bf16.mxu1 %vm6774_vm0, %v6773_v1 }
 0x9d4   :  { %6267 = vmatprep.subr.bf16.mxu1 %v6773_v1 }
 0x9d7   :  { %6268 = vmatpush3.bf16.msra.mxu1 %v6679_v50  ;;  %v6696_v50 = vld [vmem:[%s8037_s2 + $0x8] ss:$0 sm:$0xff] }
 0x9d8   :  { %6281 = vmatprep.subr.bf16.mxu1 %v6773_v1 }
 0x9da   :  { %6270 = vmatmul.mubr.msk.bf16.vlgmr.msra.gmra.mxu1 %vm235_vm1, %v7465_v29 }
 0x9db   :  { %6283 = vmatprep.mubr.msk.bf16.mxu1 %vm6774_vm0, %v6773_v1 }
 0xa6a   :  { %v2974_v58 = vpop.f32.mrf.mxu1 }
 0xa6b   :  { %v2975_v59 = vadd.f32 %v5508_v57, %v2974_v58 }
 0xa6c   :  { %v6175_v60 = vpop.f32.mrf.mxu1 }
 0xa6d   :  { %v2980_v61 = vmax.f32 %v2975_v59, 0.0 }
 0xa6e   :  { %v2977_v63 = vpop.f32.mrf.mxu1 }
 0xa6f   :  { %v2981_v0 = vpack.c.bf16 %v2980_v61, %v2980_v61 }
 0xa70   :  { %v6176_v2 = vpop.f32.mrf.mxu1 }
 0xa71   :  { %6182 = vmatmul.mubr.msk.bf16.vlgmr.msra.gmra.mxu0 %vm235_vm1, %v2981_v0  ;;  %v5512_v2 = vld [vmem:[%s8049_s14] ss:$0 sm:$0xff] }
 0xa72   :  { %v3083_v3 = vpop.f32.mrf.mxu1  ;;  %6194 = vmatpush3.bf16.msra.mxu0 %v6680_v4  ;;  %6197 = vmatprep.mubr.msk.bf16.mxu0 %vm6774_vm0, %v6773_v1 }
 0xa73   :  { %6195 = vmatprep.subr.bf16.mxu0 %v6773_v1  ;;  %v3084_v24 = vadd.f32 %v6687_v23, %v3083_v3 }
 0xa74   :  { %v6191_v5 = vpop.f32.mrf.mxu1 }
 0xa75   :  { %v3529_v31 = vpack.c.bf16 %v3084_v24, %v3084_v24 }
 0xa76   :  { %v3086_v6 = vpop.f32.mrf.mxu1  ;;  %6196 = vmatpush3.bf16.msra.mxu0 %v6681_v7 }
 0xa77   :  { %6209 = vmatprep.subr.bf16.mxu0 %v6773_v1 }
 0xa78   :  { %v6192_v8 = vpop.f32.mrf.mxu1 }
 0xa79   :  { %6198 = vmatmul.mubr.msk.bf16.vlgmr.msra.gmra.mxu0 %vm235_vm1, %v7465_v29 }
 0xa7a   :  { %v3163_v9 = vpop.f32.mrf.mxu1  ;;  %6210 = vmatpush3.bf16.msra.mxu0 %v6682_v10  ;;  %6213 = vmatprep.mubr.msk.bf16.mxu0 %vm6774_vm0, %v6773_v1 }
 0xa7b   :  { %6211 = vmatprep.subr.bf16.mxu0 %v6773_v1  ;;  %v3164_v39 = vadd.f32 %v6691_v37, %v3163_v9 }
 0xa7c   :  { %v6207_v11 = vpop.f32.mrf.mxu1 }
 0xa7d   :  { %v3531_v43 = vpack.c.bf16 %v3164_v39, %v3164_v39 }
 0xa7e   :  { %v3166_v12 = vpop.f32.mrf.mxu1  ;;  %6212 = vmatpush3.bf16.msra.mxu0 %v6683_v13 }
 0xa7f   :  { %6225 = vmatprep.subr.bf16.mxu0 %v6773_v1 }
 0xa80   :  { %v6208_v14 = vpop.f32.mrf.mxu1 }
 0xa81   :  { %6214 = vmatmul.mubr.msk.bf16.vlgmr.msra.gmra.mxu0 %vm235_vm1, %v7465_v29 }
 0xa82   :  { %v3243_v15 = vpop.f32.mrf.mxu1  ;;  %6226 = vmatpush3.bf16.msra.mxu0 %v6684_v16  ;;  %6229 = vmatprep.mubr.msk.bf16.mxu0 %vm6774_vm0, %v6773_v1 }
 0xa83   :  { %v3244_v18 = vadd.f32 %v6685_v17, %v3243_v15  ;;  %6227 = vmatprep.subr.bf16.mxu0 %v6773_v1  ;;  %v6697_v17 = vld [vmem:[%s8037_s2 + $0x5] ss:$0 sm:$0xff] }
 0xa84   :  { %v6223_v21 = vpop.f32.mrf.mxu1 }
 0xa85   :  { %v3533_v19 = vpack.c.bf16 %v3244_v18, %v3244_v18 }
 0xa86   :  { %v3246_v20 = vpop.f32.mrf.mxu1  ;;  %6228 = vmatpush3.bf16.msra.mxu0 %v6686_v22 }
 0xa87   :  { %v3541_v25 = vsel %vm907_vm2, %v3533_v19, 0  ;;  %6241 = vmatprep.subr.bf16.mxu0 %v6773_v1 }
 0xa88   :  { %v6224_v26 = vpop.f32.mrf.mxu1  ;;  %6282 = vmatpush3.bf16.xpose.msra.mxu1 %v3541_v25  ;;  %v6698_v25 = vld [vmem:[%s8037_s2 + $0x1] ss:$0 sm:$0xff] }
 0xa89   :  { %6230 = vmatmul.mubr.msk.bf16.vlgmr.msra.gmra.mxu0 %vm235_vm1, %v7465_v29  ;;  %6293 = vmatprep.subr.bf16.mxu1 %v6773_v1 }
 0xa8a   :  { %v3323_v27 = vpop.f32.mrf.mxu1  ;;  %6242 = vmatpush3.bf16.msra.mxu0 %v6688_v30  ;;  %6245 = vmatprep.mubr.msk.bf16.mxu0 %vm6774_vm0, %v6773_v1 }
 0xa8b   :  { %v3324_v33 = vadd.f32 %v6689_v32, %v3323_v27  ;;  %6243 = vmatprep.subr.bf16.mxu0 %v6773_v1  ;;  %v6699_v32 = vld [vmem:[%s8037_s2 + $0x7] ss:$0 sm:$0xff] }
 0xa8c   :  { %v6239_v34 = vpop.f32.mrf.mxu1 }
 0xa8d   :  { %v3535_v35 = vpack.c.bf16 %v3324_v33, %v3324_v33 }
 0xa8e   :  { %6244 = vmatpush3.bf16.msra.mxu0 %v6690_v36  ;;  %v3326_v28 = vpop.f32.mrf.mxu1 }
 0xa8f   :  { %v3633_v40 = vsel %vm907_vm2, %v3535_v35, 0  ;;  %6284 = vmatmul.mubr.msk.bf16.vlgmr.msra.gmra.mxu1 %vm907_vm2, %v3529_v31  ;;  %6257 = vmatprep.subr.bf16.mxu0 %v6773_v1 }
 0xa90   :  { %6294 = vmatpush3.bf16.xpose.msra.mxu1 %v3633_v40  ;;  %6295 = vmatprep.mubr.msk.bf16.mxu1 %vm6774_vm0, %v6773_v1  ;;  %v6240_v41 = vpop.f32.mrf.mxu1 }
 0xa91   :  { %6246 = vmatmul.mubr.msk.bf16.vlgmr.msra.gmra.mxu0 %vm235_vm1, %v7465_v29  ;;  %6305 = vmatprep.subr.bf16.mxu1 %v6773_v1 }
 0xa92   :  { %6258 = vmatpush3.bf16.msra.mxu0 %v6692_v38  ;;  %6261 = vmatprep.mubr.msk.bf16.mxu0 %vm6774_vm0, %v6773_v1  ;;  %v3403_v49 = vpop.f32.mrf.mxu1 }
 0xa93   :  { %6259 = vmatprep.subr.bf16.mxu0 %v6773_v1  ;;  %v3404_v53 = vadd.f32 %v6696_v50, %v3403_v49 }
 0xa94   :  { %v6255_v54 = vpop.f32.mrf.mxu1 }
 0xa95   :  { %v3769_v57 = vpack.c.bf16 %v3404_v53, %v3404_v53 }
 0xa96   :  { %6260 = vmatpush3.bf16.msra.mxu0 %v6693_v45  ;;  %v3406_v58 = vpop.f32.mrf.mxu1 }
 0xa97   :  { %6296 = vmatmul.mubr.msk.bf16.vlgmr.msra.gmra.mxu1 %vm907_vm2, %v3531_v43  ;;  %6273 = vmatprep.subr.bf16.mxu0 %v6773_v1  ;;  %v3777_v59 = vsel %vm1147_vm3, %v3769_v57, 0  ;;  %v6700_v43 = vld [vmem:[%s8037_s2 + $0x3] ss:$0 sm:$0xff]  ;;  %v6701_v57 = vld [vmem:[%s8037_s2 + $0x9] ss:$0 sm:$0xff] }
 0xa98   :  { %6307 = vmatprep.mubr.msk.bf16.mxu1 %vm6774_vm0, %v6773_v1  ;;  %v6256_v60 = vpop.f32.mrf.mxu1  ;;  %6306 = vmatpush3.bf16.msra.mxu1 %v3777_v59 }
 0xa99   :  { %6262 = vmatmul.mubr.msk.bf16.vlgmr.msra.gmra.mxu0 %vm235_vm1, %v7465_v29  ;;  %6317 = vmatprep.subr.bf16.mxu1 %v6773_v1 }
 0xa9a   :  { %6274 = vmatpush3.bf16.msra.mxu0 %v6694_v46  ;;  %6277 = vmatprep.mubr.msk.bf16.mxu0 %vm6774_vm0, %v6773_v1  ;;  %v7648_v61 = vpop.f32.mrf.mxu1 }
 0xa9b   :  { %6275 = vmatprep.subr.bf16.mxu0 %v6773_v1 }
 0xa9e   :  { %6276 = vmatpush3.bf16.msra.mxu0 %v6695_v48 }
 0xa9f   :  { %6287 = vmatprep.subr.bf16.mxu0 %v6773_v1 }
 0xaa1   :  { %6278 = vmatmul.mubr.msk.bf16.vlgmr.msra.gmra.mxu0 %vm235_vm1, %v7465_v29  ;;  %v6271_v29 = vpop.f32.mrf.mxu1 }
 0xaa2   :  { %6289 = vmatprep.mubr.msk.bf16.mxu0 %vm6774_vm0, %v6773_v1 }
 0xaa3   :  { %v3486_v63 = vpop.f32.mrf.mxu1 }
 0xaa5   :  { %v6272_v0 = vpop.f32.mrf.mxu1 }
 0xb31   :  { %v3037_v3 = vpop.f32.mrf.mxu0 }
 0xb32   :  { %v3038_v4 = vadd.f32 %v5512_v2, %v3037_v3 }
 0xb33   :  { %v6183_v5 = vpop.f32.mrf.mxu0 }
 0xb34   :  { %3043 = vst [vmem:[#allocation2] sm:$0xff] %v3038_v4 }
 0xb35   :  { %v3040_v6 = vpop.f32.mrf.mxu0 }
 0xb37   :  { %v6184_v7 = vpop.f32.mrf.mxu0 }
 0xb39   :  { %v3123_v8 = vpop.f32.mrf.mxu0 }
 0xb3a   :  { %v3124_v26 = vadd.f32 %v6698_v25, %v3123_v8 }
 0xb3b   :  { %v6199_v9 = vpop.f32.mrf.mxu0 }
 0xb3c   :  { %v3530_v36 = vpack.c.bf16 %v3124_v26, %v3124_v26 }
 0xb3d   :  { %v3126_v10 = vpop.f32.mrf.mxu0 }
 0xb3f   :  { %v6200_v11 = vpop.f32.mrf.mxu0 }
 0xb41   :  { %v3203_v12 = vpop.f32.mrf.mxu0 }
 0xb42   :  { %v3204_v45 = vadd.f32 %v6700_v43, %v3203_v12 }
 0xb43   :  { %v6215_v13 = vpop.f32.mrf.mxu0 }
 0xb44   :  { %v3532_v50 = vpack.c.bf16 %v3204_v45, %v3204_v45 }
 0xb45   :  { %v3206_v14 = vpop.f32.mrf.mxu0 }
 0xb47   :  { %v6216_v15 = vpop.f32.mrf.mxu0 }
 0xb49   :  { %v3283_v16 = vpop.f32.mrf.mxu0 }
 0xb4a   :  { %v3284_v18 = vadd.f32 %v6697_v17, %v3283_v16 }
 0xb4b   :  { %v6231_v21 = vpop.f32.mrf.mxu0 }
 0xb4c   :  { %v3534_v19 = vpack.c.bf16 %v3284_v18, %v3284_v18 }
 0xb4d   :  { %v3286_v20 = vpop.f32.mrf.mxu0 }
 0xb4e   :  { %v3587_v22 = vsel %vm907_vm2, %v3534_v19, 0 }
 0xb4f   :  { %v6232_v23 = vpop.f32.mrf.mxu0  ;;  %v3577_v24 = vpop.f32.mrf.mxu1  ;;  %6288 = vmatpush3.bf16.xpose.msra.mxu0 %v3587_v22 }
 0xb50   :  { %v3721_v27 = vsel %vm907_vm2, %v3577_v24, -inf  ;;  %6299 = vmatprep.subr.bf16.mxu0 %v6773_v1 }
 0xb51   :  { %3722 = vmax.xlane.f32.xlu0 %v3721_v27  ;;  %v3363_v30 = vpop.f32.mrf.mxu0  ;;  %v6285_v31 = vpop.f32.mrf.mxu1 }
 0xb52   :  { %v3364_v33 = vadd.f32 %v6699_v32, %v3363_v30  ;;  %v6702_v30 = vld [vmem:[%s8037_s2 + $0xa] ss:$0 sm:$0xff] }
 0xb53   :  { %v6247_v34 = vpop.f32.mrf.mxu0  ;;  %v3580_v35 = vpop.f32.mrf.mxu1  ;;  %v3484_v31 = vadd.f32 %v6702_v30, %v7648_v61 }
 0xb54   :  { %v3536_v28 = vpack.c.bf16 %v3364_v33, %v3364_v33 }
 0xb55   :  { %v3366_v37 = vpop.f32.mrf.mxu0  ;;  %v6286_v39 = vpop.f32.mrf.mxu1  ;;  %v3771_v33 = vpack.c.bf16 %v3484_v31, %v3484_v31 }
 0xb56   :  { %v3679_v40 = vsel %vm907_vm2, %v3536_v28, 0  ;;  %6290 = vmatmul.mubr.msk.bf16.vlgmr.msra.gmra.mxu0 %vm907_vm2, %v3530_v36 }
 0xb57   :  { %v6248_v41 = vpop.f32.mrf.mxu0  ;;  %v3669_v38 = vpop.f32.mrf.mxu1  ;;  %6300 = vmatpush3.bf16.xpose.msra.mxu0 %v3679_v40  ;;  %6301 = vmatprep.mubr.msk.bf16.mxu0 %vm6774_vm0, %v6773_v1  ;;  %v3869_v36 = vsel %vm1147_vm3, %v3771_v33, 0  ;;  %v6706_v33 = vld [vmem:[%s8042_s7 + $0x8] sm:$0xff]  }
 0xb58   :  { %v3727_v46 = vsel %vm907_vm2, %v3669_v38, -inf  ;;  %6311 = vmatprep.subr.bf16.mxu0 %v6773_v1 }
 0xb59   :  { %3728 = vmax.xlane.f32.xlu0 %v3727_v46  ;;  %v6297_v48 = vpop.f32.mrf.mxu1  ;;  %v3443_v54 = vpop.f32.mrf.mxu0 }
 0xb5a   :  { %v3444_v58 = vadd.f32 %v6701_v57, %v3443_v54  ;;  %v6703_v54 = vld [vmem:[%s8037_s2 + $0xb] ss:$0 sm:$0xff] }
 0xb5b   :  { %v3672_v49 = vpop.f32.mrf.mxu1  ;;  %v6263_v59 = vpop.f32.mrf.mxu0 }
 0xb5c   :  { %v3770_v60 = vpack.c.bf16 %v3444_v58, %v3444_v58 }
 0xb5d   :  { %v6298_v53 = vpop.f32.mrf.mxu1  ;;  %v3446_v29 = vpop.f32.mrf.mxu0 }
 0xb5e   :  { %6302 = vmatmul.mubr.msk.bf16.vlgmr.msra.gmra.mxu0 %vm907_vm2, %v3532_v50  ;;  %v3823_v63 = vsel %vm1147_vm3, %v3770_v60, 0 }
 0xb5f   :  { %6313 = vmatprep.mubr.msk.bf16.mxu0 %vm6774_vm0, %v6773_v1  ;;  %v6264_v0 = vpop.f32.mrf.mxu0  ;;  %6312 = vmatpush3.bf16.msra.mxu0 %v3823_v63 }
 0xb60   :  { %6323 = vmatprep.subr.bf16.mxu0 %v6773_v1 }
 0xb61   :  { %v7682_v2 = vpop.f32.mrf.mxu0 }
 0xb62   :  { %v3524_v57 = vadd.f32 %v6703_v54, %v7682_v2  ;;  %v6711_v54 = vld [vmem:[%s8041_s6] ss:$0 sm:$0xff] }
 0xb63   :  { %v6279_v3 = vpop.f32.mrf.mxu0 }
 0xb64   :  { %v3772_v63 = vpack.c.bf16 %v3524_v57, %v3524_v57 }
 0xb65   :  { %v3526_v4 = vpop.f32.mrf.mxu0 }
 0xb66   :  { %v3915_v2 = vsel %vm1147_vm3, %v3772_v63, 0 }
 0xb67   :  { %v6280_v5 = vpop.f32.mrf.mxu0 }
 0xbda   :  { %v3723_v6 = vpop.xlane.xlu0 %3722 }
 0xbdb   :  { %v3733_v7 = vsub.f32 %v3577_v24, %v3723_v6 }
 0xbdd   :  { %v3737_v8 = vmul.f32 1.442695, %v3733_v7 }
 0xbdf   :  { %6636 = vpow2.f32 %v3737_v8 }
 0xbe2   :  { %v3729_v9 = vpop.xlane.xlu0 %3728 }
 0xbe3   :  { %v3735_v10 = vsub.f32 %v3669_v38, %v3729_v9 }
 0xbe5   :  { %v3741_v11 = vmul.f32 1.442695, %v3735_v10 }
 0xbe7   :  { %6638 = vpow2.f32 %v3741_v11  ;;  %v6704_v11 = vld [vmem:[%s8040_s5 + $0x8] sm:$0xff]  }
 0xbec   :  { %v6637_v12 = vpop.eup %6636 }
 0xbed   :  { %v3745_v13 = vsel %vm907_vm2, %v6637_v12, 0.0 }
 0xbee   :  { %3746 = vadd.xlane.f32.xlu0 %v3745_v13 }
 0xbf4   :  { %v6639_v14 = vpop.eup %6638 }
 0xbf5   :  { %v3751_v15 = vsel %vm907_vm2, %v6639_v14, 0.0 }
 0xbf6   :  { %3752 = vadd.xlane.f32.xlu0 %v3751_v15 }
 0xc16   :  { %v3623_v16 = vpop.f32.mrf.mxu0 }
 0xc17   :  { %v3724_v17 = vsel %vm907_vm2, %v3623_v16, -inf }
 0xc18   :  { %3725 = vmax.xlane.f32.xlu1 %v3724_v17  ;;  %v6291_v18 = vpop.f32.mrf.mxu0 }
 0xc1a   :  { %v3626_v21 = vpop.f32.mrf.mxu0 }
 0xc1c   :  { %v6292_v19 = vpop.f32.mrf.mxu0 }
 0xc1e   :  { %v3715_v20 = vpop.f32.mrf.mxu0 }
 0xc1f   :  { %v3730_v22 = vsel %vm907_vm2, %v3715_v20, -inf }
 0xc20   :  { %3731 = vmax.xlane.f32.xlu1 %v3730_v22  ;;  %v6303_v23 = vpop.f32.mrf.mxu0 }
 0xc22   :  { %v3718_v24 = vpop.f32.mrf.mxu0 }
 0xc24   :  { %v6304_v25 = vpop.f32.mrf.mxu0 }
 0xc77   :  { %v3747_v26 = vpop.xlane.xlu0 %3746 }
 0xc78   :  { %6640 = vrcp.f32 %v3747_v26 }
 0xc7f   :  { %v3753_v27 = vpop.xlane.xlu0 %3752 }
 0xc80   :  { %6642 = vrcp.f32 %v3753_v27 }
 0xc85   :  { %v6641_v32 = vpop.eup %6640 }
 0xc86   :  { %v3761_v34 = vmul.f32 %v6641_v32, %v6637_v12 }
 0xc88   :  { %v3765_v35 = vpack.c.bf16 %v3761_v34, %v3761_v34  ;;  %v6707_v34 = vld [vmem:[%s8042_s7] sm:$0xff]  }
 0xc8a   :  { %6308 = vmatmul.mubr.msk.bf16.vlgmr.msra.gmra.mxu1 %vm907_vm2, %v3765_v35 }
 0xc8b   :  { %6318 = vmatpush3.bf16.msra.mxu1 %v3869_v36  ;;  %6319 = vmatprep.mubr.msk.bf16.mxu1 %vm6774_vm0, %v6773_v1 }
 0xc8c   :  { %6329 = vmatprep.subr.bf16.mxu1 %v6773_v1 }
 0xc8d   :  { %v6643_v28 = vpop.eup %6642 }
 0xc8e   :  { %v3763_v37 = vmul.f32 %v6643_v28, %v6639_v14  ;;  %v6705_v14 = vld [vmem:[%s8040_s5] sm:$0xff]  }
 0xc90   :  { %v3767_v39 = vpack.c.bf16 %v3763_v37, %v3763_v37 }
 0xc92   :  { %6320 = vmatmul.mubr.msk.bf16.vlgmr.msra.gmra.mxu1 %vm907_vm2, %v3767_v39 }
 0xc93   :  { %6330 = vmatpush3.bf16.msra.mxu1 %v7100_v47  ;;  %6331 = vmatprep.mubr.msk.bf16.mxu1 %vm6774_vm0, %v6773_v1 }
 0xc94   :  { %6341 = vmatprep.subr.bf16.mxu1 %v6773_v1 }
 0xca1   :  { %v3726_v61 = vpop.xlane.xlu1 %3725 }
 0xca2   :  { %v3734_v40 = vsub.f32 %v3623_v16, %v3726_v61 }
 0xca4   :  { %v3739_v41 = vmul.f32 1.442695, %v3734_v40 }
 0xca6   :  { %6644 = vpow2.f32 %v3739_v41 }
 0xca9   :  { %v3732_v38 = vpop.xlane.xlu1 %3731 }
 0xcaa   :  { %v3736_v43 = vsub.f32 %v3715_v20, %v3732_v38 }
 0xcac   :  { %v3743_v45 = vmul.f32 1.442695, %v3736_v43  ;;  %v6708_v43 = vld [vmem:[%s8039_s4] ss:$0 sm:$0xff] }
 0xcae   :  { %6646 = vpow2.f32 %v3743_v45 }
 0xcb3   :  { %v6645_v46 = vpop.eup %6644 }
 0xcb4   :  { %v3748_v48 = vsel %vm907_vm2, %v6645_v46, 0.0 }
 0xcb5   :  { %3749 = vadd.xlane.f32.xlu1 %v3748_v48 }
 0xcbb   :  { %v6647_v49 = vpop.eup %6646 }
 0xcbc   :  { %v3754_v47 = vsel %vm907_vm2, %v6647_v49, 0.0 }
 0xcbd   :  { %3755 = vadd.xlane.f32.xlu1 %v3754_v47  ;;  %v6709_v47 = vld [vmem:[%s8042_s7 + $0x18] sm:$0xff]  }
 0xd3e   :  { %v3750_v50 = vpop.xlane.xlu1 %3749 }
 0xd3f   :  { %6648 = vrcp.f32 %v3750_v50  ;;  %v6710_v50 = vld [vmem:[%s8042_s7 + $0x10] sm:$0xff]  }
 0xd46   :  { %v3756_v53 = vpop.xlane.xlu1 %3755 }
 0xd47   :  { %6650 = vrcp.f32 %v3756_v53 }
 0xd4a   :  { %v3813_v58 = vpop.f32.mrf.mxu1 }
 0xd4b   :  { %v3957_v59 = vpack.c.bf16 %v3813_v58, %v3813_v58 }
 0xd4c   :  { %v6649_v60 = vpop.eup %6648  ;;  %v6309_v29 = vpop.f32.mrf.mxu1 }
 0xd4d   :  { %v3762_v0 = vmul.f32 %v6649_v60, %v6645_v46  ;;  %6332 = vmatmul.mubr.msk.bf16.vlgmr.msra.gmra.mxu1 %vm907_vm2, %v3957_v59 }
 0xd4e   :  { %v3816_v3 = vpop.f32.mrf.mxu1  ;;  %6342 = vmatpush3.bf16.msra.mxu1 %v7123_v56  ;;  %6343 = vmatprep.mubr.msk.bf16.mxu1 %vm6774_vm0, %v6773_v1 }
 0xd4f   :  { %v3766_v4 = vpack.c.bf16 %v3762_v0, %v3762_v0  ;;  %6353 = vmatprep.subr.bf16.mxu1 %v6773_v1  ;;  %v6712_v0 = vld [vmem:[%s8042_s7 + $0x28] sm:$0xff]   ;;  %v6713_v3 = vld [vmem:[%s8042_s7 + $0x38] sm:$0xff]  }
 0xd50   :  { %v6310_v5 = vpop.f32.mrf.mxu1 }
 0xd51   :  { %6314 = vmatmul.mubr.msk.bf16.vlgmr.msra.gmra.mxu0 %vm907_vm2, %v3766_v4  ;;  %v6714_v4 = vld [vmem:[%s8042_s7 + $0x20] sm:$0xff]   ;;  %v6715_v5 = vld [vmem:[%s8042_s7 + $0x30] sm:$0xff]  }
 0xd52   :  { %6324 = vmatpush3.bf16.msra.mxu0 %v3915_v2  ;;  %v3905_v6 = vpop.f32.mrf.mxu1  ;;  %6325 = vmatprep.mubr.msk.bf16.mxu0 %vm6774_vm0, %v6773_v1  ;;  %v6716_v2 = vld [vmem:[%s8042_s7 + $0x48] sm:$0xff]  }
 0xd53   :  { %v3959_v7 = vpack.c.bf16 %v3905_v6, %v3905_v6  ;;  %6335 = vmatprep.subr.bf16.mxu0 %v6773_v1  ;;  %v6717_v6 = vld [vmem:[%s8042_s7 + $0x58] sm:$0xff]  }
 0xd54   :  { %v6651_v56 = vpop.eup %6650  ;;  %v6321_v8 = vpop.f32.mrf.mxu1 }
 0xd55   :  { %v3764_v9 = vmul.f32 %v6651_v56, %v6647_v49  ;;  %6344 = vmatmul.mubr.msk.bf16.vlgmr.msra.gmra.mxu1 %vm907_vm2, %v3959_v7  ;;  %v6718_v7 = vld [vmem:[%s8042_s7 + $0x40] sm:$0xff]   ;;  %v6719_v56 = vld [vmem:[%s8042_s7 + $0x50] sm:$0xff]   ;;  %v6720_v8 = vld [vmem:[%s8042_s7 + $0x68] sm:$0xff]  }
 0xd56   :  { %v3908_v10 = vpop.f32.mrf.mxu1  ;;  %6354 = vmatpush3.bf16.msra.mxu1 %v6704_v11  ;;  %6357 = vmatprep.mubr.msk.bf16.mxu1 %vm6774_vm0, %v6773_v1  ;;  %v6723_v11 = vld [vmem:[%s8042_s7 + $0x70] sm:$0xff]  }
 0xd57   :  { %v3768_v12 = vpack.c.bf16 %v3764_v9, %v3764_v9  ;;  %6355 = vmatprep.subr.bf16.mxu1 %v6773_v1  ;;  %v6721_v9 = vld [vmem:[%s8042_s7 + $0x78] sm:$0xff]   ;;  %v6722_v10 = vld [vmem:[%s8042_s7 + $0x60] sm:$0xff]  }
 0xd58   :  { %v6322_v13 = vpop.f32.mrf.mxu1 }
 0xd59   :  { %6326 = vmatmul.mubr.msk.bf16.vlgmr.msra.gmra.mxu0 %vm907_vm2, %v3768_v12  ;;  %v6724_v12 = vld [vmem:[%s8042_s7 + $0x88] sm:$0xff]   ;;  %v6725_v13 = vld [vmem:[%s8042_s7 + $0x98] sm:$0xff]  }
 0xd5a   :  { %6336 = vmatpush3.bf16.msra.mxu0 %v7115_v52  ;;  %6337 = vmatprep.mubr.msk.bf16.mxu0 %vm6774_vm0, %v6773_v1 }
 0xd5b   :  { %6347 = vmatprep.subr.bf16.mxu0 %v6773_v1  ;;  %6356 = vmatpush3.bf16.msra.mxu1 %v6705_v14  ;;  %v6726_v14 = vld [vmem:[%s8042_s7 + $0x80] sm:$0xff]  }
 0xd5c   :  { %6369 = vmatprep.subr.bf16.mxu1 %v6773_v1 }
 0xe0d   :  { %v3998_v15 = vpop.f32.mrf.mxu1 }
 0xe0f   :  { %v6333_v16 = vpop.f32.mrf.mxu1 }
 0xe10   :  { %v6728_v16 = vld [vmem:[%s8042_s7 + $0xa8] sm:$0xff]  }
 0xe11   :  { %v3859_v17 = vpop.f32.mrf.mxu0  ;;  %v4001_v18 = vpop.f32.mrf.mxu1 }
 0xe12   :  { %v3958_v21 = vpack.c.bf16 %v3859_v17, %v3859_v17  ;;  %v6729_v17 = vld [vmem:[%s8042_s7 + $0xb8] sm:$0xff]   ;;  %v6730_v18 = vld [vmem:[%s8042_s7 + $0xa0] sm:$0xff]  }
 0xe13   :  { %v6315_v19 = vpop.f32.mrf.mxu0  ;;  %v6334_v20 = vpop.f32.mrf.mxu1 }
 0xe14   :  { %6338 = vmatmul.mubr.msk.bf16.vlgmr.msra.gmra.mxu0 %vm907_vm2, %v3958_v21  ;;  %v6731_v21 = vld [vmem:[%s8042_s7 + $0xb0] sm:$0xff]  }
 0xe15   :  { %v3862_v52 = vpop.f32.mrf.mxu0  ;;  %v4084_v22 = vpop.f32.mrf.mxu1  ;;  %6348 = vmatpush3.bf16.msra.mxu0 %v7133_v62  ;;  %6349 = vmatprep.mubr.msk.bf16.mxu0 %vm6774_vm0, %v6773_v1 }
 0xe16   :  { %6361 = vmatprep.subr.bf16.mxu0 %v6773_v1 }
 0xe17   :  { %v6316_v23 = vpop.f32.mrf.mxu0  ;;  %v6345_v24 = vpop.f32.mrf.mxu1 }
 0xe19   :  { %v3951_v25 = vpop.f32.mrf.mxu0  ;;  %v4087_v26 = vpop.f32.mrf.mxu1 }
 0xe1a   :  { %v3960_v27 = vpack.c.bf16 %v3951_v25, %v3951_v25 }
 0xe1b   :  { %v6327_v30 = vpop.f32.mrf.mxu0  ;;  %v6346_v31 = vpop.f32.mrf.mxu1 }
 0xe1c   :  { %6350 = vmatmul.mubr.msk.bf16.vlgmr.msra.gmra.mxu0 %vm907_vm2, %v3960_v27 }
 0xe1d   :  { %v3954_v32 = vpop.f32.mrf.mxu0  ;;  %6362 = vmatpush3.bf16.msra.mxu0 %v6706_v33  ;;  %6365 = vmatprep.mubr.msk.bf16.mxu0 %vm6774_vm0, %v6773_v1 }
 0xe1e   :  { %6363 = vmatprep.subr.bf16.mxu0 %v6773_v1 }
 0xe1f   :  { %v6328_v62 = vpop.f32.mrf.mxu0 }
 0xe21   :  { %6364 = vmatpush3.bf16.msra.mxu0 %v6707_v34 }
 0xe22   :  { %6377 = vmatprep.subr.bf16.mxu0 %v6773_v1 }
 0xed4   :  { %v4041_v35 = vpop.f32.mrf.mxu0 }
 0xed5   :  { %v4134_v28 = vadd.f32 %v4041_v35, %v3998_v15  ;;  %v6727_v15 = vld [vmem:[%s8042_s7 + $0x90] sm:$0xff]  }
 0xed6   :  { %v6339_v36 = vpop.f32.mrf.mxu0 }
 0xed7   :  { %v4135_v61 = vadd.f32 %v4134_v28, %v4084_v22 }
 0xed8   :  { %v4044_v37 = vpop.f32.mrf.mxu0 }
 0xed9   :  { %v6732_v37 = vld [vmem:[%s8043_s8 + $0x4] ss:$0 sm:$0xff] }
 0xeda   :  { %v6340_v39 = vpop.f32.mrf.mxu0 }
 0xedc   :  { %v4127_v40 = vpop.f32.mrf.mxu0 }
 0xedd   :  { %v4136_v41 = vadd.f32 %v4135_v61, %v4127_v40  ;;  %v6733_v61 = vld [vmem:[%s8043_s8 + $0x5] ss:$0 sm:$0xff] }
 0xede   :  { %v6351_v38 = vpop.f32.mrf.mxu0 }
 0xedf   :  { %v4137_v45 = vadd.f32 %v6708_v43, %v4136_v41 }
 0xee0   :  { %v4130_v46 = vpop.f32.mrf.mxu0 }
 0xee1   :  { %v4138_v48 = vpack.c.bf16 %v4137_v45, %v4137_v45 }
 0xee2   :  { %v6352_v49 = vpop.f32.mrf.mxu0 }
 0xee3   :  { %6358 = vmatmul.mubr.msk.bf16.vlgmr.msra.gmra.mxu1 %vm235_vm1, %v4138_v48 }
 0xee4   :  { %6370 = vmatpush3.bf16.msra.mxu1 %v6709_v47  ;;  %6373 = vmatprep.mubr.msk.bf16.mxu1 %vm6774_vm0, %v6773_v1 }
 0xee5   :  { %6371 = vmatprep.subr.bf16.mxu1 %v6773_v1 }
 0xee8   :  { %6372 = vmatpush3.bf16.msra.mxu1 %v6710_v50 }
 0xee9   :  { %6385 = vmatprep.subr.bf16.mxu1 %v6773_v1 }
 0xfa3   :  { %v4176_v53 = vpop.f32.mrf.mxu1 }
 0xfa4   :  { %v4177_v57 = vadd.f32 %v6711_v54, %v4176_v53  ;;  %v6734_v54 = vld [vmem:[%s8043_s8] ss:$0 sm:$0xff] }
 0xfa5   :  { %v6359_v58 = vpop.f32.mrf.mxu1 }
 0xfa6   :  { %v4182_v59 = vmax.f32 %v4177_v57, 0.0  ;;  %v6735_v58 = vld [vmem:[%s8043_s8 + $0x1] ss:$0 sm:$0xff] }
 0xfa7   :  { %v4179_v60 = vpop.f32.mrf.mxu1 }
 0xfa8   :  { %v7767_v29 = vpack.c.bf16 %v4182_v59, %v4182_v59 }
 0xfa9   :  { %v6360_v63 = vpop.f32.mrf.mxu1 }
 0xfaa   :  { %6366 = vmatmul.mubr.msk.bf16.vlgmr.msra.gmra.mxu0 %vm235_vm1, %v7767_v29  ;;  %6374 = vmatmul.mubr.msk.bf16.vlgmr.msra.gmra.mxu1 %vm235_vm1, %v7767_v29  ;;  %v6736_v63 = vld [vmem:[%s8043_s8 + $0x6] ss:$0 sm:$0xff] }
 0xfab   :  { %6378 = vmatpush3.bf16.msra.mxu0 %v6712_v0  ;;  %6386 = vmatpush3.bf16.msra.mxu1 %v6713_v3  ;;  %v6737_v3 = vld [vmem:[%s8043_s8 + $0x7] ss:$0 sm:$0xff] }
 0xfac   :  { %6379 = vmatprep.subr.bf16.mxu0 %v6773_v1  ;;  %6387 = vmatprep.subr.bf16.mxu1 %v6773_v1 }
 0xfad   :  { %6381 = vmatprep.mubr.msk.bf16.mxu0 %vm6774_vm0, %v6773_v1  ;;  %6389 = vmatprep.mubr.msk.bf16.mxu1 %vm6774_vm0, %v6773_v1 }
 0xfaf   :  { %6380 = vmatpush3.bf16.msra.mxu0 %v6714_v4  ;;  %6388 = vmatpush3.bf16.msra.mxu1 %v6715_v5 }
 0xfb0   :  { %6393 = vmatprep.subr.bf16.mxu0 %v6773_v1  ;;  %6401 = vmatprep.subr.bf16.mxu1 %v6773_v1 }
 0xfb2   :  { %6382 = vmatmul.mubr.msk.bf16.vlgmr.msra.gmra.mxu0 %vm235_vm1, %v7767_v29  ;;  %6390 = vmatmul.mubr.msk.bf16.vlgmr.msra.gmra.mxu1 %vm235_vm1, %v7767_v29 }
 0xfb3   :  { %6394 = vmatpush3.bf16.msra.mxu0 %v6716_v2  ;;  %6402 = vmatpush3.bf16.msra.mxu1 %v6717_v6 }
 0xfb4   :  { %6395 = vmatprep.subr.bf16.mxu0 %v6773_v1  ;;  %6403 = vmatprep.subr.bf16.mxu1 %v6773_v1 }
 0xfb5   :  { %6397 = vmatprep.mubr.msk.bf16.mxu0 %vm6774_vm0, %v6773_v1  ;;  %6405 = vmatprep.mubr.msk.bf16.mxu1 %vm6774_vm0, %v6773_v1 }
 0xfb7   :  { %6396 = vmatpush3.bf16.msra.mxu0 %v6718_v7  ;;  %6404 = vmatpush3.bf16.msra.mxu1 %v6719_v56 }
 0xfb8   :  { %6409 = vmatprep.subr.bf16.mxu0 %v6773_v1  ;;  %6417 = vmatprep.subr.bf16.mxu1 %v6773_v1 }
 0xfba   :  { %6398 = vmatmul.mubr.msk.bf16.vlgmr.msra.gmra.mxu0 %vm235_vm1, %v7767_v29  ;;  %6406 = vmatmul.mubr.msk.bf16.vlgmr.msra.gmra.mxu1 %vm235_vm1, %v7767_v29 }
 0xfbb   :  { %6410 = vmatpush3.bf16.msra.mxu0 %v6720_v8  ;;  %6418 = vmatpush3.bf16.msra.mxu1 %v6721_v9 }
 0xfbc   :  { %6411 = vmatprep.subr.bf16.mxu0 %v6773_v1  ;;  %6419 = vmatprep.subr.bf16.mxu1 %v6773_v1 }
 0xfbd   :  { %6413 = vmatprep.mubr.msk.bf16.mxu0 %vm6774_vm0, %v6773_v1  ;;  %6421 = vmatprep.mubr.msk.bf16.mxu1 %vm6774_vm0, %v6773_v1 }
 0xfbf   :  { %6412 = vmatpush3.bf16.msra.mxu0 %v6722_v10  ;;  %6420 = vmatpush3.bf16.msra.mxu1 %v6723_v11 }
 0xfc0   :  { %6425 = vmatprep.subr.bf16.mxu0 %v6773_v1  ;;  %6433 = vmatprep.subr.bf16.mxu1 %v6773_v1 }
 0xfc2   :  { %6414 = vmatmul.mubr.msk.bf16.vlgmr.msra.gmra.mxu0 %vm235_vm1, %v7767_v29  ;;  %6422 = vmatmul.mubr.msk.bf16.vlgmr.msra.gmra.mxu1 %vm235_vm1, %v7767_v29 }
 0xfc3   :  { %6426 = vmatpush3.bf16.msra.mxu0 %v6724_v12  ;;  %6434 = vmatpush3.bf16.msra.mxu1 %v6725_v13 }
 0xfc4   :  { %6427 = vmatprep.subr.bf16.mxu0 %v6773_v1  ;;  %6435 = vmatprep.subr.bf16.mxu1 %v6773_v1 }
 0xfc5   :  { %6429 = vmatprep.mubr.msk.bf16.mxu0 %vm6774_vm0, %v6773_v1  ;;  %6437 = vmatprep.mubr.msk.bf16.mxu1 %vm6774_vm0, %v6773_v1 }
 0xfc7   :  { %6428 = vmatpush3.bf16.msra.mxu0 %v6726_v14  ;;  %6436 = vmatpush3.bf16.msra.mxu1 %v6727_v15  ;;  %v6738_v15 = vld [vmem:[%s8043_s8 + $0x2] ss:$0 sm:$0xff] }
 0xfc8   :  { %6441 = vmatprep.subr.bf16.mxu0 %v6773_v1  ;;  %6449 = vmatprep.subr.bf16.mxu1 %v6773_v1 }
 0xfca   :  { %6430 = vmatmul.mubr.msk.bf16.vlgmr.msra.gmra.mxu0 %vm235_vm1, %v7767_v29  ;;  %6438 = vmatmul.mubr.msk.bf16.vlgmr.msra.gmra.mxu1 %vm235_vm1, %v7767_v29 }
 0xfcb   :  { %6442 = vmatpush3.bf16.msra.mxu0 %v6728_v16  ;;  %6450 = vmatpush3.bf16.msra.mxu1 %v6729_v17  ;;  %v6739_v17 = vld [vmem:[%s8043_s8 + $0x3] ss:$0 sm:$0xff] }
 0xfcc   :  { %6443 = vmatprep.subr.bf16.mxu0 %v6773_v1  ;;  %6451 = vmatprep.subr.bf16.mxu1 %v6773_v1 }
 0xfcd   :  { %6445 = vmatprep.mubr.msk.bf16.mxu0 %vm6774_vm0, %v6773_v1  ;;  %6453 = vmatprep.mubr.msk.bf16.mxu1 %vm6774_vm0, %v6773_v1 }
 0xfcf   :  { %6444 = vmatpush3.bf16.msra.mxu0 %v6730_v18  ;;  %6452 = vmatpush3.bf16.msra.mxu1 %v6731_v21 }
 0xfd0   :  { %6457 = vmatprep.subr.bf16.mxu0 %v6773_v1  ;;  %6463 = vmatprep.subr.bf16.mxu1 %v6773_v1 }
 0xfd2   :  { %6446 = vmatmul.mubr.msk.bf16.vlgmr.msra.gmra.mxu0 %vm235_vm1, %v7767_v29  ;;  %6454 = vmatmul.mubr.msk.bf16.vlgmr.msra.gmra.mxu1 %vm235_vm1, %v7767_v29 }
 0xfd3   :  { %6459 = vmatprep.mubr.msk.bf16.mxu0 %vm6774_vm0, %v6773_v1  ;;  %6465 = vmatprep.mubr.msk.bf16.mxu1 %vm6774_vm0, %v6773_v1 }
0x106a   :  { %v4221_v19 = vpop.f32.mrf.mxu0  ;;  %v4261_v20 = vpop.f32.mrf.mxu1 }
0x106b   :  { %v4222_v57 = vadd.f32 %v6734_v54, %v4221_v19  ;;  %v4262_v59 = vadd.f32 %v6735_v58, %v4261_v20  ;;  %v6740_v20 = vld [vmem:[%s8043_s8 + $0x8] ss:$0 sm:$0xff] }
0x106c   :  { %v6367_v52 = vpop.f32.mrf.mxu0  ;;  %v6375_v22 = vpop.f32.mrf.mxu1 }
0x106d   :  { %v4667_v6 = vpack.c.bf16 %v4222_v57, %v4222_v57  ;;  %v4668_v7 = vpack.c.bf16 %v4262_v59, %v4262_v59  ;;  %v6741_v22 = vld [vmem:[%s8043_s8 + $0x9] ss:$0 sm:$0xff] }
0x106e   :  { %v4224_v23 = vpop.f32.mrf.mxu0  ;;  %v4264_v24 = vpop.f32.mrf.mxu1 }
0x1070   :  { %v6368_v25 = vpop.f32.mrf.mxu0  ;;  %v6376_v26 = vpop.f32.mrf.mxu1 }
0x1072   :  { %v4301_v27 = vpop.f32.mrf.mxu0  ;;  %v4341_v30 = vpop.f32.mrf.mxu1 }
0x1073   :  { %v4302_v16 = vadd.f32 %v6738_v15, %v4301_v27  ;;  %v4342_v18 = vadd.f32 %v6739_v17, %v4341_v30 }
0x1074   :  { %v6383_v31 = vpop.f32.mrf.mxu0  ;;  %v6391_v32 = vpop.f32.mrf.mxu1 }
0x1075   :  { %v4669_v26 = vpack.c.bf16 %v4302_v16, %v4302_v16  ;;  %v4670_v27 = vpack.c.bf16 %v4342_v18, %v4342_v18 }
0x1076   :  { %v4304_v33 = vpop.f32.mrf.mxu0  ;;  %v4344_v62 = vpop.f32.mrf.mxu1 }
0x1078   :  { %v6384_v34 = vpop.f32.mrf.mxu0  ;;  %v6392_v35 = vpop.f32.mrf.mxu1 }
0x107a   :  { %v4381_v36 = vpop.f32.mrf.mxu0  ;;  %v4421_v28 = vpop.f32.mrf.mxu1 }
0x107b   :  { %v4382_v39 = vadd.f32 %v6732_v37, %v4381_v36  ;;  %v4422_v40 = vadd.f32 %v6733_v61, %v4421_v28 }
0x107c   :  { %v6399_v41 = vpop.f32.mrf.mxu0  ;;  %v6407_v38 = vpop.f32.mrf.mxu1 }
0x107d   :  { %v4671_v43 = vpack.c.bf16 %v4382_v39, %v4382_v39  ;;  %v4672_v45 = vpack.c.bf16 %v4422_v40, %v4422_v40 }
0x107e   :  { %v4384_v46 = vpop.f32.mrf.mxu0  ;;  %v4424_v48 = vpop.f32.mrf.mxu1 }
0x107f   :  { %v4679_v49 = vsel %vm907_vm2, %v4671_v43, 0  ;;  %v4725_v47 = vsel %vm907_vm2, %v4672_v45, 0 }
0x1080   :  { %v6400_v50 = vpop.f32.mrf.mxu0  ;;  %v6408_v53 = vpop.f32.mrf.mxu1  ;;  %6458 = vmatpush3.bf16.xpose.msra.mxu0 %v4679_v49  ;;  %6464 = vmatpush3.bf16.xpose.msra.mxu1 %v4725_v47 }
0x1081   :  { %6469 = vmatprep.subr.bf16.mxu0 %v6773_v1  ;;  %6475 = vmatprep.subr.bf16.mxu1 %v6773_v1 }
0x1082   :  { %v4461_v60 = vpop.f32.mrf.mxu0  ;;  %v4501_v29 = vpop.f32.mrf.mxu1 }
0x1083   :  { %v4462_v0 = vadd.f32 %v6736_v63, %v4461_v60  ;;  %v4502_v4 = vadd.f32 %v6737_v3, %v4501_v29 }
0x1084   :  { %v6415_v5 = vpop.f32.mrf.mxu0  ;;  %v6423_v2 = vpop.f32.mrf.mxu1 }
0x1085   :  { %v4673_v56 = vpack.c.bf16 %v4462_v0, %v4462_v0  ;;  %v4674_v8 = vpack.c.bf16 %v4502_v4, %v4502_v4 }
0x1086   :  { %v4464_v9 = vpop.f32.mrf.mxu0  ;;  %v4504_v10 = vpop.f32.mrf.mxu1 }
0x1087   :  { %v4771_v11 = vsel %vm907_vm2, %v4673_v56, 0  ;;  %v4817_v12 = vsel %vm907_vm2, %v4674_v8, 0  ;;  %6460 = vmatmul.mubr.msk.bf16.vlgmr.msra.gmra.mxu0 %vm907_vm2, %v4667_v6  ;;  %6466 = vmatmul.mubr.msk.bf16.vlgmr.msra.gmra.mxu1 %vm907_vm2, %v4668_v7 }
0x1088   :  { %v6416_v13 = vpop.f32.mrf.mxu0  ;;  %v6424_v14 = vpop.f32.mrf.mxu1  ;;  %6470 = vmatpush3.bf16.xpose.msra.mxu0 %v4771_v11  ;;  %6476 = vmatpush3.bf16.xpose.msra.mxu1 %v4817_v12 }
0x1089   :  { %6471 = vmatprep.mubr.msk.bf16.mxu0 %vm6774_vm0, %v6773_v1  ;;  %6477 = vmatprep.mubr.msk.bf16.mxu1 %vm6774_vm0, %v6773_v1 }
0x108a   :  { %v4541_v21 = vpop.f32.mrf.mxu0  ;;  %v4581_v19 = vpop.f32.mrf.mxu1  ;;  %6481 = vmatprep.subr.bf16.mxu0 %v6773_v1  ;;  %6487 = vmatprep.subr.bf16.mxu1 %v6773_v1 }
0x108b   :  { %v4542_v52 = vadd.f32 %v6740_v20, %v4541_v21  ;;  %v4582_v23 = vadd.f32 %v6741_v22, %v4581_v19 }
0x108c   :  { %v6431_v24 = vpop.f32.mrf.mxu0  ;;  %v6439_v25 = vpop.f32.mrf.mxu1 }
0x108d   :  { %v4907_v30 = vpack.c.bf16 %v4542_v52, %v4542_v52  ;;  %v4908_v31 = vpack.c.bf16 %v4582_v23, %v4582_v23 }
0x108e   :  { %v4544_v32 = vpop.f32.mrf.mxu0  ;;  %v4584_v33 = vpop.f32.mrf.mxu1 }
0x108f   :  { %v4915_v62 = vsel %vm1147_vm3, %v4907_v30, 0  ;;  %v4961_v34 = vsel %vm1147_vm3, %v4908_v31, 0  ;;  %6472 = vmatmul.mubr.msk.bf16.vlgmr.msra.gmra.mxu0 %vm907_vm2, %v4669_v26  ;;  %6478 = vmatmul.mubr.msk.bf16.vlgmr.msra.gmra.mxu1 %vm907_vm2, %v4670_v27  ;;  %v6742_v31 = vld [vmem:[%s8043_s8 + $0xb] ss:$0 sm:$0xff]  ;;  %v6743_v33 = vld [vmem:[%s8043_s8 + $0xa] ss:$0 sm:$0xff] }
0x1090   :  { %v6432_v35 = vpop.f32.mrf.mxu0  ;;  %v6440_v36 = vpop.f32.mrf.mxu1  ;;  %6482 = vmatpush3.bf16.msra.mxu0 %v4915_v62  ;;  %6488 = vmatpush3.bf16.msra.mxu1 %v4961_v34 }
0x1091   :  { %6483 = vmatprep.mubr.msk.bf16.mxu0 %vm6774_vm0, %v6773_v1  ;;  %6489 = vmatprep.mubr.msk.bf16.mxu1 %vm6774_vm0, %v6773_v1 }
0x1092   :  { %v7949_v28 = vpop.f32.mrf.mxu0  ;;  %v7951_v37 = vpop.f32.mrf.mxu1  ;;  %6493 = vmatprep.subr.bf16.mxu0 %v6773_v1  ;;  %6499 = vmatprep.subr.bf16.mxu1 %v6773_v1 }
0x1093   :  { %v4662_v32 = vadd.f32 %v6742_v31, %v7951_v37  ;;  %v4622_v62 = vadd.f32 %v6743_v33, %v7949_v28 }
0x1094   :  { %v6447_v39 = vpop.f32.mrf.mxu0  ;;  %v6455_v61 = vpop.f32.mrf.mxu1 }
0x1095   :  { %v4910_v36 = vpack.c.bf16 %v4662_v32, %v4662_v32  ;;  %v4909_v61 = vpack.c.bf16 %v4622_v62, %v4622_v62  ;;  %v6749_v62 = vld [vmem:[%s8047_s12] ss:$0 sm:$0xff] }
0x1096   :  { %v4624_v40 = vpop.f32.mrf.mxu0  ;;  %v4664_v41 = vpop.f32.mrf.mxu1 }
0x1097   :  { %v5007_v37 = vsel %vm1147_vm3, %v4909_v61, 0 }
0x1098   :  { %v6448_v38 = vpop.f32.mrf.mxu0  ;;  %v6456_v43 = vpop.f32.mrf.mxu1 }
0x1099   :  { %v5053_v43 = vsel %vm1147_vm3, %v4910_v36, 0 }
0x1147   :  { %v4715_v45 = vpop.f32.mrf.mxu0  ;;  %v4761_v46 = vpop.f32.mrf.mxu1 }
0x1148   :  { %v4862_v48 = vsel %vm907_vm2, %v4761_v46, -inf  ;;  %v4859_v49 = vsel %vm907_vm2, %v4715_v45, -inf }
0x1149   :  { %4863 = vmax.xlane.f32.xlu1 %v4862_v48  ;;  %v6467_v47 = vpop.f32.mrf.mxu1  ;;  %4860 = vmax.xlane.f32.xlu0 %v4859_v49  ;;  %v6461_v50 = vpop.f32.mrf.mxu0 }
0x114b   :  { %v4718_v53 = vpop.f32.mrf.mxu0  ;;  %v4764_v54 = vpop.f32.mrf.mxu1 }
0x114d   :  { %v6462_v57 = vpop.f32.mrf.mxu0  ;;  %v6468_v58 = vpop.f32.mrf.mxu1 }
0x114f   :  { %v4807_v59 = vpop.f32.mrf.mxu0  ;;  %v4853_v60 = vpop.f32.mrf.mxu1 }
0x1150   :  { %v4868_v29 = vsel %vm907_vm2, %v4853_v60, -inf  ;;  %v4865_v63 = vsel %vm907_vm2, %v4807_v59, -inf }
0x1151   :  { %4869 = vmax.xlane.f32.xlu1 %v4868_v29  ;;  %v6479_v0 = vpop.f32.mrf.mxu1  ;;  %4866 = vmax.xlane.f32.xlu0 %v4865_v63  ;;  %v6473_v3 = vpop.f32.mrf.mxu0 }
0x1153   :  { %v4810_v4 = vpop.f32.mrf.mxu0  ;;  %v4856_v5 = vpop.f32.mrf.mxu1 }
0x1155   :  { %v6474_v2 = vpop.f32.mrf.mxu0  ;;  %v6480_v6 = vpop.f32.mrf.mxu1 }
0x1156   :  { %v6744_v2 = vld [vmem:[%s8048_s13 + $0x8] sm:$0xff]  }
0x11d2   :  { %v4864_v7 = vpop.xlane.xlu1 %4863  ;;  %v4861_v56 = vpop.xlane.xlu0 %4860 }
0x11d3   :  { %v4872_v8 = vsub.f32 %v4761_v46, %v4864_v7  ;;  %v4871_v9 = vsub.f32 %v4715_v45, %v4861_v56  ;;  %v6745_v7 = vld [vmem:[%s8046_s11 + $0x8] sm:$0xff]  }
0x11d5   :  { %v4877_v10 = vmul.f32 1.442695, %v4872_v8  ;;  %v4875_v11 = vmul.f32 1.442695, %v4871_v9  ;;  %v6746_v9 = vld [vmem:[%s8048_s13] sm:$0xff]  }
0x11d7   :  { %6652 = vpow2.f32 %v4877_v10  ;;  %v6747_v10 = vld [vmem:[%s8046_s11] sm:$0xff]  }
0x11d8   :  { %6654 = vpow2.f32 %v4875_v11 }
0x11da   :  { %v4870_v12 = vpop.xlane.xlu1 %4869  ;;  %v4867_v13 = vpop.xlane.xlu0 %4866 }
0x11db   :  { %v4874_v14 = vsub.f32 %v4853_v60, %v4870_v12  ;;  %v4873_v15 = vsub.f32 %v4807_v59, %v4867_v13 }
0x11dd   :  { %v4881_v16 = vmul.f32 1.442695, %v4874_v14  ;;  %v4879_v17 = vmul.f32 1.442695, %v4873_v15 }
0x11df   :  { %6656 = vpow2.f32 %v4881_v16 }
0x11e0   :  { %6658 = vpow2.f32 %v4879_v17 }
0x11e4   :  { %v6653_v18 = vpop.eup %6652 }
0x11e5   :  { %v6655_v21 = vpop.eup %6654  ;;  %v4886_v19 = vsel %vm907_vm2, %v6653_v18, 0.0 }
0x11e6   :  { %4887 = vadd.xlane.f32.xlu1 %v4886_v19  ;;  %v4883_v20 = vsel %vm907_vm2, %v6655_v21, 0.0 }
0x11e7   :  { %4884 = vadd.xlane.f32.xlu0 %v4883_v20 }
0x11ec   :  { %v6657_v52 = vpop.eup %6656 }
0x11ed   :  { %v6659_v22 = vpop.eup %6658  ;;  %v4892_v23 = vsel %vm907_vm2, %v6657_v52, 0.0 }
0x11ee   :  { %4893 = vadd.xlane.f32.xlu1 %v4892_v23  ;;  %v4889_v24 = vsel %vm907_vm2, %v6659_v22, 0.0 }
0x11ef   :  { %4890 = vadd.xlane.f32.xlu0 %v4889_v24 }
0x126f   :  { %v4888_v25 = vpop.xlane.xlu1 %4887 }
0x1270   :  { %6660 = vrcp.f32 %v4888_v25  ;;  %v4885_v26 = vpop.xlane.xlu0 %4884 }
0x1271   :  { %6662 = vrcp.f32 %v4885_v26  ;;  %v6748_v26 = vld [vmem:[%s8045_s10] ss:$0 sm:$0xff]  ;;  %s6775_s10 = smov [#allocation2]  }
0x1272   :  { %s5371_s26 = sshll.u32 %s6775_s10, 4  ;;  %s5372_s26 = int_to_ptr.vmem [resolvable:$true] %s5371_s26 }
0x1273   :  { %s6751_s12 = scalar_lea.vmem %s5372_s26, 256  ;;  %p6756_p1 = scmp.lt.s32.totalorder %s5372_s26, %s5372_s26 }
0x1274   :  { %p6752_p0 = scmp.ne.s32.totalorder %s5372_s26, %s6751_s12  ;;  %p6757_p2 = scmp.lt.s32.totalorder %s6751_s12, %s6751_s12 }
0x1276   :  { %p6758_p3 = por %p6757_p2, %p6756_p1 }
0x1277   :  { %v4894_v27 = vpop.xlane.xlu1 %4893 }
0x1278   :  { %6664 = vrcp.f32 %v4894_v27  ;;  %v4891_v30 = vpop.xlane.xlu0 %4890  ;;  %p6759_p4 = pnand %p6758_p3, %p6752_p0 }
0x1279   :  { %6666 = vrcp.f32 %v4891_v30 }
0x127d   :  { %v6661_v34 = vpop.eup %6660 }
0x127e   :  { %v6663_v35 = vpop.eup %6662  ;;  %v4900_v39 = vmul.f32 %v6661_v34, %v6653_v18 }
0x127f   :  { %v4899_v40 = vmul.f32 %v6663_v35, %v6655_v21 }
0x1280   :  { %v4904_v41 = vpack.c.bf16 %v4900_v39, %v4900_v39 }
0x1281   :  { %v4903_v38 = vpack.c.bf16 %v4899_v40, %v4899_v40 }
0x1282   :  { %6490 = vmatmul.mubr.msk.bf16.vlgmr.msra.gmra.mxu1 %vm907_vm2, %v4904_v41 }
0x1283   :  { %6484 = vmatmul.mubr.msk.bf16.vlgmr.msra.gmra.mxu0 %vm907_vm2, %v4903_v38  ;;  %6500 = vmatpush3.bf16.msra.mxu1 %v5053_v43  ;;  %v6750_v38 = vld [vmem:[%s8049_s14] ss:$0 sm:$0xff] }
0x1284   :  { %6494 = vmatpush3.bf16.msra.mxu0 %v5007_v37  ;;  %6495 = vmatprep.mubr.msk.bf16.mxu0 %vm6774_vm0, %v6773_v1 }
0x1285   :  { %v6665_v28 = vpop.eup %6664  ;;  %6501 = vmatprep.mubr.msk.bf16.mxu1 %vm6774_vm0, %v6773_v1  ;;  %6505 = vmatprep.subr.bf16.mxu0 %v6773_v1 }
0x1286   :  { %v6667_v45 = vpop.eup %6666  ;;  %v4902_v46 = vmul.f32 %v6665_v28, %v6657_v52  ;;  %6511 = vmatprep.subr.bf16.mxu1 %v6773_v1 }
0x1287   :  { %v4901_v48 = vmul.f32 %v6667_v45, %v6659_v22 }
0x1288   :  { %v4906_v49 = vpack.c.bf16 %v4902_v46, %v4902_v46 }
0x1289   :  { %v4905_v47 = vpack.c.bf16 %v4901_v48, %v4901_v48 }
0x128a   :  { %6502 = vmatmul.mubr.msk.bf16.vlgmr.msra.gmra.mxu1 %vm907_vm2, %v4906_v49 }
0x128b   :  { %6496 = vmatmul.mubr.msk.bf16.vlgmr.msra.gmra.mxu0 %vm907_vm2, %v4905_v47  ;;  %6512 = vmatpush3.bf16.msra.mxu1 %v7404_v44 }
0x128c   :  { %6506 = vmatpush3.bf16.msra.mxu0 %v7401_v42  ;;  %6507 = vmatprep.mubr.msk.bf16.mxu0 %vm6774_vm0, %v6773_v1 }
0x128d   :  { %6513 = vmatprep.mubr.msk.bf16.mxu1 %vm6774_vm0, %v6773_v1  ;;  %6517 = vmatprep.subr.bf16.mxu0 %v6773_v1 }
0x128e   :  { %6523 = vmatprep.subr.bf16.mxu1 %v6773_v1 }
0x1342   :  { %v4997_v50 = vpop.f32.mrf.mxu1 }
0x1343   :  { %v4951_v53 = vpop.f32.mrf.mxu0  ;;  %v5096_v54 = vpack.c.bf16 %v4997_v50, %v4997_v50 }
0x1344   :  { %v5095_v57 = vpack.c.bf16 %v4951_v53, %v4951_v53  ;;  %v6491_v58 = vpop.f32.mrf.mxu1 }
0x1345   :  { %v6485_v59 = vpop.f32.mrf.mxu0  ;;  %6514 = vmatmul.mubr.msk.bf16.vlgmr.msra.gmra.mxu1 %vm907_vm2, %v5096_v54 }
0x1346   :  { %6508 = vmatmul.mubr.msk.bf16.vlgmr.msra.gmra.mxu0 %vm907_vm2, %v5095_v57  ;;  %v5000_v42 = vpop.f32.mrf.mxu1  ;;  %6524 = vmatpush3.bf16.msra.mxu1 %v7426_v55 }
0x1347   :  { %v4954_v44 = vpop.f32.mrf.mxu0  ;;  %6518 = vmatpush3.bf16.msra.mxu0 %v7423_v51  ;;  %6519 = vmatprep.mubr.msk.bf16.mxu0 %vm6774_vm0, %v6773_v1 }
0x1348   :  { %v6492_v60 = vpop.f32.mrf.mxu1  ;;  %6525 = vmatprep.mubr.msk.bf16.mxu1 %vm6774_vm0, %v6773_v1  ;;  %6529 = vmatprep.subr.bf16.mxu0 %v6773_v1 }
0x1349   :  { %v6486_v29 = vpop.f32.mrf.mxu0  ;;  %6537 = vmatprep.subr.bf16.mxu1 %v6773_v1 }
0x134a   :  { %v5089_v63 = vpop.f32.mrf.mxu1 }
0x134b   :  { %v5043_v0 = vpop.f32.mrf.mxu0  ;;  %v5098_v3 = vpack.c.bf16 %v5089_v63, %v5089_v63 }
0x134c   :  { %v5097_v4 = vpack.c.bf16 %v5043_v0, %v5043_v0  ;;  %v6503_v55 = vpop.f32.mrf.mxu1 }
0x134d   :  { %v6497_v5 = vpop.f32.mrf.mxu0  ;;  %6526 = vmatmul.mubr.msk.bf16.vlgmr.msra.gmra.mxu1 %vm907_vm2, %v5098_v3 }
0x134e   :  { %6520 = vmatmul.mubr.msk.bf16.vlgmr.msra.gmra.mxu0 %vm907_vm2, %v5097_v4  ;;  %v5092_v51 = vpop.f32.mrf.mxu1  ;;  %6538 = vmatpush3.bf16.msra.mxu1 %v6744_v2 }
0x134f   :  { %v5046_v6 = vpop.f32.mrf.mxu0  ;;  %6530 = vmatpush3.bf16.msra.mxu0 %v6745_v7  ;;  %6533 = vmatprep.mubr.msk.bf16.mxu0 %vm6774_vm0, %v6773_v1 }
0x1350   :  { %v6504_v56 = vpop.f32.mrf.mxu1  ;;  %6531 = vmatprep.subr.bf16.mxu0 %v6773_v1  ;;  %6539 = vmatprep.subr.bf16.mxu1 %v6773_v1 }
0x1351   :  { %v6498_v8 = vpop.f32.mrf.mxu0  ;;  %6541 = vmatprep.mubr.msk.bf16.mxu1 %vm6774_vm0, %v6773_v1 }
0x1352   :  { %6540 = vmatpush3.bf16.msra.mxu1 %v6746_v9 }
0x1353   :  { %6532 = vmatpush3.bf16.msra.mxu0 %v6747_v10 }
0x1405   :  { %v5179_v11 = vpop.f32.mrf.mxu1 }
0x1406   :  { %v5136_v12 = vpop.f32.mrf.mxu0 }
0x1407   :  { %v6515_v13 = vpop.f32.mrf.mxu1  ;;  %v5272_v21 = vadd.f32 %v5179_v11, %v5136_v12 }
0x1408   :  { %v6509_v14 = vpop.f32.mrf.mxu0 }
0x1409   :  { %v5182_v15 = vpop.f32.mrf.mxu1 }
0x140a   :  { %v5139_v16 = vpop.f32.mrf.mxu0 }
0x140b   :  { %v6516_v17 = vpop.f32.mrf.mxu1 }
0x140c   :  { %v6510_v18 = vpop.f32.mrf.mxu0 }
0x140d   :  { %v5265_v1 = vpop.f32.mrf.mxu1 }
0x140e   :  { %v5222_v19 = vpop.f32.mrf.mxu0 }
0x140f   :  { %v5273_v20 = vadd.f32 %v5272_v21, %v5222_v19  ;;  %v6527_v52 = vpop.f32.mrf.mxu1 }
0x1410   :  { %v6521_v22 = vpop.f32.mrf.mxu0 }
0x1411   :  { %v5274_v23 = vadd.f32 %v5273_v20, %v5265_v1  ;;  %v5268_v24 = vpop.f32.mrf.mxu1 }
0x1412   :  { %v5225_v25 = vpop.f32.mrf.mxu0 }
0x1413   :  { %v5275_v27 = vadd.f32 %v6748_v26, %v5274_v23  ;;  %v6528_v30 = vpop.f32.mrf.mxu1 }
0x1414   :  { %v6522_v31 = vpop.f32.mrf.mxu0 }
0x1415   :  { %v5276_v32 = vpack.c.bf16 %v5275_v27, %v5275_v27 }
0x1417   :  { %6534 = vmatmul.mubr.msk.bf16.vlgmr.msra.gmra.mxu0 %vm235_vm1, %v5276_v32 }
0x14d7   :  { %v5314_v33 = vpop.f32.mrf.mxu0 }
0x14d8   :  { %v5315_v34 = vadd.f32 %v6749_v62, %v5314_v33 }
0x14d9   :  { %v6535_v35 = vpop.f32.mrf.mxu0 }
0x14da   :  { %v5320_v36 = vmax.f32 %v5315_v34, 0.0 }
0x14db   :  { %v5317_v39 = vpop.f32.mrf.mxu0 }
0x14dc   :  { %v5321_v61 = vpack.c.bf16 %v5320_v36, %v5320_v36 }
0x14dd   :  { %v6536_v40 = vpop.f32.mrf.mxu0 }
0x14de   :  { %6542 = vmatmul.mubr.msk.bf16.vlgmr.msra.gmra.mxu1 %vm235_vm1, %v5321_v61 }
0x159e   :  { %v5359_v41 = vpop.f32.mrf.mxu1 }
0x159f   :  { %v5360_v43 = vadd.f32 %v6750_v38, %v5359_v41 }
0x15a0   :  { %v6543_v37 = vpop.f32.mrf.mxu1 }
0x15a1   :  { %5365 = vst [vmem:[#allocation2 + $0x8] sm:$0xff] %v5360_v43 }
0x15a2   :  { %v5362_v28 = vpop.f32.mrf.mxu1 }
0x15a3   :  { %6762 = shalt.err (!%p6759_p4)
}
0x15a4   :  { %s6776_s28 = smov 128   ;;  %s6777_s0 = smov 8   ;;  %v6544_v45 = vpop.f32.mrf.mxu1 }
0x15a5   :  { %5377 = dma.vmem_to_hbm [thread:$0]  %s5372_s26, 256, %s8050_s15, [#allocation3], %s6776_s28, %s6776_s28, %s6777_s0  }
0x15a6   :  { %6771 = dma.done.wait [#allocation3], 256  }
0x15a7   :  { %6772 = vsyncadd [#allocation3], 4294967040 }
0x15a8   :  { %5381 = vsyncpa [#allocation3], 1 }

</bundles_post_ra>
